<compile_context>
chip_gen: v7x
topology: tpu7x:2x2x1
jax: 0.10.0
libtpu: 0.0.40
codegen_flags: <defaults>
</compile_context>

<pallas_src>
import math

import jax
import jax.numpy as jnp
from jax import lax
from jax.experimental import pallas as pl
from jax.experimental.pallas import tpu as pltpu

_MiB = 1024 * 1024


# ----------------------------------------------------------------------------
# Generation-aware VMEM budgeting
# ----------------------------------------------------------------------------
def _vmem_config():
    """Returns (vmem_budget_bytes, vmem_limit_bytes, num_tensorcores)."""
    try:
        info = pltpu.get_tpu_info()
        cap = int(getattr(info, "vmem_capacity_bytes", 64 * _MiB))
    except Exception:                       # query unavailable -> conservative everywhere
        cap = 64 * _MiB
    if cap <= 80 * _MiB:                    # v7x-class: 64 MiB VMEM per TC, 2 TCs/chip
        return 40 * _MiB, 56 * _MiB, 2
    return 80 * _MiB, 100 * _MiB, 1         # v5e / v6e: 128 MiB VMEM, 1 TC/chip


def _round_up(x, m):
    return -(-x // m) * m


def _pick_block_n(N, per_row_bytes, fixed_bytes, budget_bytes, num_tc):
    """Largest batch tile fitting the VMEM budget; keeps >=num_tc grid steps on multi-TC chips."""
    avail = budget_bytes - fixed_bytes
    bn = max(16, (avail // max(per_row_bytes, 1)) // 16 * 16)
    if num_tc > 1 and N > 16:
        bn = min(bn, _round_up(-(-N // num_tc), 16))   # grid >= num_tc -> both TCs busy
    return max(1, min(N, bn))


def _gru_fixed_bytes(Din, H):
    weights = (Din * 6 * H + 2 * H * 3 * H) * 2 * 2     # bf16 weights (double-buffered)
    chunk_tmp = 2048 * (2 * Din + 36 * H)               # hoisted-matmul per-chunk transients
    return weights + chunk_tmp + 4 * _MiB               # + Mosaic internal slack


# ----------------------------------------------------------------------------
# Shared bidirectional-GRU recurrence (time-major, chunked hoisted input matmul)
# ----------------------------------------------------------------------------
def _bigru_recurrence(x_ref, lens_ref, wih_ref, whhf_ref, whhb_ref,
                      bih_ref, bhhf_ref, bhhb_ref,
                      gi_scr, feat_f_ref, feat_b_ref):
    """Writes forward features into feat_f_ref[t] and backward into feat_b_ref[t].

    x_ref    : (T, Nb, Din)  time-major inputs (bf16)
    lens_ref : (Nb, 1)       valid lengths, f32
    wih_ref  : (Din, 6H)     [fwd | bwd] input weights, pre-transposed, bf16
    whh*_ref : (H, 3H)       recurrent weights, pre-transposed, bf16
    bih_ref  : (1, 6H) f32 ; bhh*_ref : (1, 3H) f32
    gi_scr   : (T, Nb, 6H)   bf16 scratch for the hoisted input gates
    feat_*   : (T, Nb, H)
    """
    T, Nb, Din = x_ref.shape
    H = whhf_ref.shape[0]
    G = 6 * H

    # Hoisted input-gate matmul, chunked over T so temporaries stay bounded (~2K rows/chunk)
    # and MXU streaming overlaps the gi_scr stores.
    wih = wih_ref[...]
    bih = bih_ref[...]
    chunk = max(1, min(T, -(-2048 // Nb)))
    for c0 in range(0, T, chunk):
        csz = min(chunk, T - c0)
        xc = x_ref[pl.ds(c0, csz)].reshape(csz * Nb, Din).astype(jnp.bfloat16)
        gi_c = jnp.dot(xc, wih, preferred_element_type=jnp.float32) + bih
        gi_scr[pl.ds(c0, csz)] = gi_c.reshape(csz, Nb, G).astype(jnp.bfloat16)

    whh_f = whhf_ref[...]                                    # bf16 (H, 3H)
    whh_b = whhb_ref[...]
    bhh_f = jnp.broadcast_to(bhhf_ref[...], (Nb, 3 * H))     # broadcast hoisted out of loop
    bhh_b = jnp.broadcast_to(bhhb_ref[...], (Nb, 3 * H))
    lens = lens_ref[...]                                     # (Nb, 1) f32
    f_dt = feat_f_ref.dtype

    def gru_cell(gi_t, h, whh_T, bhh):
        gh = jnp.dot(h.astype(jnp.bfloat16), whh_T,
                     preferred_element_type=jnp.float32) + bhh
        gi32 = gi_t.astype(jnp.float32)
        r = jax.nn.sigmoid(gi32[:, 0 * H:1 * H] + gh[:, 0 * H:1 * H])
        z = jax.nn.sigmoid(gi32[:, 1 * H:2 * H] + gh[:, 1 * H:2 * H])
        n = jnp.tanh(gi32[:, 2 * H:3 * H] + r * gh[:, 2 * H:3 * H])
        return (1.0 - z) * n + z * h

    def step(t, carry):
        h_f, h_b = carry
        tb = T - 1 - t
        # --- forward direction, timestep t (carry not gated: held state never emitted) ---
        gi_t = gi_scr[t]                                               # (Nb, 6H) bf16
        m_t = (t.astype(jnp.float32) < lens).astype(jnp.float32)       # (Nb, 1)
        h_f = gru_cell(gi_t[:, :3 * H], h_f, whh_f, bhh_f)
        feat_f_ref[t] = (h_f * m_t).astype(f_dt)                       # zero-pad like pad_packed
        # --- backward direction, timestep T-1-t (interleaved for VLIW slot fill) ---
        gi_tb = gi_scr[tb]
        m_tb = (tb.astype(jnp.float32) < lens).astype(jnp.float32)
        hb_new = gru_cell(gi_tb[:, 3 * H:], h_b, whh_b, bhh_b)
        h_b = m_tb * hb_new + (1.0 - m_tb) * h_b                       # stays 0 until last valid step
        feat_b_ref[tb] = h_b.astype(f_dt)
        return (h_f, h_b)

    h0 = jnp.zeros((Nb, H), jnp.float32)
    lax.fori_loop(0, T, step, (h0, h0))


# ----------------------------------------------------------------------------
# Kernels
# ----------------------------------------------------------------------------
def _bigru_kernel(x_ref, lens_ref, wih_ref, whhf_ref, whhb_ref,
                  bih_ref, bhhf_ref, bhhb_ref, out_ref,
                  gi_scr, featf_scr, featb_scr):
    _bigru_recurrence(x_ref, lens_ref, wih_ref, whhf_ref, whhb_ref,
                      bih_ref, bhhf_ref, bhhb_ref, gi_scr, featf_scr, featb_scr)
    H = featf_scr.shape[-1]
    # Two large one-shot stores (outside the serial loop) instead of per-step offset stores.
    out_ref[:, :, 0:H] = featf_scr[...]
    out_ref[:, :, H:2 * H] = featb_scr[...]


def _bigru_attn_kernel(x_ref, lens_ref, wih_ref, whhf_ref, whhb_ref,
                       bih_ref, bhhf_ref, bhhb_ref,
                       gamma_ref, beta_ref, watt_ref, batt_ref, ctx_ref, mask_ref,
                       pooled_ref, w_ref,
                       gi_scr, featf_scr, featb_scr):
    _bigru_recurrence(x_ref, lens_ref, wih_ref, whhf_ref, whhb_ref,
                      bih_ref, bhhf_ref, bhhb_ref, gi_scr, featf_scr, featb_scr)

    feat_f = featf_scr[...]                                   # (T, Nb, H) f32
    feat_b = featb_scr[...]
    T, Nb, H = feat_f.shape
    D = 2 * H
    A = watt_ref.shape[1]
    mask = mask_ref[...]                                      # (T, Nb) time-major, 1.0 = valid

    # LayerNorm (eps=1e-5) over the full 2H feature, computed from the two halves; LN only
    # feeds the attention scores (pooling uses raw features, as in the reference).
    mu = (jnp.sum(feat_f, -1, keepdims=True) + jnp.sum(feat_b, -1, keepdims=True)) / D
    var = (jnp.sum((feat_f - mu) ** 2, -1, keepdims=True)
           + jnp.sum((feat_b - mu) ** 2, -1, keepdims=True)) / D
    inv = lax.rsqrt(var + 1e-5)
    gamma = gamma_ref[...]
    beta = beta_ref[...]
    nf = (feat_f - mu) * inv * gamma[:, :H].reshape(1, 1, H) + beta[:, :H].reshape(1, 1, H)
    nb = (feat_b - mu) * inv * gamma[:, H:].reshape(1, 1, H) + beta[:, H:].reshape(1, 1, H)

    watt = watt_ref[...]                                      # (2H, A) bf16
    a = jnp.tanh(
        jnp.dot(nf.reshape(T * Nb, H).astype(jnp.bfloat16), watt[0:H, :],
                preferred_element_type=jnp.float32)
        + jnp.dot(nb.reshape(T * Nb, H).astype(jnp.bfloat16), watt[H:2 * H, :],
                  preferred_element_type=jnp.float32)
        + batt_ref[...])
    # Context projection as multiply + lane reduce (a 1-column MXU output wastes the array).
    score = jnp.sum(a.reshape(T, Nb, A) * ctx_ref[...].reshape(1, 1, A), axis=-1)   # (T, Nb)

    neg = jnp.float32(-3.0e38)
    smax = jnp.max(jnp.where(mask > 0, score, neg), axis=0, keepdims=True)          # per-seq max
    e = jnp.exp(jnp.where(mask > 0, score - smax, 0.0)) * mask
    denom = jnp.maximum(jnp.sum(e, axis=0, keepdims=True), 1e-12)                    # guard empty rows
    w = e * pl.reciprocal(denom, approx=True)                                        # EUP divide

    pooled_f = jnp.sum(feat_f * w[:, :, None], axis=0)                               # (Nb, H)
    pooled_b = jnp.sum(feat_b * w[:, :, None], axis=0)
    pooled_ref[:, 0:H] = pooled_f.astype(pooled_ref.dtype)
    pooled_ref[:, H:2 * H] = pooled_b.astype(pooled_ref.dtype)
    w_ref[...] = w


# ----------------------------------------------------------------------------
# Wrappers
# ----------------------------------------------------------------------------
def _const_spec(arr):
    nd = arr.ndim
    return pl.BlockSpec(arr.shape, lambda i, _nd=nd: (0,) * _nd)


def _gru_in_specs(layer, T, bn, Din):
    return [
        pl.BlockSpec((T, bn, Din), lambda i: (0, i, 0)),   # x, time-major, tiled over N
        pl.BlockSpec((bn, 1), lambda i: (i, 0)),           # per-sequence lengths
        _const_spec(layer["wih_T"]),
        _const_spec(layer["whh_f_T"]),
        _const_spec(layer["whh_b_T"]),
        _const_spec(layer["bih"]),
        _const_spec(layer["bhh_f"]),
        _const_spec(layer["bhh_b"]),
    ]


def _gru_args(layer):
    return (layer["wih_T"], layer["whh_f_T"], layer["whh_b_T"],
            layer["bih"], layer["bhh_f"], layer["bhh_b"])


def bigru_layer(x_tm, lens, layer):
    """x_tm: (T, N, Din) time-major bf16, lens: (N, 1) f32. Returns (T, N, 2H) bf16."""
    T, N, Din = x_tm.shape
    H = layer["whh_f_T"].shape[0]
    budget, vlimit, num_tc = _vmem_config()
    # per-row bytes: x(bf16,x2) + out(bf16,x2) + gi(bf16) + feat scratches(bf16)
    per_row = T * (4 * Din + 24 * H)
    bn = _pick_block_n(N, per_row, _gru_fixed_bytes(Din, H), budget, num_tc)
    return pl.pallas_call(
        _bigru_kernel,
        out_shape=jax.ShapeDtypeStruct((T, N, 2 * H), jnp.bfloat16),
        grid_spec=pltpu.PrefetchScalarGridSpec(
            num_scalar_prefetch=0,
            grid=(pl.cdiv(N, bn),),
            in_specs=_gru_in_specs(layer, T, bn, Din),
            out_specs=pl.BlockSpec((T, bn, 2 * H), lambda i: (0, i, 0)),
            scratch_shapes=[pltpu.VMEM((T, bn, 6 * H), jnp.bfloat16),   # hoisted input gates
                            pltpu.VMEM((T, bn, H), jnp.bfloat16),       # forward features
                            pltpu.VMEM((T, bn, H), jnp.bfloat16)],      # backward features
        ),
        compiler_params=pltpu.CompilerParams(
            dimension_semantics=("parallel",),
            vmem_limit_bytes=vlimit),
    )(x_tm, lens, *_gru_args(layer))


def bigru_attention_layer(x_tm, lens, mask_tm, layer, att, *, out_dtype=jnp.float32):
    """Last BiGRU layer fused with LayerNorm + attention + masked softmax pooling.

    x_tm: (T, N, Din) bf16 time-major, lens: (N, 1) f32, mask_tm: (T, N) f32.
    Returns pooled (N, 2H) out_dtype and attention weights (T, N) f32 time-major.
    """
    T, N, Din = x_tm.shape
    H = layer["whh_f_T"].shape[0]
    D = 2 * H
    A = att["watt_T"].shape[1]
    budget, vlimit, num_tc = _vmem_config()
    # per-row bytes: x(bf16,x2) + mask(x2) + gi(bf16) + feat(f32) + w(x2) + epilogue temporaries
    per_row = T * (4 * Din + 32 * H + 6 * A + 48)
    fixed = _gru_fixed_bytes(Din, H) + (D * A * 2 + 4 * A * 4) * 2
    bn = _pick_block_n(N, per_row, fixed, budget, num_tc)

    in_specs = _gru_in_specs(layer, T, bn, Din) + [
        _const_spec(att["gamma"]), _const_spec(att["beta"]),
        _const_spec(att["watt_T"]), _const_spec(att["batt"]),
        _const_spec(att["ctx"]),
        pl.BlockSpec((T, bn), lambda i: (0, i)),            # time-major validity mask
    ]
    return pl.pallas_call(
        _bigru_attn_kernel,
        out_shape=(jax.ShapeDtypeStruct((N, D), out_dtype),
                   jax.ShapeDtypeStruct((T, N), jnp.float32)),
        grid_spec=pltpu.PrefetchScalarGridSpec(
            num_scalar_prefetch=0,
            grid=(pl.cdiv(N, bn),),
            in_specs=in_specs,
            out_specs=(pl.BlockSpec((bn, D), lambda i: (i, 0)),
                       pl.BlockSpec((T, bn), lambda i: (0, i))),
            scratch_shapes=[pltpu.VMEM((T, bn, 6 * H), jnp.bfloat16),   # hoisted input gates
                            pltpu.VMEM((T, bn, H), jnp.float32),        # forward features
                            pltpu.VMEM((T, bn, H), jnp.float32)],       # backward features
        ),
        compiler_params=pltpu.CompilerParams(
            dimension_semantics=("parallel",),
            vmem_limit_bytes=vlimit),
    )(x_tm, lens, *_gru_args(layer),
      att["gamma"], att["beta"], att["watt_T"], att["batt"], att["ctx"], mask_tm)


# ----------------------------------------------------------------------------
# Parameter construction (deterministic, PyTorch module shapes, kernel layout)
# ----------------------------------------------------------------------------
def init_params(key, vocab_size, embed_dim, word_H, sent_H,
                word_layers, sent_layers, word_att_dim, sent_att_dim):
    keys = iter(jax.random.split(key, 256))

    def u(shape, scale):
        return jax.random.uniform(next(keys), shape, jnp.float32, -scale, scale)

    def gru_params(num_layers, in_dim, H):
        layers = []
        s = 1.0 / math.sqrt(H)
        d = in_dim
        for _ in range(num_layers):
            wih_f = u((3 * H, d), s); whh_f = u((3 * H, H), s)
            bih_f = u((3 * H,), s);   bhh_f = u((3 * H,), s)
            wih_b = u((3 * H, d), s); whh_b = u((3 * H, H), s)
            bih_b = u((3 * H,), s);   bhh_b = u((3 * H,), s)
            layers.append({
                # pre-transposed, fwd|bwd packed, bf16 MXU operands (biases stay f32).
                # For peak perf pick H as a multiple of 128 so gate slices are lane-aligned.
                "wih_T": jnp.concatenate([wih_f.T, wih_b.T], axis=1).astype(jnp.bfloat16),
                "whh_f_T": whh_f.T.astype(jnp.bfloat16),
                "whh_b_T": whh_b.T.astype(jnp.bfloat16),
                "bih": jnp.concatenate([bih_f, bih_b]).reshape(1, 6 * H),
                "bhh_f": bhh_f.reshape(1, 3 * H),
                "bhh_b": bhh_b.reshape(1, 3 * H),
            })
            d = 2 * H
        return layers

    def att_params(H, A):
        s = 1.0 / math.sqrt(2 * H)
        return {
            "gamma": jnp.ones((1, 2 * H), jnp.float32),
            "beta": jnp.zeros((1, 2 * H), jnp.float32),
            "watt_T": u((A, 2 * H), s).T.astype(jnp.bfloat16),    # (2H, A)
            "batt": u((1, A), s),
            "ctx": u((1, A), 1.0 / math.sqrt(A)),
        }

    p = {"embedding": jax.random.normal(next(keys), (vocab_size, embed_dim), jnp.float32)}
    p["word_gru"] = gru_params(word_layers, embed_dim, word_H)
    p["word_att"] = att_params(word_H, word_att_dim)
    p["sent_gru"] = gru_params(sent_layers, 2 * word_H, sent_H)
    p["sent_att"] = att_params(sent_H, sent_att_dim)
    return p


# ----------------------------------------------------------------------------
# SentenceAttention.forward
# ----------------------------------------------------------------------------
def sentence_attention_forward(params, docs, doc_lengths, sent_lengths):
    B, S, W = docs.shape

    doc_valid = jnp.arange(S)[None, :] < doc_lengths[:, None]                         # (B, S)
    sent_lengths_eff = jnp.where(doc_valid, sent_lengths, 0).reshape(B * S)           # ignore pad sents

    word_lens = sent_lengths_eff.reshape(B * S, 1).astype(jnp.float32)                # (B*S, 1)
    word_mask_tm = (jnp.arange(W)[:, None] <
                    sent_lengths_eff[None, :]).astype(jnp.float32)                    # (W, B*S)
    doc_lens = doc_lengths.reshape(B, 1).astype(jnp.float32)                          # (B, 1)
    doc_mask_tm = (jnp.arange(S)[:, None] < doc_lengths[None, :]).astype(jnp.float32) # (S, B)

    # ---- word level (WordAttention) ----
    emb = jnp.take(params["embedding"], docs.reshape(B * S, W), axis=0)               # (B*S, W, E)
    x = jnp.transpose(emb, (1, 0, 2)).astype(jnp.bfloat16)                            # (W, B*S, E) time-major
    for layer in params["word_gru"][:-1]:
        x = bigru_layer(x, word_lens, layer)     # TODO(synk): inter-layer GRU dropout modeled as identity (eval)
    sent_vecs, word_w_tm = bigru_attention_layer(
        x, word_lens, word_mask_tm, params["word_gru"][-1], params["word_att"],
        out_dtype=jnp.bfloat16)                                                       # (B*S, 2wH) bf16, (W, B*S)

    # ---- sentence level ----
    g = jnp.transpose(sent_vecs.reshape(B, S, -1), (1, 0, 2))                         # (S, B, 2wH); dropout = identity
    for layer in params["sent_gru"][:-1]:
        g = bigru_layer(g, doc_lens, layer)
    doc_vecs, sent_w_tm = bigru_attention_layer(
        g, doc_lens, doc_mask_tm, params["sent_gru"][-1], params["sent_att"],
        out_dtype=jnp.float32)                                                        # (B, 2sH), (S, B)

    word_w = jnp.transpose(word_w_tm, (1, 0)).reshape(B, S, W)                        # zero for pad positions
    sent_w = jnp.transpose(sent_w_tm, (1, 0))                                         # (B, S)
    return doc_vecs, word_w, sent_w


if __name__ == "__main__":
    # Small HAN config
    vocab_size, embed_dim = 50, 32
    word_H, sent_H = 16, 16
    word_layers, sent_layers = 1, 1
    word_att_dim, sent_att_dim = 16, 16
    B, S, W = 2, 4, 8

    key = jax.random.PRNGKey(0)
    pkey, dkey = jax.random.split(key)
    params = init_params(pkey, vocab_size, embed_dim, word_H, sent_H,
                         word_layers, sent_layers, word_att_dim, sent_att_dim)

    docs = jax.random.randint(dkey, (B, S, W), 0, vocab_size, dtype=jnp.int32)
    doc_lengths = jnp.array([4, 2], dtype=jnp.int32)                    # sentences per doc
    sent_lengths = jnp.array([[8, 5, 3, 6],
                              [4, 8, 0, 0]], dtype=jnp.int32)           # words per sentence

    fwd = jax.jit(sentence_attention_forward)
    doc_vecs, word_att_weights, sent_att_weights = fwd(params, docs, doc_lengths, sent_lengths)
    jax.block_until_ready((doc_vecs, word_att_weights, sent_att_weights))

    assert doc_vecs.shape == (B, 2 * sent_H)
    assert word_att_weights.shape == (B, S, W)
    assert sent_att_weights.shape == (B, S)
    assert bool(jnp.all(jnp.isfinite(doc_vecs)))
    print("KERNEL_OK")
</pallas_src>

<mosaic_0001>
module attributes {stable_mosaic.version = 11 : i64} {
  func.func @_bigru_attn_kernel(%arg0: i32, %arg1: memref<8x8x32xbf16, #tpu.memory_space<vmem>>, %arg2: memref<8x1xf32, #tpu.memory_space<vmem>>, %arg3: memref<32x96xbf16, #tpu.memory_space<vmem>>, %arg4: memref<16x48xbf16, #tpu.memory_space<vmem>>, %arg5: memref<16x48xbf16, #tpu.memory_space<vmem>>, %arg6: memref<1x96xf32, #tpu.memory_space<vmem>>, %arg7: memref<1x48xf32, #tpu.memory_space<vmem>>, %arg8: memref<1x48xf32, #tpu.memory_space<vmem>>, %arg9: memref<1x32xf32, #tpu.memory_space<vmem>>, %arg10: memref<1x32xf32, #tpu.memory_space<vmem>>, %arg11: memref<32x16xbf16, #tpu.memory_space<vmem>>, %arg12: memref<1x16xf32, #tpu.memory_space<vmem>>, %arg13: memref<1x16xf32, #tpu.memory_space<vmem>>, %arg14: memref<8x8xf32, #tpu.memory_space<vmem>>, %arg15: memref<8x32xbf16, #tpu.memory_space<vmem>>, %arg16: memref<8x8xf32, #tpu.memory_space<vmem>>, %arg17: memref<8x8x96xbf16, #tpu.memory_space<vmem>>, %arg18: memref<8x8x16xf32, #tpu.memory_space<vmem>>, %arg19: memref<8x8x16xf32, #tpu.memory_space<vmem>>) attributes {dimension_semantics = [#tpu.dimension_semantics<parallel>], iteration_bounds = array<i64: 1>, scalar_prefetch = 0 : i64, scratch_operands = 3 : i64, tpu.core_type = #tpu.core_type<tc>, window_params = [{transform_indices = @transform_0, window_bounds = array<i64: 8, 8, 32>}, {transform_indices = @transform_1, window_bounds = array<i64: 8, 1>}, {pipeline_mode = #tpu.pipeline_mode<synchronous>, transform_indices = @transform_2, window_bounds = array<i64: 32, 96>}, {pipeline_mode = #tpu.pipeline_mode<synchronous>, transform_indices = @transform_3, window_bounds = array<i64: 16, 48>}, {pipeline_mode = #tpu.pipeline_mode<synchronous>, transform_indices = @transform_4, window_bounds = array<i64: 16, 48>}, {pipeline_mode = #tpu.pipeline_mode<synchronous>, transform_indices = @transform_5, window_bounds = array<i64: 1, 96>}, {pipeline_mode = #tpu.pipeline_mode<synchronous>, transform_indices = @transform_6, window_bounds = array<i64: 1, 48>}, {pipeline_mode = #tpu.pipeline_mode<synchronous>, transform_indices = @transform_7, window_bounds = array<i64: 1, 48>}, {pipeline_mode = #tpu.pipeline_mode<synchronous>, transform_indices = @transform_8, window_bounds = array<i64: 1, 32>}, {pipeline_mode = #tpu.pipeline_mode<synchronous>, transform_indices = @transform_9, window_bounds = array<i64: 1, 32>}, {pipeline_mode = #tpu.pipeline_mode<synchronous>, transform_indices = @transform_10, window_bounds = array<i64: 32, 16>}, {pipeline_mode = #tpu.pipeline_mode<synchronous>, transform_indices = @transform_11, window_bounds = array<i64: 1, 16>}, {pipeline_mode = #tpu.pipeline_mode<synchronous>, transform_indices = @transform_12, window_bounds = array<i64: 1, 16>}, {transform_indices = @transform_13, window_bounds = array<i64: 8, 8>}, {transform_indices = @transform_14, window_bounds = array<i64: 8, 32>}, {transform_indices = @transform_15, window_bounds = array<i64: 8, 8>}]} {
    %c0 = arith.constant 0 : index
    %c0_0 = arith.constant 0 : index
    %0 = vector.load %arg3[%c0, %c0_0] : memref<32x96xbf16, #tpu.memory_space<vmem>>, vector<32x96xbf16>
    %c0_1 = arith.constant 0 : index
    %c0_2 = arith.constant 0 : index
    %1 = vector.load %arg6[%c0_1, %c0_2] : memref<1x96xf32, #tpu.memory_space<vmem>>, vector<1x96xf32>
    %c0_3 = arith.constant 0 : index
    %c0_4 = arith.constant 0 : index
    %c0_5 = arith.constant 0 : index
    %2 = vector.load %arg1[%c0_3, %c0_4, %c0_5] : memref<8x8x32xbf16, #tpu.memory_space<vmem>>, vector<8x8x32xbf16>
    %3 = vector.shape_cast %2 : vector<8x8x32xbf16> to vector<64x32xbf16>
    %cst = arith.constant dense<0.000000e+00> : vector<64x96xf32>
    %4 = tpu.matmul %3, %0, %cst {dimension_numbers = #tpu.dot_dimension_numbers<[1], [0], [0], [1], [0, 0, 1, 1], [], []>} : vector<64x32xbf16>, vector<32x96xbf16>, vector<64x96xf32> -> vector<64x96xf32>
    %5 = vector.broadcast %1 : vector<1x96xf32> to vector<64x96xf32>
    %6 = arith.addf %4, %5 : vector<64x96xf32>
    %7 = vector.shape_cast %6 : vector<64x96xf32> to vector<8x8x96xf32>
    %8 = arith.truncf %7 : vector<8x8x96xf32> to vector<8x8x96xbf16>
    %c0_6 = arith.constant 0 : index
    %c0_7 = arith.constant 0 : index
    %c0_8 = arith.constant 0 : index
    %9 = vector.load %arg17[%c0_6, %c0_7, %c0_8] : memref<8x8x96xbf16, #tpu.memory_space<vmem>>, vector<8x8x96xbf16>
    tpu.vector_store %arg17[%c0_6, %c0_7, %c0_8], %8 {strides = array<i32>} : memref<8x8x96xbf16, #tpu.memory_space<vmem>>, vector<8x8x96xbf16>,
    %c0_9 = arith.constant 0 : index
    %c0_10 = arith.constant 0 : index
    %10 = vector.load %arg4[%c0_9, %c0_10] : memref<16x48xbf16, #tpu.memory_space<vmem>>, vector<16x48xbf16>
    %c0_11 = arith.constant 0 : index
    %c0_12 = arith.constant 0 : index
    %11 = vector.load %arg5[%c0_11, %c0_12] : memref<16x48xbf16, #tpu.memory_space<vmem>>, vector<16x48xbf16>
    %c0_13 = arith.constant 0 : index
    %c0_14 = arith.constant 0 : index
    %12 = vector.load %arg7[%c0_13, %c0_14] : memref<1x48xf32, #tpu.memory_space<vmem>>, vector<1x48xf32>
    %13 = vector.shape_cast %12 : vector<1x48xf32> to vector<1x48xf32>
    %14 = vector.broadcast %13 : vector<1x48xf32> to vector<8x48xf32>
    %c0_15 = arith.constant 0 : index
    %c0_16 = arith.constant 0 : index
    %15 = vector.load %arg8[%c0_15, %c0_16] : memref<1x48xf32, #tpu.memory_space<vmem>>, vector<1x48xf32>
    %16 = vector.shape_cast %15 : vector<1x48xf32> to vector<1x48xf32>
    %17 = vector.broadcast %16 : vector<1x48xf32> to vector<8x48xf32>
    %c0_17 = arith.constant 0 : index
    %c0_18 = arith.constant 0 : index
    %18 = vector.load %arg2[%c0_17, %c0_18] : memref<8x1xf32, #tpu.memory_space<vmem>>, vector<8x1xf32>
    %cst_19 = arith.constant 0.000000e+00 : f32
    %19 = vector.broadcast %cst_19 : f32 to vector<8x16xf32>
    %c0_i32 = arith.constant 0 : i32
    %c8_i32 = arith.constant 8 : i32
    %20 = arith.addi %c0_i32, %c8_i32 : i32
    %c1_i32 = arith.constant 1 : i32
    %21:2 = scf.for %arg20 = %c0_i32 to %20 step %c1_i32 iter_args(%arg21 = %19, %arg22 = %19) -> (vector<8x16xf32>, vector<8x16xf32>)  : i32 {
      %c7_i32 = arith.constant 7 : i32
      %128 = arith.subi %c7_i32, %arg20 : i32
      %129 = arith.index_cast %arg20 : i32 to index
      %c0_63 = arith.constant 0 : index
      %c0_64 = arith.constant 0 : index
      %130 = vector.load %arg17[%129, %c0_63, %c0_64] : memref<8x8x96xbf16, #tpu.memory_space<vmem>>, vector<1x8x96xbf16>
      %131 = vector.shape_cast %130 : vector<1x8x96xbf16> to vector<8x96xbf16>
      %132 = arith.sitofp %arg20 : i32 to f32
      %133 = vector.broadcast %132 : f32 to vector<8x1xf32>
      %134 = arith.cmpf olt, %133, %18 : vector<8x1xf32>
      %135 = arith.extui %134 : vector<8x1xi1> to vector<8x1xi32>
      %136 = arith.sitofp %135 : vector<8x1xi32> to vector<8x1xf32>
      %137 = vector.extract_strided_slice %131 {offsets = [0, 0], sizes = [8, 48], strides = [1, 1]} : vector<8x96xbf16> to vector<8x48xbf16>
      %138 = arith.truncf %arg21 : vector<8x16xf32> to vector<8x16xbf16>
      %cst_65 = arith.constant dense<0.000000e+00> : vector<8x48xf32>
      %139 = tpu.matmul %138, %10, %cst_65 {dimension_numbers = #tpu.dot_dimension_numbers<[1], [0], [0], [1], [0, 0, 1, 1], [], []>} : vector<8x16xbf16>, vector<16x48xbf16>, vector<8x48xf32> -> vector<8x48xf32>
      %140 = arith.addf %139, %14 : vector<8x48xf32>
      %141 = arith.extf %137 : vector<8x48xbf16> to vector<8x48xf32>
      %142 = vector.extract_strided_slice %141 {offsets = [0, 0], sizes = [8, 16], strides = [1, 1]} : vector<8x48xf32> to vector<8x16xf32>
      %143 = vector.extract_strided_slice %140 {offsets = [0, 0], sizes = [8, 16], strides = [1, 1]} : vector<8x48xf32> to vector<8x16xf32>
      %144 = arith.addf %142, %143 : vector<8x16xf32>
      %145 = arith.negf %144 : vector<8x16xf32>
      %146 = math.exp %145 : vector<8x16xf32>
      %cst_66 = arith.constant 1.000000e+00 : f32
      %147 = vector.broadcast %cst_66 : f32 to vector<8x16xf32>
      %148 = arith.addf %147, %146 : vector<8x16xf32>
      %149 = arith.divf %147, %148 : vector<8x16xf32>
      %150 = vector.extract_strided_slice %141 {offsets = [0, 16], sizes = [8, 16], strides = [1, 1]} : vector<8x48xf32> to vector<8x16xf32>
      %151 = vector.extract_strided_slice %140 {offsets = [0, 16], sizes = [8, 16], strides = [1, 1]} : vector<8x48xf32> to vector<8x16xf32>
      %152 = arith.addf %150, %151 : vector<8x16xf32>
      %153 = arith.negf %152 : vector<8x16xf32>
      %154 = math.exp %153 : vector<8x16xf32>
      %cst_67 = arith.constant 1.000000e+00 : f32
      %155 = vector.broadcast %cst_67 : f32 to vector<8x16xf32>
      %156 = arith.addf %155, %154 : vector<8x16xf32>
      %157 = arith.divf %155, %156 : vector<8x16xf32>
      %158 = vector.extract_strided_slice %141 {offsets = [0, 32], sizes = [8, 16], strides = [1, 1]} : vector<8x48xf32> to vector<8x16xf32>
      %159 = vector.extract_strided_slice %140 {offsets = [0, 32], sizes = [8, 16], strides = [1, 1]} : vector<8x48xf32> to vector<8x16xf32>
      %160 = arith.mulf %149, %159 : vector<8x16xf32>
      %161 = arith.addf %158, %160 : vector<8x16xf32>
      %162 = math.tanh %161 : vector<8x16xf32>
      %cst_68 = arith.constant 1.000000e+00 : f32
      %163 = vector.broadcast %cst_68 : f32 to vector<8x16xf32>
      %164 = arith.subf %163, %157 : vector<8x16xf32>
      %165 = arith.mulf %164, %162 : vector<8x16xf32>
      %166 = arith.mulf %157, %arg21 : vector<8x16xf32>
      %167 = arith.addf %165, %166 : vector<8x16xf32>
      %168 = vector.broadcast %136 : vector<8x1xf32> to vector<8x16xf32>
      %169 = arith.mulf %167, %168 : vector<8x16xf32>
      %170 = arith.index_cast %arg20 : i32 to index
      %c0_69 = arith.constant 0 : index
      %c0_70 = arith.constant 0 : index
      %171 = vector.load %arg18[%170, %c0_69, %c0_70] : memref<8x8x16xf32, #tpu.memory_space<vmem>>, vector<1x8x16xf32>
      %172 = vector.shape_cast %171 : vector<1x8x16xf32> to vector<8x16xf32>
      %173 = vector.shape_cast %169 : vector<8x16xf32> to vector<1x8x16xf32>
      tpu.vector_store %arg18[%170, %c0_69, %c0_70], %173 {strides = array<i32>} : memref<8x8x16xf32, #tpu.memory_space<vmem>>, vector<1x8x16xf32>,
      %174 = arith.index_cast %128 : i32 to index
      %c0_71 = arith.constant 0 : index
      %c0_72 = arith.constant 0 : index
      %175 = vector.load %arg17[%174, %c0_71, %c0_72] : memref<8x8x96xbf16, #tpu.memory_space<vmem>>, vector<1x8x96xbf16>
      %176 = vector.shape_cast %175 : vector<1x8x96xbf16> to vector<8x96xbf16>
      %177 = arith.sitofp %128 : i32 to f32
      %178 = vector.broadcast %177 : f32 to vector<8x1xf32>
      %179 = arith.cmpf olt, %178, %18 : vector<8x1xf32>
      %180 = arith.extui %179 : vector<8x1xi1> to vector<8x1xi32>
      %181 = arith.sitofp %180 : vector<8x1xi32> to vector<8x1xf32>
      %182 = vector.extract_strided_slice %176 {offsets = [0, 48], sizes = [8, 48], strides = [1, 1]} : vector<8x96xbf16> to vector<8x48xbf16>
      %183 = arith.truncf %arg22 : vector<8x16xf32> to vector<8x16xbf16>
      %cst_73 = arith.constant dense<0.000000e+00> : vector<8x48xf32>
      %184 = tpu.matmul %183, %11, %cst_73 {dimension_numbers = #tpu.dot_dimension_numbers<[1], [0], [0], [1], [0, 0, 1, 1], [], []>} : vector<8x16xbf16>, vector<16x48xbf16>, vector<8x48xf32> -> vector<8x48xf32>
      %185 = arith.addf %184, %17 : vector<8x48xf32>
      %186 = arith.extf %182 : vector<8x48xbf16> to vector<8x48xf32>
      %187 = vector.extract_strided_slice %186 {offsets = [0, 0], sizes = [8, 16], strides = [1, 1]} : vector<8x48xf32> to vector<8x16xf32>
      %188 = vector.extract_strided_slice %185 {offsets = [0, 0], sizes = [8, 16], strides = [1, 1]} : vector<8x48xf32> to vector<8x16xf32>
      %189 = arith.addf %187, %188 : vector<8x16xf32>
      %190 = arith.negf %189 : vector<8x16xf32>
      %191 = math.exp %190 : vector<8x16xf32>
      %cst_74 = arith.constant 1.000000e+00 : f32
      %192 = vector.broadcast %cst_74 : f32 to vector<8x16xf32>
      %193 = arith.addf %192, %191 : vector<8x16xf32>
      %194 = arith.divf %192, %193 : vector<8x16xf32>
      %195 = vector.extract_strided_slice %186 {offsets = [0, 16], sizes = [8, 16], strides = [1, 1]} : vector<8x48xf32> to vector<8x16xf32>
      %196 = vector.extract_strided_slice %185 {offsets = [0, 16], sizes = [8, 16], strides = [1, 1]} : vector<8x48xf32> to vector<8x16xf32>
      %197 = arith.addf %195, %196 : vector<8x16xf32>
      %198 = arith.negf %197 : vector<8x16xf32>
      %199 = math.exp %198 : vector<8x16xf32>
      %cst_75 = arith.constant 1.000000e+00 : f32
      %200 = vector.broadcast %cst_75 : f32 to vector<8x16xf32>
      %201 = arith.addf %200, %199 : vector<8x16xf32>
      %202 = arith.divf %200, %201 : vector<8x16xf32>
      %203 = vector.extract_strided_slice %186 {offsets = [0, 32], sizes = [8, 16], strides = [1, 1]} : vector<8x48xf32> to vector<8x16xf32>
      %204 = vector.extract_strided_slice %185 {offsets = [0, 32], sizes = [8, 16], strides = [1, 1]} : vector<8x48xf32> to vector<8x16xf32>
      %205 = arith.mulf %194, %204 : vector<8x16xf32>
      %206 = arith.addf %203, %205 : vector<8x16xf32>
      %207 = math.tanh %206 : vector<8x16xf32>
      %cst_76 = arith.constant 1.000000e+00 : f32
      %208 = vector.broadcast %cst_76 : f32 to vector<8x16xf32>
      %209 = arith.subf %208, %202 : vector<8x16xf32>
      %210 = arith.mulf %209, %207 : vector<8x16xf32>
      %211 = arith.mulf %202, %arg22 : vector<8x16xf32>
      %212 = arith.addf %210, %211 : vector<8x16xf32>
      %213 = vector.broadcast %181 : vector<8x1xf32> to vector<8x16xf32>
      %214 = arith.mulf %213, %212 : vector<8x16xf32>
      %cst_77 = arith.constant 1.000000e+00 : f32
      %215 = vector.broadcast %cst_77 : f32 to vector<8x1xf32>
      %216 = arith.subf %215, %181 : vector<8x1xf32>
      %217 = vector.broadcast %216 : vector<8x1xf32> to vector<8x16xf32>
      %218 = arith.mulf %217, %arg22 : vector<8x16xf32>
      %219 = arith.addf %214, %218 : vector<8x16xf32>
      %220 = arith.index_cast %128 : i32 to index
      %c0_78 = arith.constant 0 : index
      %c0_79 = arith.constant 0 : index
      %221 = vector.load %arg19[%220, %c0_78, %c0_79] : memref<8x8x16xf32, #tpu.memory_space<vmem>>, vector<1x8x16xf32>
      %222 = vector.shape_cast %221 : vector<1x8x16xf32> to vector<8x16xf32>
      %223 = vector.shape_cast %219 : vector<8x16xf32> to vector<1x8x16xf32>
      tpu.vector_store %arg19[%220, %c0_78, %c0_79], %223 {strides = array<i32>} : memref<8x8x16xf32, #tpu.memory_space<vmem>>, vector<1x8x16xf32>,
      scf.yield %167, %219 : vector<8x16xf32>, vector<8x16xf32>
    }
    %c8_i32_20 = arith.constant 8 : i32
    %c0_21 = arith.constant 0 : index
    %c0_22 = arith.constant 0 : index
    %c0_23 = arith.constant 0 : index
    %22 = vector.load %arg18[%c0_21, %c0_22, %c0_23] : memref<8x8x16xf32, #tpu.memory_space<vmem>>, vector<8x8x16xf32>
    %c0_24 = arith.constant 0 : index
    %c0_25 = arith.constant 0 : index
    %c0_26 = arith.constant 0 : index
    %23 = vector.load %arg19[%c0_24, %c0_25, %c0_26] : memref<8x8x16xf32, #tpu.memory_space<vmem>>, vector<8x8x16xf32>
    %c0_27 = arith.constant 0 : index
    %c0_28 = arith.constant 0 : index
    %24 = vector.load %arg14[%c0_27, %c0_28] : memref<8x8xf32, #tpu.memory_space<vmem>>, vector<8x8xf32>
    %cst_29 = arith.constant dense<0.000000e+00> : vector<8x8xf32>
    %25 = vector.multi_reduction <add>, %22, %cst_29 [2] : vector<8x8x16xf32> to vector<8x8xf32>
    %26 = vector.shape_cast %25 : vector<8x8xf32> to vector<8x8x1xf32>
    %cst_30 = arith.constant dense<0.000000e+00> : vector<8x8xf32>
    %27 = vector.multi_reduction <add>, %23, %cst_30 [2] : vector<8x8x16xf32> to vector<8x8xf32>
    %28 = vector.shape_cast %27 : vector<8x8xf32> to vector<8x8x1xf32>
    %29 = arith.addf %26, %28 : vector<8x8x1xf32>
    %cst_31 = arith.constant 3.200000e+01 : f32
    %30 = vector.broadcast %cst_31 : f32 to vector<8x8x1xf32>
    %31 = arith.divf %29, %30 : vector<8x8x1xf32>
    %32 = vector.broadcast %31 : vector<8x8x1xf32> to vector<8x8x16xf32>
    %33 = arith.subf %22, %32 : vector<8x8x16xf32>
    %34 = arith.mulf %33, %33 : vector<8x8x16xf32>
    %cst_32 = arith.constant dense<0.000000e+00> : vector<8x8xf32>
    %35 = vector.multi_reduction <add>, %34, %cst_32 [2] : vector<8x8x16xf32> to vector<8x8xf32>
    %36 = vector.shape_cast %35 : vector<8x8xf32> to vector<8x8x1xf32>
    %37 = vector.broadcast %31 : vector<8x8x1xf32> to vector<8x8x16xf32>
    %38 = arith.subf %23, %37 : vector<8x8x16xf32>
    %39 = arith.mulf %38, %38 : vector<8x8x16xf32>
    %cst_33 = arith.constant dense<0.000000e+00> : vector<8x8xf32>
    %40 = vector.multi_reduction <add>, %39, %cst_33 [2] : vector<8x8x16xf32> to vector<8x8xf32>
    %41 = vector.shape_cast %40 : vector<8x8xf32> to vector<8x8x1xf32>
    %42 = arith.addf %36, %41 : vector<8x8x1xf32>
    %cst_34 = arith.constant 3.200000e+01 : f32
    %43 = vector.broadcast %cst_34 : f32 to vector<8x8x1xf32>
    %44 = arith.divf %42, %43 : vector<8x8x1xf32>
    %cst_35 = arith.constant 9.99999974E-6 : f32
    %45 = vector.broadcast %cst_35 : f32 to vector<8x8x1xf32>
    %46 = arith.addf %44, %45 : vector<8x8x1xf32>
    %47 = math.rsqrt %46 : vector<8x8x1xf32>
    %c0_36 = arith.constant 0 : index
    %c0_37 = arith.constant 0 : index
    %48 = vector.load %arg9[%c0_36, %c0_37] : memref<1x32xf32, #tpu.memory_space<vmem>>, vector<1x32xf32>
    %c0_38 = arith.constant 0 : index
    %c0_39 = arith.constant 0 : index
    %49 = vector.load %arg10[%c0_38, %c0_39] : memref<1x32xf32, #tpu.memory_space<vmem>>, vector<1x32xf32>
    %50 = vector.broadcast %31 : vector<8x8x1xf32> to vector<8x8x16xf32>
    %51 = arith.subf %22, %50 : vector<8x8x16xf32>
    %52 = vector.broadcast %47 : vector<8x8x1xf32> to vector<8x8x16xf32>
    %53 = arith.mulf %51, %52 : vector<8x8x16xf32>
    %54 = vector.extract_strided_slice %48 {offsets = [0, 0], sizes = [1, 16], strides = [1, 1]} : vector<1x32xf32> to vector<1x16xf32>
    %55 = vector.shape_cast %54 : vector<1x16xf32> to vector<1x1x16xf32>
    %56 = vector.broadcast %55 : vector<1x1x16xf32> to vector<8x8x16xf32>
    %57 = arith.mulf %53, %56 : vector<8x8x16xf32>
    %58 = vector.extract_strided_slice %49 {offsets = [0, 0], sizes = [1, 16], strides = [1, 1]} : vector<1x32xf32> to vector<1x16xf32>
    %59 = vector.shape_cast %58 : vector<1x16xf32> to vector<1x1x16xf32>
    %60 = vector.broadcast %59 : vector<1x1x16xf32> to vector<8x8x16xf32>
    %61 = arith.addf %57, %60 : vector<8x8x16xf32>
    %62 = vector.broadcast %31 : vector<8x8x1xf32> to vector<8x8x16xf32>
    %63 = arith.subf %23, %62 : vector<8x8x16xf32>
    %64 = vector.broadcast %47 : vector<8x8x1xf32> to vector<8x8x16xf32>
    %65 = arith.mulf %63, %64 : vector<8x8x16xf32>
    %66 = vector.extract_strided_slice %48 {offsets = [0, 16], sizes = [1, 16], strides = [1, 1]} : vector<1x32xf32> to vector<1x16xf32>
    %67 = vector.shape_cast %66 : vector<1x16xf32> to vector<1x1x16xf32>
    %68 = vector.broadcast %67 : vector<1x1x16xf32> to vector<8x8x16xf32>
    %69 = arith.mulf %65, %68 : vector<8x8x16xf32>
    %70 = vector.extract_strided_slice %49 {offsets = [0, 16], sizes = [1, 16], strides = [1, 1]} : vector<1x32xf32> to vector<1x16xf32>
    %71 = vector.shape_cast %70 : vector<1x16xf32> to vector<1x1x16xf32>
    %72 = vector.broadcast %71 : vector<1x1x16xf32> to vector<8x8x16xf32>
    %73 = arith.addf %69, %72 : vector<8x8x16xf32>
    %c0_40 = arith.constant 0 : index
    %c0_41 = arith.constant 0 : index
    %74 = vector.load %arg11[%c0_40, %c0_41] : memref<32x16xbf16, #tpu.memory_space<vmem>>, vector<32x16xbf16>
    %75 = vector.shape_cast %61 : vector<8x8x16xf32> to vector<64x16xf32>
    %76 = arith.truncf %75 : vector<64x16xf32> to vector<64x16xbf16>
    %77 = vector.extract_strided_slice %74 {offsets = [0, 0], sizes = [16, 16], strides = [1, 1]} : vector<32x16xbf16> to vector<16x16xbf16>
    %cst_42 = arith.constant dense<0.000000e+00> : vector<64x16xf32>
    %78 = tpu.matmul %76, %77, %cst_42 {dimension_numbers = #tpu.dot_dimension_numbers<[1], [0], [0], [1], [0, 0, 1, 1], [], []>} : vector<64x16xbf16>, vector<16x16xbf16>, vector<64x16xf32> -> vector<64x16xf32>
    %79 = vector.shape_cast %73 : vector<8x8x16xf32> to vector<64x16xf32>
    %80 = arith.truncf %79 : vector<64x16xf32> to vector<64x16xbf16>
    %81 = vector.extract_strided_slice %74 {offsets = [16, 0], sizes = [16, 16], strides = [1, 1]} : vector<32x16xbf16> to vector<16x16xbf16>
    %cst_43 = arith.constant dense<0.000000e+00> : vector<64x16xf32>
    %82 = tpu.matmul %80, %81, %cst_43 {dimension_numbers = #tpu.dot_dimension_numbers<[1], [0], [0], [1], [0, 0, 1, 1], [], []>} : vector<64x16xbf16>, vector<16x16xbf16>, vector<64x16xf32> -> vector<64x16xf32>
    %83 = arith.addf %78, %82 : vector<64x16xf32>
    %c0_44 = arith.constant 0 : index
    %c0_45 = arith.constant 0 : index
    %84 = vector.load %arg12[%c0_44, %c0_45] : memref<1x16xf32, #tpu.memory_space<vmem>>, vector<1x16xf32>
    %85 = vector.broadcast %84 : vector<1x16xf32> to vector<64x16xf32>
    %86 = arith.addf %83, %85 : vector<64x16xf32>
    %87 = math.tanh %86 : vector<64x16xf32>
    %88 = vector.shape_cast %87 : vector<64x16xf32> to vector<8x8x16xf32>
    %c0_46 = arith.constant 0 : index
    %c0_47 = arith.constant 0 : index
    %89 = vector.load %arg13[%c0_46, %c0_47] : memref<1x16xf32, #tpu.memory_space<vmem>>, vector<1x16xf32>
    %90 = vector.shape_cast %89 : vector<1x16xf32> to vector<1x1x16xf32>
    %91 = vector.broadcast %90 : vector<1x1x16xf32> to vector<8x8x16xf32>
    %92 = arith.mulf %88, %91 : vector<8x8x16xf32>
    %cst_48 = arith.constant dense<0.000000e+00> : vector<8x8xf32>
    %93 = vector.multi_reduction <add>, %92, %cst_48 [2] : vector<8x8x16xf32> to vector<8x8xf32>
    %cst_49 = arith.constant 0.000000e+00 : f32
    %94 = vector.broadcast %cst_49 : f32 to vector<8x8xf32>
    %95 = arith.cmpf ogt, %24, %94 : vector<8x8xf32>
    %cst_50 = arith.constant -3.000000e+38 : f32
    %96 = vector.broadcast %cst_50 : f32 to vector<8x8xf32>
    %97 = arith.select %95, %93, %96 : vector<8x8xi1>, vector<8x8xf32>
    %cst_51 = arith.constant dense<0xFF800000> : vector<8xf32>
    %98 = vector.multi_reduction <maximumf>, %97, %cst_51 [0] : vector<8x8xf32> to vector<8xf32>
    %99 = vector.shape_cast %98 : vector<8xf32> to vector<1x8xf32>
    %cst_52 = arith.constant 0.000000e+00 : f32
    %100 = vector.broadcast %cst_52 : f32 to vector<8x8xf32>
    %101 = arith.cmpf ogt, %24, %100 : vector<8x8xf32>
    %102 = vector.broadcast %99 : vector<1x8xf32> to vector<8x8xf32>
    %103 = arith.subf %93, %102 : vector<8x8xf32>
    %cst_53 = arith.constant 0.000000e+00 : f32
    %104 = vector.broadcast %cst_53 : f32 to vector<8x8xf32>
    %105 = arith.select %101, %103, %104 : vector<8x8xi1>, vector<8x8xf32>
    %106 = math.exp %105 : vector<8x8xf32>
    %107 = arith.mulf %106, %24 : vector<8x8xf32>
    %cst_54 = arith.constant dense<0.000000e+00> : vector<8xf32>
    %108 = vector.multi_reduction <add>, %107, %cst_54 [0] : vector<8x8xf32> to vector<8xf32>
    %109 = vector.shape_cast %108 : vector<8xf32> to vector<1x8xf32>
    %cst_55 = arith.constant 9.99999996E-13 : f32
    %110 = vector.broadcast %cst_55 : f32 to vector<1x8xf32>
    %111 = arith.maximumf %109, %110 : vector<1x8xf32>
    %112 = tpu.reciprocal %111 {approx = true} : vector<1x8xf32> -> vector<1x8xf32>
    %113 = vector.broadcast %112 : vector<1x8xf32> to vector<8x8xf32>
    %114 = arith.mulf %107, %113 : vector<8x8xf32>
    %115 = vector.shape_cast %114 : vector<8x8xf32> to vector<8x8x1xf32>
    %116 = vector.broadcast %115 : vector<8x8x1xf32> to vector<8x8x16xf32>
    %117 = arith.mulf %22, %116 : vector<8x8x16xf32>
    %cst_56 = arith.constant dense<0.000000e+00> : vector<8x16xf32>
    %118 = vector.multi_reduction <add>, %117, %cst_56 [0] : vector<8x8x16xf32> to vector<8x16xf32>
    %119 = vector.shape_cast %114 : vector<8x8xf32> to vector<8x8x1xf32>
    %120 = vector.broadcast %119 : vector<8x8x1xf32> to vector<8x8x16xf32>
    %121 = arith.mulf %23, %120 : vector<8x8x16xf32>
    %cst_57 = arith.constant dense<0.000000e+00> : vector<8x16xf32>
    %122 = vector.multi_reduction <add>, %121, %cst_57 [0] : vector<8x8x16xf32> to vector<8x16xf32>
    %123 = arith.truncf %118 : vector<8x16xf32> to vector<8x16xbf16>
    %c0_58 = arith.constant 0 : index
    %c0_59 = arith.constant 0 : index
    %124 = vector.load %arg15[%c0_58, %c0_59] : memref<8x32xbf16, #tpu.memory_space<vmem>>, vector<8x16xbf16>
    tpu.vector_store %arg15[%c0_58, %c0_59], %123 {strides = array<i32>} : memref<8x32xbf16, #tpu.memory_space<vmem>>, vector<8x16xbf16>,
    %125 = arith.truncf %122 : vector<8x16xf32> to vector<8x16xbf16>
    %c0_60 = arith.constant 0 : index
    %c16 = arith.constant 16 : index
    %126 = vector.load %arg15[%c0_60, %c16] : memref<8x32xbf16, #tpu.memory_space<vmem>>, vector<8x16xbf16>
    tpu.vector_store %arg15[%c0_60, %c16], %125 {strides = array<i32>} : memref<8x32xbf16, #tpu.memory_space<vmem>>, vector<8x16xbf16>,
    %c0_61 = arith.constant 0 : index
    %c0_62 = arith.constant 0 : index
    %127 = vector.load %arg16[%c0_61, %c0_62] : memref<8x8xf32, #tpu.memory_space<vmem>>, vector<8x8xf32>
    tpu.vector_store %arg16[%c0_61, %c0_62], %114 {strides = array<i32>} : memref<8x8xf32, #tpu.memory_space<vmem>>, vector<8x8xf32>,
    return
  }
  func.func @transform_0(%arg0: i32) -> (i32, i32, i32) {
    %c0_i32 = arith.constant 0 : i32
    %c0_i32_0 = arith.constant 0 : i32
    %c0_i32_1 = arith.constant 0 : i32
    return %c0_i32, %arg0, %c0_i32_0 : i32, i32, i32
  }
  func.func @transform_1(%arg0: i32) -> (i32, i32) {
    %c0_i32 = arith.constant 0 : i32
    %c0_i32_0 = arith.constant 0 : i32
    return %arg0, %c0_i32 : i32, i32
  }
  func.func @transform_2(%arg0: i32) -> (i32, i32) {
    %c0_i32 = arith.constant 0 : i32
    %c0_i32_0 = arith.constant 0 : i32
    %c0_i32_1 = arith.constant 0 : i32
    return %c0_i32, %c0_i32_0 : i32, i32
  }
  func.func @transform_3(%arg0: i32) -> (i32, i32) {
    %c0_i32 = arith.constant 0 : i32
    %c0_i32_0 = arith.constant 0 : i32
    %c0_i32_1 = arith.constant 0 : i32
    return %c0_i32, %c0_i32_0 : i32, i32
  }
  func.func @transform_4(%arg0: i32) -> (i32, i32) {
    %c0_i32 = arith.constant 0 : i32
    %c0_i32_0 = arith.constant 0 : i32
    %c0_i32_1 = arith.constant 0 : i32
    return %c0_i32, %c0_i32_0 : i32, i32
  }
  func.func @transform_5(%arg0: i32) -> (i32, i32) {
    %c0_i32 = arith.constant 0 : i32
    %c0_i32_0 = arith.constant 0 : i32
    %c0_i32_1 = arith.constant 0 : i32
    return %c0_i32, %c0_i32_0 : i32, i32
  }
  func.func @transform_6(%arg0: i32) -> (i32, i32) {
    %c0_i32 = arith.constant 0 : i32
    %c0_i32_0 = arith.constant 0 : i32
    %c0_i32_1 = arith.constant 0 : i32
    return %c0_i32, %c0_i32_0 : i32, i32
  }
  func.func @transform_7(%arg0: i32) -> (i32, i32) {
    %c0_i32 = arith.constant 0 : i32
    %c0_i32_0 = arith.constant 0 : i32
    %c0_i32_1 = arith.constant 0 : i32
    return %c0_i32, %c0_i32_0 : i32, i32
  }
  func.func @transform_8(%arg0: i32) -> (i32, i32) {
    %c0_i32 = arith.constant 0 : i32
    %c0_i32_0 = arith.constant 0 : i32
    %c0_i32_1 = arith.constant 0 : i32
    return %c0_i32, %c0_i32_0 : i32, i32
  }
  func.func @transform_9(%arg0: i32) -> (i32, i32) {
    %c0_i32 = arith.constant 0 : i32
    %c0_i32_0 = arith.constant 0 : i32
    %c0_i32_1 = arith.constant 0 : i32
    return %c0_i32, %c0_i32_0 : i32, i32
  }
  func.func @transform_10(%arg0: i32) -> (i32, i32) {
    %c0_i32 = arith.constant 0 : i32
    %c0_i32_0 = arith.constant 0 : i32
    %c0_i32_1 = arith.constant 0 : i32
    return %c0_i32, %c0_i32_0 : i32, i32
  }
  func.func @transform_11(%arg0: i32) -> (i32, i32) {
    %c0_i32 = arith.constant 0 : i32
    %c0_i32_0 = arith.constant 0 : i32
    %c0_i32_1 = arith.constant 0 : i32
    return %c0_i32, %c0_i32_0 : i32, i32
  }
  func.func @transform_12(%arg0: i32) -> (i32, i32) {
    %c0_i32 = arith.constant 0 : i32
    %c0_i32_0 = arith.constant 0 : i32
    %c0_i32_1 = arith.constant 0 : i32
    return %c0_i32, %c0_i32_0 : i32, i32
  }
  func.func @transform_13(%arg0: i32) -> (i32, i32) {
    %c0_i32 = arith.constant 0 : i32
    %c0_i32_0 = arith.constant 0 : i32
    return %c0_i32, %arg0 : i32, i32
  }
  func.func @transform_14(%arg0: i32) -> (i32, i32) {
    %c0_i32 = arith.constant 0 : i32
    %c0_i32_0 = arith.constant 0 : i32
    return %arg0, %c0_i32 : i32, i32
  }
  func.func @transform_15(%arg0: i32) -> (i32, i32) {
    %c0_i32 = arith.constant 0 : i32
    %c0_i32_0 = arith.constant 0 : i32
    return %c0_i32, %arg0 : i32, i32
  }
}

module attributes {stable_mosaic.version = 11 : i64} {
  func.func @_bigru_attn_kernel(%arg0: i32, %arg1: memref<4x2x32xbf16, #tpu.memory_space<vmem>>, %arg2: memref<2x1xf32, #tpu.memory_space<vmem>>, %arg3: memref<32x96xbf16, #tpu.memory_space<vmem>>, %arg4: memref<16x48xbf16, #tpu.memory_space<vmem>>, %arg5: memref<16x48xbf16, #tpu.memory_space<vmem>>, %arg6: memref<1x96xf32, #tpu.memory_space<vmem>>, %arg7: memref<1x48xf32, #tpu.memory_space<vmem>>, %arg8: memref<1x48xf32, #tpu.memory_space<vmem>>, %arg9: memref<1x32xf32, #tpu.memory_space<vmem>>, %arg10: memref<1x32xf32, #tpu.memory_space<vmem>>, %arg11: memref<32x16xbf16, #tpu.memory_space<vmem>>, %arg12: memref<1x16xf32, #tpu.memory_space<vmem>>, %arg13: memref<1x16xf32, #tpu.memory_space<vmem>>, %arg14: memref<4x2xf32, #tpu.memory_space<vmem>>, %arg15: memref<2x32xf32, #tpu.memory_space<vmem>>, %arg16: memref<4x2xf32, #tpu.memory_space<vmem>>, %arg17: memref<4x2x96xbf16, #tpu.memory_space<vmem>>, %arg18: memref<4x2x16xf32, #tpu.memory_space<vmem>>, %arg19: memref<4x2x16xf32, #tpu.memory_space<vmem>>) attributes {dimension_semantics = [#tpu.dimension_semantics<parallel>], iteration_bounds = array<i64: 1>, scalar_prefetch = 0 : i64, scratch_operands = 3 : i64, tpu.core_type = #tpu.core_type<tc>, window_params = [{transform_indices = @transform_0, window_bounds = array<i64: 4, 2, 32>}, {transform_indices = @transform_1, window_bounds = array<i64: 2, 1>}, {pipeline_mode = #tpu.pipeline_mode<synchronous>, transform_indices = @transform_2, window_bounds = array<i64: 32, 96>}, {pipeline_mode = #tpu.pipeline_mode<synchronous>, transform_indices = @transform_3, window_bounds = array<i64: 16, 48>}, {pipeline_mode = #tpu.pipeline_mode<synchronous>, transform_indices = @transform_4, window_bounds = array<i64: 16, 48>}, {pipeline_mode = #tpu.pipeline_mode<synchronous>, transform_indices = @transform_5, window_bounds = array<i64: 1, 96>}, {pipeline_mode = #tpu.pipeline_mode<synchronous>, transform_indices = @transform_6, window_bounds = array<i64: 1, 48>}, {pipeline_mode = #tpu.pipeline_mode<synchronous>, transform_indices = @transform_7, window_bounds = array<i64: 1, 48>}, {pipeline_mode = #tpu.pipeline_mode<synchronous>, transform_indices = @transform_8, window_bounds = array<i64: 1, 32>}, {pipeline_mode = #tpu.pipeline_mode<synchronous>, transform_indices = @transform_9, window_bounds = array<i64: 1, 32>}, {pipeline_mode = #tpu.pipeline_mode<synchronous>, transform_indices = @transform_10, window_bounds = array<i64: 32, 16>}, {pipeline_mode = #tpu.pipeline_mode<synchronous>, transform_indices = @transform_11, window_bounds = array<i64: 1, 16>}, {pipeline_mode = #tpu.pipeline_mode<synchronous>, transform_indices = @transform_12, window_bounds = array<i64: 1, 16>}, {transform_indices = @transform_13, window_bounds = array<i64: 4, 2>}, {transform_indices = @transform_14, window_bounds = array<i64: 2, 32>}, {transform_indices = @transform_15, window_bounds = array<i64: 4, 2>}]} {
    %c0 = arith.constant 0 : index
    %c0_0 = arith.constant 0 : index
    %0 = vector.load %arg3[%c0, %c0_0] : memref<32x96xbf16, #tpu.memory_space<vmem>>, vector<32x96xbf16>
    %c0_1 = arith.constant 0 : index
    %c0_2 = arith.constant 0 : index
    %1 = vector.load %arg6[%c0_1, %c0_2] : memref<1x96xf32, #tpu.memory_space<vmem>>, vector<1x96xf32>
    %c0_3 = arith.constant 0 : index
    %c0_4 = arith.constant 0 : index
    %c0_5 = arith.constant 0 : index
    %2 = vector.load %arg1[%c0_3, %c0_4, %c0_5] : memref<4x2x32xbf16, #tpu.memory_space<vmem>>, vector<4x2x32xbf16>
    %3 = vector.shape_cast %2 : vector<4x2x32xbf16> to vector<8x32xbf16>
    %cst = arith.constant dense<0.000000e+00> : vector<8x96xf32>
    %4 = tpu.matmul %3, %0, %cst {dimension_numbers = #tpu.dot_dimension_numbers<[1], [0], [0], [1], [0, 0, 1, 1], [], []>} : vector<8x32xbf16>, vector<32x96xbf16>, vector<8x96xf32> -> vector<8x96xf32>
    %5 = vector.broadcast %1 : vector<1x96xf32> to vector<8x96xf32>
    %6 = arith.addf %4, %5 : vector<8x96xf32>
    %7 = vector.shape_cast %6 : vector<8x96xf32> to vector<4x2x96xf32>
    %8 = arith.truncf %7 : vector<4x2x96xf32> to vector<4x2x96xbf16>
    %c0_6 = arith.constant 0 : index
    %c0_7 = arith.constant 0 : index
    %c0_8 = arith.constant 0 : index
    %9 = vector.load %arg17[%c0_6, %c0_7, %c0_8] : memref<4x2x96xbf16, #tpu.memory_space<vmem>>, vector<4x2x96xbf16>
    tpu.vector_store %arg17[%c0_6, %c0_7, %c0_8], %8 {strides = array<i32>} : memref<4x2x96xbf16, #tpu.memory_space<vmem>>, vector<4x2x96xbf16>,
    %c0_9 = arith.constant 0 : index
    %c0_10 = arith.constant 0 : index
    %10 = vector.load %arg4[%c0_9, %c0_10] : memref<16x48xbf16, #tpu.memory_space<vmem>>, vector<16x48xbf16>
    %c0_11 = arith.constant 0 : index
    %c0_12 = arith.constant 0 : index
    %11 = vector.load %arg5[%c0_11, %c0_12] : memref<16x48xbf16, #tpu.memory_space<vmem>>, vector<16x48xbf16>
    %c0_13 = arith.constant 0 : index
    %c0_14 = arith.constant 0 : index
    %12 = vector.load %arg7[%c0_13, %c0_14] : memref<1x48xf32, #tpu.memory_space<vmem>>, vector<1x48xf32>
    %13 = vector.shape_cast %12 : vector<1x48xf32> to vector<1x48xf32>
    %14 = vector.broadcast %13 : vector<1x48xf32> to vector<2x48xf32>
    %c0_15 = arith.constant 0 : index
    %c0_16 = arith.constant 0 : index
    %15 = vector.load %arg8[%c0_15, %c0_16] : memref<1x48xf32, #tpu.memory_space<vmem>>, vector<1x48xf32>
    %16 = vector.shape_cast %15 : vector<1x48xf32> to vector<1x48xf32>
    %17 = vector.broadcast %16 : vector<1x48xf32> to vector<2x48xf32>
    %c0_17 = arith.constant 0 : index
    %c0_18 = arith.constant 0 : index
    %18 = vector.load %arg2[%c0_17, %c0_18] : memref<2x1xf32, #tpu.memory_space<vmem>>, vector<2x1xf32>
    %cst_19 = arith.constant 0.000000e+00 : f32
    %19 = vector.broadcast %cst_19 : f32 to vector<2x16xf32>
    %c0_i32 = arith.constant 0 : i32
    %c4_i32 = arith.constant 4 : i32
    %20 = arith.addi %c0_i32, %c4_i32 : i32
    %c1_i32 = arith.constant 1 : i32
    %21:2 = scf.for %arg20 = %c0_i32 to %20 step %c1_i32 iter_args(%arg21 = %19, %arg22 = %19) -> (vector<2x16xf32>, vector<2x16xf32>)  : i32 {
      %c3_i32 = arith.constant 3 : i32
      %126 = arith.subi %c3_i32, %arg20 : i32
      %127 = arith.index_cast %arg20 : i32 to index
      %c0_63 = arith.constant 0 : index
      %c0_64 = arith.constant 0 : index
      %128 = vector.load %arg17[%127, %c0_63, %c0_64] : memref<4x2x96xbf16, #tpu.memory_space<vmem>>, vector<1x2x96xbf16>
      %129 = vector.shape_cast %128 : vector<1x2x96xbf16> to vector<2x96xbf16>
      %130 = arith.sitofp %arg20 : i32 to f32
      %131 = vector.broadcast %130 : f32 to vector<2x1xf32>
      %132 = arith.cmpf olt, %131, %18 : vector<2x1xf32>
      %133 = arith.extui %132 : vector<2x1xi1> to vector<2x1xi32>
      %134 = arith.sitofp %133 : vector<2x1xi32> to vector<2x1xf32>
      %135 = vector.extract_strided_slice %129 {offsets = [0, 0], sizes = [2, 48], strides = [1, 1]} : vector<2x96xbf16> to vector<2x48xbf16>
      %136 = arith.truncf %arg21 : vector<2x16xf32> to vector<2x16xbf16>
      %cst_65 = arith.constant dense<0.000000e+00> : vector<2x48xf32>
      %137 = tpu.matmul %136, %10, %cst_65 {dimension_numbers = #tpu.dot_dimension_numbers<[1], [0], [0], [1], [0, 0, 1, 1], [], []>} : vector<2x16xbf16>, vector<16x48xbf16>, vector<2x48xf32> -> vector<2x48xf32>
      %138 = arith.addf %137, %14 : vector<2x48xf32>
      %139 = arith.extf %135 : vector<2x48xbf16> to vector<2x48xf32>
      %140 = vector.extract_strided_slice %139 {offsets = [0, 0], sizes = [2, 16], strides = [1, 1]} : vector<2x48xf32> to vector<2x16xf32>
      %141 = vector.extract_strided_slice %138 {offsets = [0, 0], sizes = [2, 16], strides = [1, 1]} : vector<2x48xf32> to vector<2x16xf32>
      %142 = arith.addf %140, %141 : vector<2x16xf32>
      %143 = arith.negf %142 : vector<2x16xf32>
      %144 = math.exp %143 : vector<2x16xf32>
      %cst_66 = arith.constant 1.000000e+00 : f32
      %145 = vector.broadcast %cst_66 : f32 to vector<2x16xf32>
      %146 = arith.addf %145, %144 : vector<2x16xf32>
      %147 = arith.divf %145, %146 : vector<2x16xf32>
      %148 = vector.extract_strided_slice %139 {offsets = [0, 16], sizes = [2, 16], strides = [1, 1]} : vector<2x48xf32> to vector<2x16xf32>
      %149 = vector.extract_strided_slice %138 {offsets = [0, 16], sizes = [2, 16], strides = [1, 1]} : vector<2x48xf32> to vector<2x16xf32>
      %150 = arith.addf %148, %149 : vector<2x16xf32>
      %151 = arith.negf %150 : vector<2x16xf32>
      %152 = math.exp %151 : vector<2x16xf32>
      %cst_67 = arith.constant 1.000000e+00 : f32
      %153 = vector.broadcast %cst_67 : f32 to vector<2x16xf32>
      %154 = arith.addf %153, %152 : vector<2x16xf32>
      %155 = arith.divf %153, %154 : vector<2x16xf32>
      %156 = vector.extract_strided_slice %139 {offsets = [0, 32], sizes = [2, 16], strides = [1, 1]} : vector<2x48xf32> to vector<2x16xf32>
      %157 = vector.extract_strided_slice %138 {offsets = [0, 32], sizes = [2, 16], strides = [1, 1]} : vector<2x48xf32> to vector<2x16xf32>
      %158 = arith.mulf %147, %157 : vector<2x16xf32>
      %159 = arith.addf %156, %158 : vector<2x16xf32>
      %160 = math.tanh %159 : vector<2x16xf32>
      %cst_68 = arith.constant 1.000000e+00 : f32
      %161 = vector.broadcast %cst_68 : f32 to vector<2x16xf32>
      %162 = arith.subf %161, %155 : vector<2x16xf32>
      %163 = arith.mulf %162, %160 : vector<2x16xf32>
      %164 = arith.mulf %155, %arg21 : vector<2x16xf32>
      %165 = arith.addf %163, %164 : vector<2x16xf32>
      %166 = vector.broadcast %134 : vector<2x1xf32> to vector<2x16xf32>
      %167 = arith.mulf %165, %166 : vector<2x16xf32>
      %168 = arith.index_cast %arg20 : i32 to index
      %c0_69 = arith.constant 0 : index
      %c0_70 = arith.constant 0 : index
      %169 = vector.load %arg18[%168, %c0_69, %c0_70] : memref<4x2x16xf32, #tpu.memory_space<vmem>>, vector<1x2x16xf32>
      %170 = vector.shape_cast %169 : vector<1x2x16xf32> to vector<2x16xf32>
      %171 = vector.shape_cast %167 : vector<2x16xf32> to vector<1x2x16xf32>
      tpu.vector_store %arg18[%168, %c0_69, %c0_70], %171 {strides = array<i32>} : memref<4x2x16xf32, #tpu.memory_space<vmem>>, vector<1x2x16xf32>,
      %172 = arith.index_cast %126 : i32 to index
      %c0_71 = arith.constant 0 : index
      %c0_72 = arith.constant 0 : index
      %173 = vector.load %arg17[%172, %c0_71, %c0_72] : memref<4x2x96xbf16, #tpu.memory_space<vmem>>, vector<1x2x96xbf16>
      %174 = vector.shape_cast %173 : vector<1x2x96xbf16> to vector<2x96xbf16>
      %175 = arith.sitofp %126 : i32 to f32
      %176 = vector.broadcast %175 : f32 to vector<2x1xf32>
      %177 = arith.cmpf olt, %176, %18 : vector<2x1xf32>
      %178 = arith.extui %177 : vector<2x1xi1> to vector<2x1xi32>
      %179 = arith.sitofp %178 : vector<2x1xi32> to vector<2x1xf32>
      %180 = vector.extract_strided_slice %174 {offsets = [0, 48], sizes = [2, 48], strides = [1, 1]} : vector<2x96xbf16> to vector<2x48xbf16>
      %181 = arith.truncf %arg22 : vector<2x16xf32> to vector<2x16xbf16>
      %cst_73 = arith.constant dense<0.000000e+00> : vector<2x48xf32>
      %182 = tpu.matmul %181, %11, %cst_73 {dimension_numbers = #tpu.dot_dimension_numbers<[1], [0], [0], [1], [0, 0, 1, 1], [], []>} : vector<2x16xbf16>, vector<16x48xbf16>, vector<2x48xf32> -> vector<2x48xf32>
      %183 = arith.addf %182, %17 : vector<2x48xf32>
      %184 = arith.extf %180 : vector<2x48xbf16> to vector<2x48xf32>
      %185 = vector.extract_strided_slice %184 {offsets = [0, 0], sizes = [2, 16], strides = [1, 1]} : vector<2x48xf32> to vector<2x16xf32>
      %186 = vector.extract_strided_slice %183 {offsets = [0, 0], sizes = [2, 16], strides = [1, 1]} : vector<2x48xf32> to vector<2x16xf32>
      %187 = arith.addf %185, %186 : vector<2x16xf32>
      %188 = arith.negf %187 : vector<2x16xf32>
      %189 = math.exp %188 : vector<2x16xf32>
      %cst_74 = arith.constant 1.000000e+00 : f32
      %190 = vector.broadcast %cst_74 : f32 to vector<2x16xf32>
      %191 = arith.addf %190, %189 : vector<2x16xf32>
      %192 = arith.divf %190, %191 : vector<2x16xf32>
      %193 = vector.extract_strided_slice %184 {offsets = [0, 16], sizes = [2, 16], strides = [1, 1]} : vector<2x48xf32> to vector<2x16xf32>
      %194 = vector.extract_strided_slice %183 {offsets = [0, 16], sizes = [2, 16], strides = [1, 1]} : vector<2x48xf32> to vector<2x16xf32>
      %195 = arith.addf %193, %194 : vector<2x16xf32>
      %196 = arith.negf %195 : vector<2x16xf32>
      %197 = math.exp %196 : vector<2x16xf32>
      %cst_75 = arith.constant 1.000000e+00 : f32
      %198 = vector.broadcast %cst_75 : f32 to vector<2x16xf32>
      %199 = arith.addf %198, %197 : vector<2x16xf32>
      %200 = arith.divf %198, %199 : vector<2x16xf32>
      %201 = vector.extract_strided_slice %184 {offsets = [0, 32], sizes = [2, 16], strides = [1, 1]} : vector<2x48xf32> to vector<2x16xf32>
      %202 = vector.extract_strided_slice %183 {offsets = [0, 32], sizes = [2, 16], strides = [1, 1]} : vector<2x48xf32> to vector<2x16xf32>
      %203 = arith.mulf %192, %202 : vector<2x16xf32>
      %204 = arith.addf %201, %203 : vector<2x16xf32>
      %205 = math.tanh %204 : vector<2x16xf32>
      %cst_76 = arith.constant 1.000000e+00 : f32
      %206 = vector.broadcast %cst_76 : f32 to vector<2x16xf32>
      %207 = arith.subf %206, %200 : vector<2x16xf32>
      %208 = arith.mulf %207, %205 : vector<2x16xf32>
      %209 = arith.mulf %200, %arg22 : vector<2x16xf32>
      %210 = arith.addf %208, %209 : vector<2x16xf32>
      %211 = vector.broadcast %179 : vector<2x1xf32> to vector<2x16xf32>
      %212 = arith.mulf %211, %210 : vector<2x16xf32>
      %cst_77 = arith.constant 1.000000e+00 : f32
      %213 = vector.broadcast %cst_77 : f32 to vector<2x1xf32>
      %214 = arith.subf %213, %179 : vector<2x1xf32>
      %215 = vector.broadcast %214 : vector<2x1xf32> to vector<2x16xf32>
      %216 = arith.mulf %215, %arg22 : vector<2x16xf32>
      %217 = arith.addf %212, %216 : vector<2x16xf32>
      %218 = arith.index_cast %126 : i32 to index
      %c0_78 = arith.constant 0 : index
      %c0_79 = arith.constant 0 : index
      %219 = vector.load %arg19[%218, %c0_78, %c0_79] : memref<4x2x16xf32, #tpu.memory_space<vmem>>, vector<1x2x16xf32>
      %220 = vector.shape_cast %219 : vector<1x2x16xf32> to vector<2x16xf32>
      %221 = vector.shape_cast %217 : vector<2x16xf32> to vector<1x2x16xf32>
      tpu.vector_store %arg19[%218, %c0_78, %c0_79], %221 {strides = array<i32>} : memref<4x2x16xf32, #tpu.memory_space<vmem>>, vector<1x2x16xf32>,
      scf.yield %165, %217 : vector<2x16xf32>, vector<2x16xf32>
    }
    %c4_i32_20 = arith.constant 4 : i32
    %c0_21 = arith.constant 0 : index
    %c0_22 = arith.constant 0 : index
    %c0_23 = arith.constant 0 : index
    %22 = vector.load %arg18[%c0_21, %c0_22, %c0_23] : memref<4x2x16xf32, #tpu.memory_space<vmem>>, vector<4x2x16xf32>
    %c0_24 = arith.constant 0 : index
    %c0_25 = arith.constant 0 : index
    %c0_26 = arith.constant 0 : index
    %23 = vector.load %arg19[%c0_24, %c0_25, %c0_26] : memref<4x2x16xf32, #tpu.memory_space<vmem>>, vector<4x2x16xf32>
    %c0_27 = arith.constant 0 : index
    %c0_28 = arith.constant 0 : index
    %24 = vector.load %arg14[%c0_27, %c0_28] : memref<4x2xf32, #tpu.memory_space<vmem>>, vector<4x2xf32>
    %cst_29 = arith.constant dense<0.000000e+00> : vector<4x2xf32>
    %25 = vector.multi_reduction <add>, %22, %cst_29 [2] : vector<4x2x16xf32> to vector<4x2xf32>
    %26 = vector.shape_cast %25 : vector<4x2xf32> to vector<4x2x1xf32>
    %cst_30 = arith.constant dense<0.000000e+00> : vector<4x2xf32>
    %27 = vector.multi_reduction <add>, %23, %cst_30 [2] : vector<4x2x16xf32> to vector<4x2xf32>
    %28 = vector.shape_cast %27 : vector<4x2xf32> to vector<4x2x1xf32>
    %29 = arith.addf %26, %28 : vector<4x2x1xf32>
    %cst_31 = arith.constant 3.200000e+01 : f32
    %30 = vector.broadcast %cst_31 : f32 to vector<4x2x1xf32>
    %31 = arith.divf %29, %30 : vector<4x2x1xf32>
    %32 = vector.broadcast %31 : vector<4x2x1xf32> to vector<4x2x16xf32>
    %33 = arith.subf %22, %32 : vector<4x2x16xf32>
    %34 = arith.mulf %33, %33 : vector<4x2x16xf32>
    %cst_32 = arith.constant dense<0.000000e+00> : vector<4x2xf32>
    %35 = vector.multi_reduction <add>, %34, %cst_32 [2] : vector<4x2x16xf32> to vector<4x2xf32>
    %36 = vector.shape_cast %35 : vector<4x2xf32> to vector<4x2x1xf32>
    %37 = vector.broadcast %31 : vector<4x2x1xf32> to vector<4x2x16xf32>
    %38 = arith.subf %23, %37 : vector<4x2x16xf32>
    %39 = arith.mulf %38, %38 : vector<4x2x16xf32>
    %cst_33 = arith.constant dense<0.000000e+00> : vector<4x2xf32>
    %40 = vector.multi_reduction <add>, %39, %cst_33 [2] : vector<4x2x16xf32> to vector<4x2xf32>
    %41 = vector.shape_cast %40 : vector<4x2xf32> to vector<4x2x1xf32>
    %42 = arith.addf %36, %41 : vector<4x2x1xf32>
    %cst_34 = arith.constant 3.200000e+01 : f32
    %43 = vector.broadcast %cst_34 : f32 to vector<4x2x1xf32>
    %44 = arith.divf %42, %43 : vector<4x2x1xf32>
    %cst_35 = arith.constant 9.99999974E-6 : f32
    %45 = vector.broadcast %cst_35 : f32 to vector<4x2x1xf32>
    %46 = arith.addf %44, %45 : vector<4x2x1xf32>
    %47 = math.rsqrt %46 : vector<4x2x1xf32>
    %c0_36 = arith.constant 0 : index
    %c0_37 = arith.constant 0 : index
    %48 = vector.load %arg9[%c0_36, %c0_37] : memref<1x32xf32, #tpu.memory_space<vmem>>, vector<1x32xf32>
    %c0_38 = arith.constant 0 : index
    %c0_39 = arith.constant 0 : index
    %49 = vector.load %arg10[%c0_38, %c0_39] : memref<1x32xf32, #tpu.memory_space<vmem>>, vector<1x32xf32>
    %50 = vector.broadcast %31 : vector<4x2x1xf32> to vector<4x2x16xf32>
    %51 = arith.subf %22, %50 : vector<4x2x16xf32>
    %52 = vector.broadcast %47 : vector<4x2x1xf32> to vector<4x2x16xf32>
    %53 = arith.mulf %51, %52 : vector<4x2x16xf32>
    %54 = vector.extract_strided_slice %48 {offsets = [0, 0], sizes = [1, 16], strides = [1, 1]} : vector<1x32xf32> to vector<1x16xf32>
    %55 = vector.shape_cast %54 : vector<1x16xf32> to vector<1x1x16xf32>
    %56 = vector.broadcast %55 : vector<1x1x16xf32> to vector<4x2x16xf32>
    %57 = arith.mulf %53, %56 : vector<4x2x16xf32>
    %58 = vector.extract_strided_slice %49 {offsets = [0, 0], sizes = [1, 16], strides = [1, 1]} : vector<1x32xf32> to vector<1x16xf32>
    %59 = vector.shape_cast %58 : vector<1x16xf32> to vector<1x1x16xf32>
    %60 = vector.broadcast %59 : vector<1x1x16xf32> to vector<4x2x16xf32>
    %61 = arith.addf %57, %60 : vector<4x2x16xf32>
    %62 = vector.broadcast %31 : vector<4x2x1xf32> to vector<4x2x16xf32>
    %63 = arith.subf %23, %62 : vector<4x2x16xf32>
    %64 = vector.broadcast %47 : vector<4x2x1xf32> to vector<4x2x16xf32>
    %65 = arith.mulf %63, %64 : vector<4x2x16xf32>
    %66 = vector.extract_strided_slice %48 {offsets = [0, 16], sizes = [1, 16], strides = [1, 1]} : vector<1x32xf32> to vector<1x16xf32>
    %67 = vector.shape_cast %66 : vector<1x16xf32> to vector<1x1x16xf32>
    %68 = vector.broadcast %67 : vector<1x1x16xf32> to vector<4x2x16xf32>
    %69 = arith.mulf %65, %68 : vector<4x2x16xf32>
    %70 = vector.extract_strided_slice %49 {offsets = [0, 16], sizes = [1, 16], strides = [1, 1]} : vector<1x32xf32> to vector<1x16xf32>
    %71 = vector.shape_cast %70 : vector<1x16xf32> to vector<1x1x16xf32>
    %72 = vector.broadcast %71 : vector<1x1x16xf32> to vector<4x2x16xf32>
    %73 = arith.addf %69, %72 : vector<4x2x16xf32>
    %c0_40 = arith.constant 0 : index
    %c0_41 = arith.constant 0 : index
    %74 = vector.load %arg11[%c0_40, %c0_41] : memref<32x16xbf16, #tpu.memory_space<vmem>>, vector<32x16xbf16>
    %75 = vector.shape_cast %61 : vector<4x2x16xf32> to vector<8x16xf32>
    %76 = arith.truncf %75 : vector<8x16xf32> to vector<8x16xbf16>
    %77 = vector.extract_strided_slice %74 {offsets = [0, 0], sizes = [16, 16], strides = [1, 1]} : vector<32x16xbf16> to vector<16x16xbf16>
    %cst_42 = arith.constant dense<0.000000e+00> : vector<8x16xf32>
    %78 = tpu.matmul %76, %77, %cst_42 {dimension_numbers = #tpu.dot_dimension_numbers<[1], [0], [0], [1], [0, 0, 1, 1], [], []>} : vector<8x16xbf16>, vector<16x16xbf16>, vector<8x16xf32> -> vector<8x16xf32>
    %79 = vector.shape_cast %73 : vector<4x2x16xf32> to vector<8x16xf32>
    %80 = arith.truncf %79 : vector<8x16xf32> to vector<8x16xbf16>
    %81 = vector.extract_strided_slice %74 {offsets = [16, 0], sizes = [16, 16], strides = [1, 1]} : vector<32x16xbf16> to vector<16x16xbf16>
    %cst_43 = arith.constant dense<0.000000e+00> : vector<8x16xf32>
    %82 = tpu.matmul %80, %81, %cst_43 {dimension_numbers = #tpu.dot_dimension_numbers<[1], [0], [0], [1], [0, 0, 1, 1], [], []>} : vector<8x16xbf16>, vector<16x16xbf16>, vector<8x16xf32> -> vector<8x16xf32>
    %83 = arith.addf %78, %82 : vector<8x16xf32>
    %c0_44 = arith.constant 0 : index
    %c0_45 = arith.constant 0 : index
    %84 = vector.load %arg12[%c0_44, %c0_45] : memref<1x16xf32, #tpu.memory_space<vmem>>, vector<1x16xf32>
    %85 = vector.broadcast %84 : vector<1x16xf32> to vector<8x16xf32>
    %86 = arith.addf %83, %85 : vector<8x16xf32>
    %87 = math.tanh %86 : vector<8x16xf32>
    %88 = vector.shape_cast %87 : vector<8x16xf32> to vector<4x2x16xf32>
    %c0_46 = arith.constant 0 : index
    %c0_47 = arith.constant 0 : index
    %89 = vector.load %arg13[%c0_46, %c0_47] : memref<1x16xf32, #tpu.memory_space<vmem>>, vector<1x16xf32>
    %90 = vector.shape_cast %89 : vector<1x16xf32> to vector<1x1x16xf32>
    %91 = vector.broadcast %90 : vector<1x1x16xf32> to vector<4x2x16xf32>
    %92 = arith.mulf %88, %91 : vector<4x2x16xf32>
    %cst_48 = arith.constant dense<0.000000e+00> : vector<4x2xf32>
    %93 = vector.multi_reduction <add>, %92, %cst_48 [2] : vector<4x2x16xf32> to vector<4x2xf32>
    %cst_49 = arith.constant 0.000000e+00 : f32
    %94 = vector.broadcast %cst_49 : f32 to vector<4x2xf32>
    %95 = arith.cmpf ogt, %24, %94 : vector<4x2xf32>
    %cst_50 = arith.constant -3.000000e+38 : f32
    %96 = vector.broadcast %cst_50 : f32 to vector<4x2xf32>
    %97 = arith.select %95, %93, %96 : vector<4x2xi1>, vector<4x2xf32>
    %cst_51 = arith.constant dense<0xFF800000> : vector<2xf32>
    %98 = vector.multi_reduction <maximumf>, %97, %cst_51 [0] : vector<4x2xf32> to vector<2xf32>
    %99 = vector.shape_cast %98 : vector<2xf32> to vector<1x2xf32>
    %cst_52 = arith.constant 0.000000e+00 : f32
    %100 = vector.broadcast %cst_52 : f32 to vector<4x2xf32>
    %101 = arith.cmpf ogt, %24, %100 : vector<4x2xf32>
    %102 = vector.broadcast %99 : vector<1x2xf32> to vector<4x2xf32>
    %103 = arith.subf %93, %102 : vector<4x2xf32>
    %cst_53 = arith.constant 0.000000e+00 : f32
    %104 = vector.broadcast %cst_53 : f32 to vector<4x2xf32>
    %105 = arith.select %101, %103, %104 : vector<4x2xi1>, vector<4x2xf32>
    %106 = math.exp %105 : vector<4x2xf32>
    %107 = arith.mulf %106, %24 : vector<4x2xf32>
    %cst_54 = arith.constant dense<0.000000e+00> : vector<2xf32>
    %108 = vector.multi_reduction <add>, %107, %cst_54 [0] : vector<4x2xf32> to vector<2xf32>
    %109 = vector.shape_cast %108 : vector<2xf32> to vector<1x2xf32>
    %cst_55 = arith.constant 9.99999996E-13 : f32
    %110 = vector.broadcast %cst_55 : f32 to vector<1x2xf32>
    %111 = arith.maximumf %109, %110 : vector<1x2xf32>
    %112 = tpu.reciprocal %111 {approx = true} : vector<1x2xf32> -> vector<1x2xf32>
    %113 = vector.broadcast %112 : vector<1x2xf32> to vector<4x2xf32>
    %114 = arith.mulf %107, %113 : vector<4x2xf32>
    %115 = vector.shape_cast %114 : vector<4x2xf32> to vector<4x2x1xf32>
    %116 = vector.broadcast %115 : vector<4x2x1xf32> to vector<4x2x16xf32>
    %117 = arith.mulf %22, %116 : vector<4x2x16xf32>
    %cst_56 = arith.constant dense<0.000000e+00> : vector<2x16xf32>
    %118 = vector.multi_reduction <add>, %117, %cst_56 [0] : vector<4x2x16xf32> to vector<2x16xf32>
    %119 = vector.shape_cast %114 : vector<4x2xf32> to vector<4x2x1xf32>
    %120 = vector.broadcast %119 : vector<4x2x1xf32> to vector<4x2x16xf32>
    %121 = arith.mulf %23, %120 : vector<4x2x16xf32>
    %cst_57 = arith.constant dense<0.000000e+00> : vector<2x16xf32>
    %122 = vector.multi_reduction <add>, %121, %cst_57 [0] : vector<4x2x16xf32> to vector<2x16xf32>
    %c0_58 = arith.constant 0 : index
    %c0_59 = arith.constant 0 : index
    %123 = vector.load %arg15[%c0_58, %c0_59] : memref<2x32xf32, #tpu.memory_space<vmem>>, vector<2x16xf32>
    tpu.vector_store %arg15[%c0_58, %c0_59], %118 {strides = array<i32>} : memref<2x32xf32, #tpu.memory_space<vmem>>, vector<2x16xf32>,
    %c0_60 = arith.constant 0 : index
    %c16 = arith.constant 16 : index
    %124 = vector.load %arg15[%c0_60, %c16] : memref<2x32xf32, #tpu.memory_space<vmem>>, vector<2x16xf32>
    tpu.vector_store %arg15[%c0_60, %c16], %122 {strides = array<i32>} : memref<2x32xf32, #tpu.memory_space<vmem>>, vector<2x16xf32>,
    %c0_61 = arith.constant 0 : index
    %c0_62 = arith.constant 0 : index
    %125 = vector.load %arg16[%c0_61, %c0_62] : memref<4x2xf32, #tpu.memory_space<vmem>>, vector<4x2xf32>
    tpu.vector_store %arg16[%c0_61, %c0_62], %114 {strides = array<i32>} : memref<4x2xf32, #tpu.memory_space<vmem>>, vector<4x2xf32>,
    return
  }
  func.func @transform_0(%arg0: i32) -> (i32, i32, i32) {
    %c0_i32 = arith.constant 0 : i32
    %c0_i32_0 = arith.constant 0 : i32
    %c0_i32_1 = arith.constant 0 : i32
    return %c0_i32, %arg0, %c0_i32_0 : i32, i32, i32
  }
  func.func @transform_1(%arg0: i32) -> (i32, i32) {
    %c0_i32 = arith.constant 0 : i32
    %c0_i32_0 = arith.constant 0 : i32
    return %arg0, %c0_i32 : i32, i32
  }
  func.func @transform_2(%arg0: i32) -> (i32, i32) {
    %c0_i32 = arith.constant 0 : i32
    %c0_i32_0 = arith.constant 0 : i32
    %c0_i32_1 = arith.constant 0 : i32
    return %c0_i32, %c0_i32_0 : i32, i32
  }
  func.func @transform_3(%arg0: i32) -> (i32, i32) {
    %c0_i32 = arith.constant 0 : i32
    %c0_i32_0 = arith.constant 0 : i32
    %c0_i32_1 = arith.constant 0 : i32
    return %c0_i32, %c0_i32_0 : i32, i32
  }
  func.func @transform_4(%arg0: i32) -> (i32, i32) {
    %c0_i32 = arith.constant 0 : i32
    %c0_i32_0 = arith.constant 0 : i32
    %c0_i32_1 = arith.constant 0 : i32
    return %c0_i32, %c0_i32_0 : i32, i32
  }
  func.func @transform_5(%arg0: i32) -> (i32, i32) {
    %c0_i32 = arith.constant 0 : i32
    %c0_i32_0 = arith.constant 0 : i32
    %c0_i32_1 = arith.constant 0 : i32
    return %c0_i32, %c0_i32_0 : i32, i32
  }
  func.func @transform_6(%arg0: i32) -> (i32, i32) {
    %c0_i32 = arith.constant 0 : i32
    %c0_i32_0 = arith.constant 0 : i32
    %c0_i32_1 = arith.constant 0 : i32
    return %c0_i32, %c0_i32_0 : i32, i32
  }
  func.func @transform_7(%arg0: i32) -> (i32, i32) {
    %c0_i32 = arith.constant 0 : i32
    %c0_i32_0 = arith.constant 0 : i32
    %c0_i32_1 = arith.constant 0 : i32
    return %c0_i32, %c0_i32_0 : i32, i32
  }
  func.func @transform_8(%arg0: i32) -> (i32, i32) {
    %c0_i32 = arith.constant 0 : i32
    %c0_i32_0 = arith.constant 0 : i32
    %c0_i32_1 = arith.constant 0 : i32
    return %c0_i32, %c0_i32_0 : i32, i32
  }
  func.func @transform_9(%arg0: i32) -> (i32, i32) {
    %c0_i32 = arith.constant 0 : i32
    %c0_i32_0 = arith.constant 0 : i32
    %c0_i32_1 = arith.constant 0 : i32
    return %c0_i32, %c0_i32_0 : i32, i32
  }
  func.func @transform_10(%arg0: i32) -> (i32, i32) {
    %c0_i32 = arith.constant 0 : i32
    %c0_i32_0 = arith.constant 0 : i32
    %c0_i32_1 = arith.constant 0 : i32
    return %c0_i32, %c0_i32_0 : i32, i32
  }
  func.func @transform_11(%arg0: i32) -> (i32, i32) {
    %c0_i32 = arith.constant 0 : i32
    %c0_i32_0 = arith.constant 0 : i32
    %c0_i32_1 = arith.constant 0 : i32
    return %c0_i32, %c0_i32_0 : i32, i32
  }
  func.func @transform_12(%arg0: i32) -> (i32, i32) {
    %c0_i32 = arith.constant 0 : i32
    %c0_i32_0 = arith.constant 0 : i32
    %c0_i32_1 = arith.constant 0 : i32
    return %c0_i32, %c0_i32_0 : i32, i32
  }
  func.func @transform_13(%arg0: i32) -> (i32, i32) {
    %c0_i32 = arith.constant 0 : i32
    %c0_i32_0 = arith.constant 0 : i32
    return %c0_i32, %arg0 : i32, i32
  }
  func.func @transform_14(%arg0: i32) -> (i32, i32) {
    %c0_i32 = arith.constant 0 : i32
    %c0_i32_0 = arith.constant 0 : i32
    return %arg0, %c0_i32 : i32, i32
  }
  func.func @transform_15(%arg0: i32) -> (i32, i32) {
    %c0_i32 = arith.constant 0 : i32
    %c0_i32_0 = arith.constant 0 : i32
    return %c0_i32, %arg0 : i32, i32
  }
}

</mosaic_0001>

<bundles_post_ra>
// kernel: lt.36
= control target key start
LH: loop header
LB: loop body
LE: loop exit
PB: predicated region body
PF: predicated region fallthrough
CT: control target
= control target key end

     0   :  { %vm7_vm0 = vcmask 31744   ;;  %vm13_vm1 = vcmask 64544   ;;  %s39_s0 = inlined_call_operand.vmem [shape: s32[2,4], index: 0, kind: input, shape index: {}]   ;;  %s40_s1 = inlined_call_operand.vmem [shape: s32[8], index: 1, kind: output, shape index: {}]  }
   0x1   :  { %v4_v0 = vld [vmem:[%s39_s0] sm:$0x3]  ;;  %s22_s0 = smov 4  }
   0x2   :  { %5 = vst [vmem:[#allocation1] sm:$0x3] %v4_v0 }
   0x9   :  { %v10_v1 = vld [vmem:[#allocation1 + $0x1] sm:$0x1]   ;;  %v6_v2 = vld [vmem:[#allocation1] sm:$0x1]  }
   0xa   :  { %11 = vrot.lane.b32.xlu0 %v10_v1, %s22_s0  ;;  %8 = vst.msk [vmem:[#allocation0] sm:$0x1] %vm7_vm0, %v6_v2  }
  0x7c   :  { %v12_v3 = vpop.permute.xlu0 %11  }
  0x7d   :  { %14 = vst.msk [vmem:[#allocation0] sm:$0x1] %vm13_vm1, %v12_v3  }
  0x84   :  { %v18_v4 = vld [vmem:[#allocation0] sm:$0x1] }
  0x85   :  { %20 = vst [vmem:[%s40_s1] sm:$0x1] %v18_v4 }

// kernel: sentence_attention_forward.3
= control target key start
LH: loop header
LB: loop body
LE: loop exit
PB: predicated region body
PF: predicated region fallthrough
CT: control target
= control target key end

     0   :  { %21 = vsyncpa [#allocation6], 0  ;;  %v75_v1 = vlaneseq  ;;  %v1185_v2 = vmov 0.0   ;;  %vm1186_vm0 = vmmov 0   ;;  %v1187_v8 = vmov 1966171168   ;;  %s1594_s0 = inlined_call_operand.vmem [shape: bf16[4,2,32], index: 0, kind: input, shape index: {}]   ;;  %s1595_s1 = inlined_call_operand.vmem [shape: f32[2,1], index: 1, kind: input, shape index: {}]   ;;  %s1596_s2 = inlined_call_operand.vmem [shape: bf16[32,96], index: 2, kind: input, shape index: {}]   ;;  %s1597_s3 = inlined_call_operand.vmem [shape: bf16[16,48], index: 3, kind: input, shape index: {}]   ;;  %s1598_s4 = inlined_call_operand.vmem [shape: bf16[16,48], index: 4, kind: input, shape index: {}]   ;;  %s1599_s5 = inlined_call_operand.vmem [shape: f32[1,96], index: 5, kind: input, shape index: {}]   ;;  %s1600_s6 = inlined_call_operand.vmem [shape: f32[1,48], index: 6, kind: input, shape index: {}]   ;;  %s1601_s7 = inlined_call_operand.vmem [shape: f32[1,48], index: 7, kind: input, shape index: {}]   ;;  %s1602_s8 = inlined_call_operand.vmem [shape: f32[1,32], index: 8, kind: input, shape index: {}]   ;;  %s1603_s9 = inlined_call_operand.vmem [shape: f32[1,32], index: 9, kind: input, shape index: {}]   ;;  %s1604_s10 = inlined_call_operand.vmem [shape: bf16[32,16], index: 10, kind: input, shape index: {}]   ;;  %s1605_s11 = inlined_call_operand.vmem [shape: f32[1,16], index: 11, kind: input, shape index: {}]   ;;  %s1606_s12 = inlined_call_operand.vmem [shape: f32[1,16], index: 12, kind: input, shape index: {}]   ;;  %s1607_s13 = inlined_call_operand.vmem [shape: f32[4,2], index: 13, kind: input, shape index: {}]   ;;  %s1608_s14 = inlined_call_operand.hbm [shape: f32[2,32], index: 14, kind: output, shape index: {0}]   ;;  %s1609_s15 = inlined_call_operand.vmem [shape: f32[4,2], index: 15, kind: output, shape index: {1}]  }
   0x1   :  { %v1103_v0 = vld [vmem:[%s1596_s2] sm:$0xff]   ;;  %1030 = vmatprep.subr.bf16.mxu0 %v1185_v2  ;;  %v1104_v3 = vld [vmem:[%s1596_s2 + $0x8] sm:$0xff]   ;;  %1034 = vmatprep.mubr.msk.bf16.mxu0 %vm1186_vm0, %v1185_v2  ;;  %v73_v9 = vunpack.c.l.s4 %v1187_v8  ;;  %vm106_vm1 = vcmask 261120   ;;  %v1188_v26 = vmov 1983009808   ;;  %vm176_vm2 = vcmask 778240  }
   0x2   :  { %1031 = vmatpush3.bf16.msra.mxu0 %v1103_v0  ;;  %v56_v4 = vld [vmem:[%s1594_s0] sm:$0x1]  ;;  %v57_v5 = vld [vmem:[%s1594_s0 + $0x1] sm:$0x1]  ;;  %v58_v6 = vld [vmem:[%s1594_s0 + $0x2] sm:$0x1]  ;;  %v153_v27 = vunpack.c.l.s4 %v1188_v26 }
   0x3   :  { %1032 = vmatprep.subr.bf16.mxu0 %v1185_v2  ;;  %v59_v7 = vld [vmem:[%s1594_s0 + $0x3] sm:$0x1]  ;;  %v1305_v10 = vshrl.u32 %v75_v1, 7  ;;  %v70_v11 = vcombine.low %v56_v4, %v57_v5  ;;  %v74_v13 = vunpack.c.0.s8 %v73_v9  ;;  %v1316_v20 = vld [vmem:[%s1597_s3 + $0x4] sm:$0xf]  ;;  %v1351_v45 = vmov 0.0  }
   0x4   :  { %v71_v12 = vcombine.low %v58_v6, %v59_v7  ;;  %v1311_v19 = vld [vmem:[%s1597_s3] sm:$0xf]  ;;  %v1326_v22 = vld [vmem:[%s1598_s4 + $0x4] sm:$0xf]  ;;  %v154_v28 = vunpack.c.0.s8 %v153_v27  ;;  %v1353_v46 = vmov 0.0  }
   0x5   :  { %v77_v14 = vsub.s32 %v74_v13, %v1305_v10  ;;  %v1321_v21 = vld [vmem:[%s1598_s4] sm:$0xf] }
   0x6   :  { %1033 = vmatpush3.bf16.msra.mxu0 %v1104_v3  ;;  %v1331_v23 = vld [vmem:[%s1600_s6] ss:$0 sm:$0xff]  ;;  %v1347_v30 = vsub.s32 %v154_v28, %v1305_v10 }
   0x7   :  { %v78_v15 = vrot.slane %v70_v11, %v77_v14  ;;  %v85_v16 = vrot.slane %v71_v12, %v77_v14  ;;  %v1336_v24 = vld [vmem:[%s1601_s7] ss:$0 sm:$0xff] }
   0x8   :  { %v1341_v25 = vld [vmem:[%s1595_s1] sm:$0x3]  ;;  %s1355_s1 = smov 0  }
   0x9   :  { %v86_v17 = vcombine.low %v78_v15, %v85_v16  ;;  %v995_v29 = vld [vmem:[%s1599_s5] ss:$0 sm:$0xff] }
   0xb   :  { %v93_v18 = vrot.slane %v86_v17, %v77_v14 }
   0xd   :  { %1035 = vmatmul.mubr.msk.bf16.vlgmr.msra.gmra.mrb[0].mxu0 %vm106_vm1, %v93_v18 }
  0xe0   :  { %v144_v31 = vpop.f32.mrb[0].mxu0 }
  0xe1   :  { %v145_v32 = vadd.f32 %v995_v29, %v144_v31  ;;  %v1036_v33 = vpop.f32.mrb[1].mxu0 }
  0xe2   :  { %v147_v34 = vpop.f32.mrb[2].mxu0 }
  0xe3   :  { %v151_v35 = vcombine.high %v145_v32, %v145_v32  ;;  %v158_v36 = vrot.slane %v145_v32, %v1347_v30  ;;  %v1037_v37 = vpop.f32.mrb[3].mxu0 }
  0xe5   :  { %v165_v38 = vrot.slane %v151_v35, %v1347_v30  ;;  %v166_v39 = vcombine.high %v158_v36, %v158_v36  ;;  %v172_v40 = vpack.c.bf16 %v158_v36, %v158_v36 }
  0xe7   :  { %v167_v41 = vcombine.high %v165_v38, %v165_v38  ;;  %v173_v42 = vpack.c.bf16 %v166_v39, %v166_v39  ;;  %v174_v43 = vpack.c.bf16 %v165_v38, %v165_v38  ;;  %177 = vst.msk [vmem:[#allocation2] sm:$0x1] %vm176_vm2, %v172_v40 }
  0xe9   :  { %v175_v44 = vpack.c.bf16 %v167_v41, %v167_v41  ;;  %178 = vst.msk [vmem:[#allocation2 + $0x1] sm:$0x1] %vm176_vm2, %v173_v42  ;;  %179 = vst.msk [vmem:[#allocation2 + $0x2] sm:$0x1] %vm176_vm2, %v174_v43 }
  0xeb   :  { %180 = vst.msk [vmem:[#allocation2 + $0x3] sm:$0x1] %vm176_vm2, %v175_v44 }
  0xec LB: > { %v1007_v47 = vcombine.low %v1321_v21, %v1326_v22  ;;  %v1189_v48 = vmov 0.0   ;;  %vm1190_vm3 = vmmov 0   ;;  %v1002_v49 = vcombine.low %v1311_v19, %v1316_v20  ;;  %s1191_s5 = smov 112   ;;  %s1192_s6 = smov 48   ;;  %s1183_s1 = sphi %s1355_s1, %s205_s1   ;;  %v1179_v46 = vphi %v1353_v46, %v303_v46   ;;  %v1175_v45 = vphi %v1351_v45, %v454_v45  }
  0xed   : > { %1044 = vmatprep.subr.bf16.mxu1 %v1189_v48  ;;  %1046 = vmatprep.mubr.msk.bf16.mxu1 %vm1190_vm3, %v1189_v48  ;;  %v216_v50 = vpack.c.bf16 %v1179_v46, %v1179_v46  ;;  %vm226_vm4 = vcmask 130048   ;;  %v332_v51 = vpack.c.bf16 %v1175_v45, %v1175_v45  ;;  %s1193_s7 = smov 16   ;;  %s1384_s27 = ssub.s32 3, %s1183_s1  ;;  %v1196_v14 = vmov 0  }
  0xee   : > { %1045 = vmatpush3.bf16.msra.mxu1 %v1007_v47  ;;  %1038 = vmatprep.subr.bf16.mxu0 %v1189_v48  ;;  %s325_s28 = scalar_lea.vmem [#allocation2], %s1384_s27  ;;  %s1194_s2 = smov 96   ;;  %v424_v37 = vrot.slane %v1175_v45, %v1347_v30  ;;  %vm323_vm7 = vcmask 123904  }
  0xef   : > { %1039 = vmatpush3.bf16.msra.mxu0 %v1002_v49  ;;  %1040 = vmatprep.mubr.msk.bf16.mxu0 %vm1190_vm3, %v1189_v48  ;;  %s1195_s29 = smov 32   ;;  %s211_s30 = scvt.s32.f32 %s1183_s1 }
  0xf0   : > { %218 = vrot.lane.b32.xlu0 %v216_v50, %s1191_s5  ;;  %1106 = vset.pattern.permute.xlu1 %v1196_v14  ;;  %s209_s0 = scalar_lea.vmem [#allocation2], %s1183_s1  ;;  %s327_s16 = scvt.s32.f32 %s1384_s27 }
  0xf1   : > { %1047 = vmatmul.mubr.msk.bf16.vlgmr.msra.gmra.mrb[0].mxu1 %vm226_vm4, %v332_v51  ;;  %1105 = vset.pattern.permute.xlu0 %v1196_v14  ;;  %v212_v15 = vstv %s211_s30  ;;  %s1197_s17 = smov 64   ;;  %s1010_s18 = sshll.u32 %s1384_s27, 1 }
  0xf2   : > { %v326_v59 = vld [vmem:[%s325_s28] sm:$0x1]  ;;  %vm213_vm5 = vcmp.lt.f32.partialorder %v212_v15, %v1341_v25  ;;  %v328_v38 = vstv %s327_s16  ;;  %s456_s19 = scalar_lea.vmem [#allocation4], %s1010_s18  ;;  %s1005_s20 = sshll.u32 %s1183_s1, 1 }
  0xf3   : > { %v382_v0 = vunpack.c.l.bf16 %v326_v59  ;;  %v1001_v16 = vsel %vm213_vm5, 1.0, %v1189_v48  ;;  %v210_v17 = vld [vmem:[%s209_s0] sm:$0x1]  ;;  %vm329_vm6 = vcmp.lt.f32.partialorder %v328_v38, %v1341_v25  ;;  %s322_s21 = scalar_lea.vmem [#allocation3], %s1005_s20  ;;  %s205_s1 = sadd.s32 1, %s1183_s1  }
  0xf4   : > { %v270_v18 = vunpack.c.l.bf16 %v210_v17  ;;  %v1006_v39 = vsel %vm329_vm6, 1.0, %v1189_v48  ;;  %p202_p0 = scmp.ge.s32.totalorder %s205_s1, 4  }
  0xf5   : > { %v447_v43 = vsub.f32 1.0, %v1006_v39  ;;  %1050 = vmatprep.subr.bf16.mxu0 (%p202_p0), %v1185_v2  ;;  %1056 = vmatprep.subr.bf16.mxu1 (%p202_p0), %v1185_v2  ;;  %s1198_s24 = smov (%p202_p0), 112   ;;  %vm827_vm8 = vcmask (%p202_p0), 1041409   ;;  %vm829_vm9 = vcmask (%p202_p0), 1042434   ;;  %vm831_vm10 = vcmask (%p202_p0), 1043459   ;;  %s1201_s27 = smov (%p202_p0), [#allocation5]  }
  0xf6   :  { %1058 = vmatprep.mubr.msk.bf16.mxu1 (%p202_p0), %vm1186_vm0, %v1185_v2  ;;  %vm835_vm12 = vcmask (%p202_p0), 11264   ;;  %s966_s28 = sshll.u32 (%p202_p0), %s1201_s27, 4  ;;  %vm957_vm13 = vcmask (%p202_p0), 255104   ;;  %s967_s28 = int_to_ptr.vmem [resolvable:$true] %s966_s28 }
  0xf7   :  { %p1142_p2 = scmp.lt.s32.totalorder (%p202_p0), %s967_s28, %s967_s28 }
 0x162   : > { %v219_v52 = vpop.permute.xlu0 %218 }
 0x163   : > { %1041 = vmatmul.mubr.msk.bf16.vlgmr.msra.gmra.mrb[0].mxu0 %vm226_vm4, %v219_v52 }
 0x164   :  { %1052 = vmatprep.mubr.msk.bf16.mxu0 (%p202_p0), %vm1186_vm0, %v1185_v2 }
 0x1c4   : > { %v376_v53 = vpop.f32.mrb[0].mxu1 }
 0x1c5   : > { %v377_v54 = vadd.f32 %v1336_v24, %v376_v53  ;;  %v1048_v55 = vpop.f32.mrb[1].mxu1 }
 0x1c6   : > { %v379_v56 = vpop.f32.mrb[2].mxu1 }
 0x1c7   : > { %v390_v57 = vrot.slane %v377_v54, %v1347_v30  ;;  %v1049_v58 = vpop.f32.mrb[3].mxu1 }
 0x1c9   : > { %391 = vrot.lane.b32.xlu0 %v390_v57, %s1192_s6  ;;  %401 = vrot.lane.b32.xlu1 %v390_v57, %s1193_s7 }
 0x236   : > { %v264_v60 = vpop.f32.mrb[0].mxu0 }
 0x237   : > { %v265_v61 = vadd.f32 %v1331_v23, %v264_v60  ;;  %v1042_v62 = vpop.f32.mrb[1].mxu0 }
 0x238   : > { %v267_v63 = vpop.f32.mrb[2].mxu0 }
 0x239   : > { %v285_v3 = vrot.slane %v265_v61, %v1347_v30  ;;  %v1043_v4 = vpop.f32.mrb[3].mxu0  ;;  %v271_v26 = vadd.f32 %v270_v18, %v265_v61 }
 0x23b   : > { %286 = vrot.lane.b32.xlu1 %v285_v3, %s1194_s2  ;;  %v392_v5 = vpop.permute.xlu0 %391  ;;  %v402_v11 = vpop.permute.xlu1 %401  ;;  %v1004_v27 = vmul.f32 -1.442695, %v271_v26  ;;  %s1137_s2 = scalar_lea.vmem (%p202_p0), %s967_s28, 32 }
 0x23c   : > { %v394_v6 = vadd.f32 %v392_v5, %v382_v0  ;;  %p1138_p1 = scmp.ne.s32.totalorder (%p202_p0), %s967_s28, %s1137_s2  ;;  %p1143_p3 = scmp.lt.s32.totalorder (%p202_p0), %s1137_s2, %s1137_s2 }
 0x23e   : > { %v1009_v7 = vmul.f32 -1.442695, %v394_v6  ;;  %p1144_p4 = por (%p202_p0), %p1143_p3, %p1142_p2 }
 0x240   : > { %1107 = vpow2.f32 %v1009_v7  ;;  %p1145_p5 = pnand (%p202_p0), %p1144_p4, %p1138_p1 }
 0x24a   : > { %v1108_v8 = vpop.eup %1107 }
 0x24b   : > { %v398_v9 = vadd.f32 1.0, %v1108_v8 }
 0x24d   : > { %1109 = vrcp.f32 %v398_v9 }
 0x24e   : > { %1111 = vpow2.f32 %v1004_v27 }
 0x257   : > { %v1110_v12 = vpop.eup %1109 }
 0x258   : > { %v404_v13 = vmul.f32 %v1110_v12, %v402_v11  ;;  %v1112_v28 = vpop.eup %1111  ;;  %v411_v47 = vsub.f32 1.0, %v1110_v12 }
 0x259   : > { %v275_v29 = vadd.f32 1.0, %v1112_v28 }
 0x25a   : > { %406 = vrot.lane.b32.xlu0 %v404_v13, %s1195_s29 }
 0x25b   : > { %1113 = vrcp.f32 %v275_v29 }
 0x25e   : > { %306 = vperm.xlu0 %1105, %v1001_v16  }
 0x265   : > { %v1114_v31 = vpop.eup %1113 }
 0x266   : > { %v296_v54 = vsub.f32 1.0, %v1114_v31  ;;  %v302_v56 = vmul.f32 %v1179_v46, %v1114_v31 }
 0x2ad   : > { %v287_v32 = vpop.permute.xlu1 %286 }
 0x2ae   : > { %v289_v33 = vmul.f32 %v1114_v31, %v287_v32 }
 0x2b0   : > { %291 = vrot.lane.b32.xlu1 %v289_v33, %s1195_s29 }
 0x2cc   : > { %v407_v34 = vpop.permute.xlu0 %406 }
 0x2cd   : > { %v409_v35 = vadd.f32 %v407_v34, %v382_v0 }
 0x2cf   : > { %1115 = vtanh.f32 %v409_v35 }
 0x2d9   : > { %v1116_v36 = vpop.eup %1115 }
 0x2da   : > { %413 = vrot.lane.b32.xlu1 %v1116_v36, %s1191_s5 }
 0x2dd   : > { %v307_v48 = vpop.permute.xlu0 %306 }
 0x2de   : > { %425 = vrot.lane.b32.xlu1 %v424_v37, %s1197_s17 }
 0x2e2   : > { %432 = vperm.xlu1 %1106, %v1006_v39  }
 0x322   : > { %v292_v40 = vpop.permute.xlu1 %291 }
 0x323   : > { %v294_v41 = vadd.f32 %v292_v40, %v270_v18 }
 0x325   : > { %1117 = vtanh.f32 %v294_v41 }
 0x32f   : > { %v1118_v42 = vpop.eup %1117 }
 0x330   : > { %298 = vrot.lane.b32.xlu0 %v1118_v42, %s1191_s5 }
 0x334   : > { %450 = vperm.xlu0 %1105, %v447_v43  }
 0x34c   : > { %v414_v44 = vpop.permute.xlu1 %413 }
 0x34d   : > { %v416_v50 = vmul.f32 %v414_v44, %v411_v47 }
 0x350   : > { %v426_v49 = vpop.permute.xlu1 %425 }
 0x351   : > { %v428_v51 = vmul.f32 %v1110_v12, %v426_v49 }
 0x353   : > { %v429_v52 = vadd.f32 %v428_v51, %v416_v50 }
 0x355   : > { %v442_v53 = vrot.slane %v429_v52, %v1347_v30 }
 0x357   : > { %443 = vrot.lane.b32.xlu1 %v442_v53, %s1197_s17 }
 0x361   : > { %v433_v60 = vpop.permute.xlu1 %432 }
 0x3a2   : > { %v299_v55 = vpop.permute.xlu0 %298 }
 0x3a3   : > { %v301_v57 = vmul.f32 %v299_v55, %v296_v54 }
 0x3a5   : > { %v303_v46 = vadd.f32 %v302_v56, %v301_v57  }
 0x3a7   : > { %v309_v58 = vmul.f32 %v307_v48, %v303_v46 }
 0x3a9   : > { %v317_v59 = vrot.slane %v309_v58, %v1347_v30 }
 0x3ab   : > { %318 = vrot.lane.b32.xlu0 %v317_v59, %s1191_s5 }
 0x3b3   : > { %v451_v61 = vpop.permute.xlu0 %450 }
 0x3b4   : > { %v453_v63 = vmul.f32 %v1175_v45, %v451_v61  ;;  %v1501_v61 = vld [vmem:[%s1603_s9] ss:$0 sm:$0xff] (%p202_p0) }
 0x3c9   : > { %v444_v62 = vpop.permute.xlu1 %443 }
 0x3ca   : > { %v446_v0 = vmul.f32 %v444_v62, %v433_v60  ;;  %v1011_v62 = vld [vmem:[%s1602_s8] ss:$0 sm:$0xff] (%p202_p0) }
 0x3cc   : > { %v454_v45 = vadd.f32 %v453_v63, %v446_v0   ;;  %v1121_v63 = vld [vmem:[%s1604_s10 + $0x8] sm:$0xff] (%p202_p0)   ;;  %v1122_v0 = vld [vmem:[%s1604_s10] sm:$0xff] (%p202_p0)  }
 0x3cd   :  { %1051 = vmatpush3.bf16.msra.mxu0 (%p202_p0), %v1121_v63  ;;  %1057 = vmatpush3.bf16.msra.mxu1 (%p202_p0), %v1122_v0 }
 0x3ce   : > { %457 = vst.msk [vmem:[%s456_s19] sm:$0x3] %vm323_vm7, %v454_v45 }
 0x3d5   :  { %v1438_v21 = vld [vmem:[#allocation4 + $0x2] sm:$0x3] (%p202_p0)  ;;  %v1440_v22 = vld [vmem:[#allocation4] sm:$0x3] (%p202_p0)  ;;  %v1446_v24 = vld [vmem:[#allocation4 + $0x6] sm:$0x3] (%p202_p0) }
 0x3d6   :  { %v483_v23 = vsel (%p202_p0), %vm323_vm7, %v1438_v21, 0.0  ;;  %v480_v2 = vsel (%p202_p0), %vm323_vm7, %v1440_v22, 0.0  ;;  %v1448_v25 = vld [vmem:[#allocation4 + $0x4] sm:$0x3] (%p202_p0)  ;;  %v489_v45 = vsel (%p202_p0), %vm323_vm7, %v1446_v24, 0.0 }
 0x3d7   :  { %v486_v9 = vsel (%p202_p0), %vm323_vm7, %v1448_v25, 0.0 }
 0x418   :  { %204 = sbr.rel (!%p202_p0) target bundleno = 236 (0xec), region = 95 }
 0x41d   : > { %v319_v3 = vpop.permute.xlu0 %318 }
 0x41e   : > { %324 = vst.msk [vmem:[%s322_s21] sm:$0x3] %vm323_vm7, %v319_v3 }
 0x425   :  { %v1416_v4 = vld [vmem:[#allocation3 + $0x4] sm:$0x3]  ;;  %v1418_v5 = vld [vmem:[#allocation3] sm:$0x3]  ;;  %v1420_v6 = vld [vmem:[#allocation3 + $0x6] sm:$0x3] }
 0x426   :  { %v474_v7 = vsel %vm323_vm7, %v1416_v4, 0.0  ;;  %v468_v8 = vsel %vm323_vm7, %v1418_v5, 0.0  ;;  %v1428_v46 = vld [vmem:[#allocation3 + $0x2] sm:$0x3]  ;;  %v477_v19 = vsel %vm323_vm7, %v1420_v6, 0.0 }
 0x427   :  { %475 = vadd.xlane.f32.xlu1 %v474_v7  ;;  %469 = vadd.xlane.f32.xlu0 %v468_v8  ;;  %v471_v20 = vsel %vm323_vm7, %v1428_v46, 0.0 }
 0x42b   :  { %478 = vadd.xlane.f32.xlu1 %v477_v19  ;;  %472 = vadd.xlane.f32.xlu0 %v471_v20 }
 0x42f   :  { %484 = vadd.xlane.f32.xlu1 %v483_v23  ;;  %481 = vadd.xlane.f32.xlu0 %v480_v2 }
 0x433   :  { %490 = vadd.xlane.f32.xlu1 %v489_v45  ;;  %487 = vadd.xlane.f32.xlu0 %v486_v9 }
 0x4b4   :  { %v476_v11 = vpop.xlane.xlu1 %475  ;;  %v470_v12 = vpop.xlane.xlu0 %469 }
 0x4b8   :  { %v479_v13 = vpop.xlane.xlu1 %478  ;;  %v473_v14 = vpop.xlane.xlu0 %472 }
 0x4bc   :  { %v485_v15 = vpop.xlane.xlu1 %484  ;;  %v482_v16 = vpop.xlane.xlu0 %481 }
 0x4bd   :  { %v493_v17 = vadd.f32 %v485_v15, %v473_v14  ;;  %v492_v18 = vadd.f32 %v482_v16, %v470_v12 }
 0x4bf   :  { %v498_v26 = vmul.f32 0.03125, %v493_v17  ;;  %v497_v27 = vmul.f32 0.03125, %v492_v18 }
 0x4c0   :  { %v491_v28 = vpop.xlane.xlu1 %490  ;;  %v488_v29 = vpop.xlane.xlu0 %487 }
 0x4c1   :  { %v495_v31 = vadd.f32 %v491_v28, %v479_v13  ;;  %v494_v32 = vadd.f32 %v488_v29, %v476_v11  ;;  %v1455_v33 = vsub.f32 %v1428_v46, %v498_v26  ;;  %v1458_v34 = vsub.f32 %v1418_v5, %v497_v27 }
 0x4c2   :  { %v1465_v39 = vsub.f32 %v1438_v21, %v498_v26  ;;  %v1468_v40 = vsub.f32 %v1440_v22, %v497_v27 }
 0x4c3   :  { %v500_v35 = vmul.f32 0.03125, %v495_v31  ;;  %v499_v36 = vmul.f32 0.03125, %v494_v32  ;;  %v506_v37 = vmul.f32 %v1455_v33, %v1455_v33  ;;  %v505_v38 = vmul.f32 %v1458_v34, %v1458_v34 }
 0x4c4   :  { %v526_v50 = vmul.f32 %v1465_v39, %v1465_v39  ;;  %v525_v51 = vmul.f32 %v1468_v40, %v1468_v40 }
 0x4c5   :  { %v512_v41 = vsel %vm323_vm7, %v506_v37, 0.0  ;;  %v509_v42 = vsel %vm323_vm7, %v505_v38, 0.0  ;;  %v1473_v43 = vsub.f32 %v1420_v6, %v500_v35  ;;  %v1476_v44 = vsub.f32 %v1416_v4, %v499_v36 }
 0x4c6   :  { %513 = vadd.xlane.f32.xlu1 %v512_v41  ;;  %510 = vadd.xlane.f32.xlu0 %v509_v42  ;;  %v524_v48 = vsub.f32 %v1446_v24, %v500_v35  ;;  %v1490_v54 = vsub.f32 %v1448_v25, %v499_v36  ;;  %v532_v55 = vsel %vm323_vm7, %v526_v50, 0.0  ;;  %v529_v56 = vsel %vm323_vm7, %v525_v51, 0.0 }
 0x4c7   :  { %v508_v47 = vmul.f32 %v1473_v43, %v1473_v43  ;;  %v507_v49 = vmul.f32 %v1476_v44, %v1476_v44 }
 0x4c8   :  { %v528_v57 = vmul.f32 %v524_v48, %v524_v48  ;;  %v527_v58 = vmul.f32 %v1490_v54, %v1490_v54 }
 0x4c9   :  { %v518_v52 = vsel %vm323_vm7, %v508_v47, 0.0  ;;  %v515_v53 = vsel %vm323_vm7, %v507_v49, 0.0 }
 0x4ca   :  { %519 = vadd.xlane.f32.xlu1 %v518_v52  ;;  %516 = vadd.xlane.f32.xlu0 %v515_v53  ;;  %v538_v59 = vsel %vm323_vm7, %v528_v57, 0.0  ;;  %v535_v60 = vsel %vm323_vm7, %v527_v58, 0.0 }
 0x4ce   :  { %533 = vadd.xlane.f32.xlu1 %v532_v55  ;;  %530 = vadd.xlane.f32.xlu0 %v529_v56 }
 0x4d2   :  { %539 = vadd.xlane.f32.xlu1 %v538_v59  ;;  %536 = vadd.xlane.f32.xlu0 %v535_v60 }
 0x4e3   :  { %594 = vrot.lane.b32.xlu1 %v1501_v61, %s1198_s24 }
 0x4e8   :  { %587 = vrot.lane.b32.xlu0 %v1011_v62, %s1198_s24 }
 0x553   :  { %v514_v3 = vpop.xlane.xlu1 %513  ;;  %v511_v7 = vpop.xlane.xlu0 %510 }
 0x557   :  { %v520_v8 = vpop.xlane.xlu1 %519  ;;  %v517_v19 = vpop.xlane.xlu0 %516 }
 0x55b   :  { %v534_v20 = vpop.xlane.xlu1 %533  ;;  %v531_v23 = vpop.xlane.xlu0 %530 }
 0x55c   :  { %v542_v2 = vadd.f32 %v534_v20, %v514_v3  ;;  %v541_v45 = vadd.f32 %v531_v23, %v511_v7 }
 0x55e   :  { %v546_v9 = vmul.f32 0.03125, %v542_v2  ;;  %v545_v11 = vmul.f32 0.03125, %v541_v45 }
 0x55f   :  { %v540_v12 = vpop.xlane.xlu1 %539  ;;  %v537_v13 = vpop.xlane.xlu0 %536 }
 0x560   :  { %v550_v14 = vadd.f32 1e-05, %v546_v9  ;;  %v549_v15 = vadd.f32 1e-05, %v545_v11  ;;  %v544_v16 = vadd.f32 %v540_v12, %v520_v8  ;;  %v543_v17 = vadd.f32 %v537_v13, %v517_v19  ;;  %v1017_v13 = vld [vmem:[%s1605_s11] ss:$0 sm:$0xff] }
 0x562   :  { %1123 = vrsqrt.f32 %v550_v14  ;;  %v548_v18 = vmul.f32 0.03125, %v544_v16  ;;  %v547_v26 = vmul.f32 0.03125, %v543_v17 }
 0x563   :  { %1125 = vrsqrt.f32 %v549_v15  ;;  %v588_v31 = vpop.permute.xlu0 %587  ;;  %v595_v38 = vpop.permute.xlu1 %594 }
 0x564   :  { %v552_v27 = vadd.f32 1e-05, %v548_v18  ;;  %v551_v28 = vadd.f32 1e-05, %v547_v26 }
 0x566   :  { %1127 = vrsqrt.f32 %v552_v27 }
 0x567   :  { %1129 = vrsqrt.f32 %v551_v28 }
 0x56c   :  { %v1124_v29 = vpop.eup %1123 }
 0x56d   :  { %v1126_v32 = vpop.eup %1125  ;;  %v584_v35 = vmul.f32 %v1124_v29, %v1465_v39  ;;  %v560_v36 = vmul.f32 %v1124_v29, %v1455_v33 }
 0x56e   :  { %v583_v37 = vmul.f32 %v1126_v32, %v1468_v40  ;;  %v559_v41 = vmul.f32 %v1126_v32, %v1458_v34 }
 0x56f   :  { %v591_v42 = vmul.f32 %v588_v31, %v584_v35  ;;  %v570_v47 = vmul.f32 %v1011_v62, %v560_v36 }
 0x570   :  { %v1128_v49 = vpop.eup %1127  ;;  %v590_v50 = vmul.f32 %v588_v31, %v583_v37  ;;  %v569_v51 = vmul.f32 %v1011_v62, %v559_v41 }
 0x571   :  { %v1130_v52 = vpop.eup %1129  ;;  %v586_v53 = vmul.f32 %v1128_v49, %v524_v48  ;;  %v598_v55 = vadd.f32 %v595_v38, %v591_v42  ;;  %v562_v56 = vmul.f32 %v1128_v49, %v1473_v43  ;;  %v580_v57 = vadd.f32 %v1501_v61, %v570_v47 }
 0x572   :  { %v585_v39 = vmul.f32 %v1130_v52, %v1490_v54  ;;  %v597_v33 = vadd.f32 %v595_v38, %v590_v50  ;;  %v561_v40 = vmul.f32 %v1130_v52, %v1476_v44  ;;  %v579_v58 = vadd.f32 %v1501_v61, %v569_v51 }
 0x573   :  { %v593_v34 = vmul.f32 %v588_v31, %v586_v53  ;;  %v572_v59 = vmul.f32 %v1011_v62, %v562_v56 }
 0x574   :  { %v592_v60 = vmul.f32 %v588_v31, %v585_v39  ;;  %v571_v63 = vmul.f32 %v1011_v62, %v561_v40  ;;  %v632_v7 = vcombine.low %v597_v33, %v598_v55  ;;  %v609_v8 = vcombine.low %v579_v58, %v580_v57  ;;  %v1018_v31 = vld [vmem:[%s1606_s12] ss:$0 sm:$0xff] }
 0x575   :  { %v600_v0 = vadd.f32 %v595_v38, %v593_v34  ;;  %v582_v3 = vadd.f32 %v1501_v61, %v572_v59  ;;  %v810_v55 = vand.u32 127, %v75_v1  ;;  %v466_v40 = vld [vmem:[%s1607_s13] sm:$0xf] }
 0x576   :  { %v599_v48 = vadd.f32 %v595_v38, %v592_v60  ;;  %v581_v43 = vadd.f32 %v1501_v61, %v571_v63  ;;  %v640_v54 = vrot.slane %v632_v7, %v1347_v30  ;;  %v617_v23 = vrot.slane %v609_v8, %v1347_v30 }
 0x577   :  { %vm804_vm11 = vcmp.gt.f32.partialorder %v466_v40, 0.0  ;;  %v1199_v7 = vmov 0  }
 0x578   :  { %v633_v19 = vcombine.low %v599_v48, %v600_v0  ;;  %v610_v20 = vcombine.low %v581_v43, %v582_v3  ;;  %1120 = vset.pattern.permute.xlu0 %v1199_v7  ;;  %1119 = vset.pattern.permute.xlu1 %v1199_v7 }
 0x57a   :  { %v647_v44 = vrot.slane %v633_v19, %v1347_v30  ;;  %v624_v2 = vrot.slane %v610_v20, %v1347_v30 }
 0x57c   :  { %v648_v45 = vcombine.low %v640_v54, %v647_v44  ;;  %v625_v62 = vcombine.low %v617_v23, %v624_v2 }
 0x57e   :  { %v650_v9 = vpack.c.bf16 %v648_v45, %v648_v45  ;;  %v627_v11 = vpack.c.bf16 %v625_v62, %v625_v62 }
 0x580   :  { %1053 = vmatmul.mubr.msk.bf16.vlgmr.msra.gmra.mrb[0].mxu0 %vm226_vm4, %v650_v9  ;;  %1059 = vmatmul.mubr.msk.bf16.vlgmr.msra.gmra.mrb[0].mxu1 %vm226_vm4, %v627_v11 }
 0x653   :  { %v695_v61 = vpop.f32.mrb[0].mxu0  ;;  %v744_v12 = vpop.f32.mrb[0].mxu1 }
 0x654   :  { %v745_v14 = vadd.f32 %v744_v12, %v695_v61  ;;  %v1054_v15 = vpop.f32.mrb[1].mxu0  ;;  %v1060_v16 = vpop.f32.mrb[1].mxu1 }
 0x655   :  { %v698_v17 = vpop.f32.mrb[2].mxu0  ;;  %v747_v18 = vpop.f32.mrb[2].mxu1 }
 0x656   :  { %v757_v26 = vadd.f32 %v1017_v13, %v745_v14  ;;  %v1055_v27 = vpop.f32.mrb[3].mxu0  ;;  %v1061_v28 = vpop.f32.mrb[3].mxu1 }
 0x658   :  { %1131 = vtanh.f32 %v757_v26 }
 0x662   :  { %v1132_v29 = vpop.eup %1131 }
 0x663   :  { %v767_v32 = vrot.slane %v1132_v29, %v1347_v30  ;;  %v760_v35 = vcombine.high %v1132_v29, %v1132_v29 }
 0x665   :  { %v788_v36 = vmul.f32 %v1018_v31, %v767_v32  ;;  %v775_v37 = vcombine.high %v767_v32, %v767_v32  ;;  %v774_v38 = vrot.slane %v760_v35, %v1347_v30  ;;  %v813_v30 = vsub.s32 %v810_v55, %v1305_v10 }
 0x667   :  { %v792_v41 = vsel %vm323_vm7, %v788_v36, 0.0  ;;  %v789_v42 = vmul.f32 %v1018_v31, %v775_v37  ;;  %v776_v47 = vcombine.high %v774_v38, %v774_v38  ;;  %v790_v51 = vmul.f32 %v1018_v31, %v774_v38 }
 0x668   :  { %793 = vadd.xlane.f32.xlu1 %v792_v41 }
 0x669   :  { %v795_v49 = vsel %vm323_vm7, %v789_v42, 0.0  ;;  %v791_v50 = vmul.f32 %v1018_v31, %v776_v47  ;;  %v798_v53 = vsel %vm323_vm7, %v790_v51, 0.0  ;;  %v904_v51 = vsub.s32 0, %v1305_v10 }
 0x66a   :  { %796 = vadd.xlane.f32.xlu0 %v795_v49 }
 0x66b   :  { %v801_v52 = vsel %vm323_vm7, %v791_v50, 0.0  ;;  %v918_v50 = vsub.s32 2, %v1305_v10 }
 0x66c   :  { %802 = vadd.xlane.f32.xlu1 %v801_v52 }
 0x66e   :  { %799 = vadd.xlane.f32.xlu0 %v798_v53 }
 0x6f5   :  { %v794_v56 = vpop.xlane.xlu1 %793 }
 0x6f6   :  { %v814_v58 = vrot.slane %v794_v56, %v813_v30 }
 0x6f7   :  { %v797_v57 = vpop.xlane.xlu0 %796 }
 0x6f8   :  { %v818_v39 = vrot.slane %v797_v57, %v813_v30 }
 0x6f9   :  { %v803_v33 = vpop.xlane.xlu1 %802 }
 0x6fa   :  { %v828_v60 = vsel %vm827_vm8, %v818_v39, %v814_v58  ;;  %v826_v63 = vrot.slane %v803_v33, %v813_v30  ;;  %v925_v39 = vsub.s32 3, %v1305_v10 }
 0x6fb   :  { %v800_v34 = vpop.xlane.xlu0 %799 }
 0x6fc   :  { %v822_v59 = vrot.slane %v800_v34, %v813_v30 }
 0x6fe   :  { %v830_v1 = vsel %vm829_vm9, %v822_v59, %v828_v60 }
 0x6ff   :  { %v832_v0 = vsel %vm831_vm10, %v826_v63, %v830_v1 }
 0x700   :  { %v834_v3 = vsel %vm804_vm11, %v832_v0, -3e+38 }
 0x701   :  { %v836_v48 = vsel %vm835_vm12, %v834_v3, -inf }
 0x702   :  { %v837_v43 = vrot.slane %v836_v48, 4 }
 0x704   :  { %v838_v8 = vmax.f32 %v836_v48, %v837_v43 }
 0x706   :  { %v839_v19 = vrot.slane %v838_v8, 2 }
 0x708   :  { %v840_v20 = vmax.f32 %v838_v8, %v839_v19 }
 0x70a   :  { %v841_v54 = vrot.slane %v840_v20, 1 }
 0x70c   :  { %v842_v44 = vmax.f32 %v840_v20, %v841_v54 }
 0x70e   :  { %845 = vbcast.lane.b32.xlu0 %v842_v44, 256 }
 0x780   :  { %v846_v23 = vpop.permute.xlu0 %845 }
 0x781   :  { %v851_v2 = vsub.f32 %v803_v33, %v846_v23  ;;  %v848_v45 = vsub.f32 %v794_v56, %v846_v23  ;;  %v849_v62 = vsub.f32 %v797_v57, %v846_v23  ;;  %v850_v9 = vsub.f32 %v800_v34, %v846_v23 }
 0x783   :  { %866 = vperm.xlu0 %1120, %v851_v2   ;;  %857 = vperm.xlu1 %1119, %v848_v45  }
 0x787   :  { %860 = vperm.xlu1 %1119, %v849_v62  }
 0x78b   :  { %863 = vperm.xlu1 %1119, %v850_v9  }
 0x802   :  { %v858_v11 = vpop.permute.xlu1 %857  ;;  %v867_v13 = vpop.permute.xlu0 %866 }
 0x803   :  { %v871_v14 = vrot.slane %v858_v11, %v813_v30  ;;  %v883_v17 = vrot.slane %v867_v13, %v813_v30 }
 0x806   :  { %v861_v61 = vpop.permute.xlu1 %860 }
 0x807   :  { %v875_v12 = vrot.slane %v861_v61, %v813_v30 }
 0x809   :  { %v884_v18 = vsel %vm827_vm8, %v875_v12, %v871_v14 }
 0x80a   :  { %v864_v15 = vpop.permute.xlu1 %863 }
 0x80b   :  { %v879_v16 = vrot.slane %v864_v15, %v813_v30  ;;  %v911_v30 = vsub.s32 1, %v1305_v10 }
 0x80d   :  { %v885_v26 = vsel %vm829_vm9, %v879_v16, %v884_v18 }
 0x80e   :  { %v886_v27 = vsel %vm831_vm10, %v883_v17, %v885_v26 }
 0x80f   :  { %v888_v28 = vsel %vm804_vm11, %v886_v27, 0.0 }
 0x810   :  { %v889_v29 = vmul.f32 1.442695, %v888_v28 }
 0x812   :  { %1133 = vpow2.f32 %v889_v29 }
 0x81c   :  { %v1134_v31 = vpop.eup %1133 }
 0x81d   :  { %v891_v32 = vmul.f32 %v1134_v31, %v466_v40 }
 0x81f   :  { %v892_v35 = vsel %vm835_vm12, %v891_v32, 0.0 }
 0x820   :  { %v893_v36 = vrot.slane %v892_v35, 4 }
 0x822   :  { %v894_v37 = vadd.f32 %v893_v36, %v892_v35 }
 0x824   :  { %v895_v38 = vrot.slane %v894_v37, 2 }
 0x826   :  { %v896_v41 = vadd.f32 %v895_v38, %v894_v37 }
 0x828   :  { %v897_v42 = vrot.slane %v896_v41, 1 }
 0x82a   :  { %v898_v47 = vadd.f32 %v897_v42, %v896_v41 }
 0x82c   :  { %v899_v49 = vmax.f32 %v898_v47, 1e-12 }
 0x82e   :  { %1135 = vrcp.f32 %v899_v49 }
 0x838   :  { %v1136_v52 = vpop.eup %1135 }
 0x839   :  { %v901_v53 = vmul.f32 %v1136_v52, %v891_v32 }
 0x83b   :  { %v919_v55 = vrot.slane %v901_v53, %v918_v50  ;;  %959 = vst.msk [vmem:[%s1609_s15] sm:$0xf] %vm835_vm12, %v901_v53  ;;  %v905_v56 = vrot.slane %v901_v53, %v904_v51  ;;  %v912_v57 = vrot.slane %v901_v53, %v911_v30  ;;  %v926_v33 = vrot.slane %v901_v53, %v925_v39  ;;  %s1200_s15 = smov 16  }
 0x83d   :  { %921 = vbcast.lane.b32.xlu0 %v919_v55, 256  ;;  %907 = vbcast.lane.b32.xlu1 %v905_v56, 256 }
 0x841   :  { %914 = vbcast.lane.b32.xlu1 %v912_v57, 256 }
 0x845   :  { %928 = vbcast.lane.b32.xlu1 %v926_v33, 256 }
 0x8af   :  { %v908_v40 = vpop.permute.xlu1 %907  ;;  %v922_v58 = vpop.permute.xlu0 %921 }
 0x8b0   :  { %v930_v34 = vmul.f32 %v908_v40, %v1418_v5  ;;  %v941_v59 = vmul.f32 %v908_v40, %v1440_v22  ;;  %v932_v63 = vmul.f32 %v922_v58, %v1416_v4  ;;  %v943_v1 = vmul.f32 %v922_v58, %v1448_v25 }
 0x8b2   :  { %v934_v10 = vsel %vm323_vm7, %v930_v34, 0.0  ;;  %v945_v48 = vsel %vm323_vm7, %v941_v59, 0.0  ;;  %v937_v19 = vsel %vm323_vm7, %v932_v63, 0.0  ;;  %v948_v4 = vsel %vm323_vm7, %v943_v1, 0.0 }
 0x8b3   :  { %v915_v60 = vpop.permute.xlu1 %914 }
 0x8b4   :  { %v931_v0 = vmul.f32 %v915_v60, %v1428_v46  ;;  %v942_v3 = vmul.f32 %v915_v60, %v1438_v21 }
 0x8b6   :  { %v935_v7 = vsel %vm323_vm7, %v931_v0, 0.0  ;;  %v946_v43 = vsel %vm323_vm7, %v942_v3, 0.0 }
 0x8b7   :  { %v936_v5 = vadd.f32 %v935_v7, %v934_v10  ;;  %v947_v8 = vadd.f32 %v946_v43, %v945_v48  ;;  %v929_v22 = vpop.permute.xlu1 %928 }
 0x8b8   :  { %v933_v25 = vmul.f32 %v929_v22, %v1420_v6  ;;  %v944_v46 = vmul.f32 %v929_v22, %v1446_v24 }
 0x8b9   :  { %v938_v21 = vadd.f32 %v937_v19, %v936_v5  ;;  %v949_v20 = vadd.f32 %v948_v4, %v947_v8 }
 0x8ba   :  { %v939_v54 = vsel %vm323_vm7, %v933_v25, 0.0  ;;  %v950_v44 = vsel %vm323_vm7, %v944_v46, 0.0 }
 0x8bb   :  { %v940_v23 = vadd.f32 %v939_v54, %v938_v21  ;;  %v951_v2 = vadd.f32 %v950_v44, %v949_v20 }
 0x8bd   :  { %952 = vst.msk [vmem:[#allocation5] sm:$0x3] %vm323_vm7, %v940_v23  ;;  %954 = vrot.lane.b32.xlu0 %v951_v2, %s1200_s15 }
 0x92f   :  { %v955_v45 = vpop.permute.xlu0 %954 }
 0x930   :  { %958 = vst.msk [vmem:[#allocation5] sm:$0x3] %vm957_vm13, %v955_v45 }
 0x931   :  { %1148 = shalt.err (!%p1145_p5)
}
 0x932   :  { %s1149_s0 = scalar_lea.hbm %s1608_s14, 32 }
 0x933   :  { %p1150_p6 = scmp.ne.s32.totalorder %s1608_s14, %s1149_s0  ;;  %p1153_p7 = scmp.lt.u32.totalorder %s1149_s0, %s1608_s14 }
 0x935   :  { %p1155_p8 = pnand %p1153_p7, %p1150_p6 }
 0x937   :  { %1158 = shalt.err (!%p1155_p8)
}
 0x938   :  { %969 = dma.vmem_to_hbm [thread:$0]  %s967_s28, 32, %s1608_s14, [#allocation6]  }
 0x939   :  { %1171 = dma.done.wait [#allocation6], 32  }
 0x93a   :  { %1172 = vsyncadd [#allocation6], 4294967264 }
 0x93b   :  { %977 = vsyncpa [#allocation6], 1 }

// kernel: sentence_attention_forward.2
= control target key start
LH: loop header
LB: loop body
LE: loop exit
PB: predicated region body
PF: predicated region fallthrough
CT: control target
= control target key end

     0   :  { %vm101_vm0 = vcmask 261120   ;;  %vm187_vm1 = vcmask 781312   ;;  %v1647_v38 = vmov 0.0   ;;  %v1649_v39 = vmov 0.0   ;;  %s2039_s2 = inlined_call_operand.vmem [shape: bf16[32,96], index: 2, kind: input, shape index: {}]   ;;  %s2040_s8 = inlined_call_operand.vmem [shape: f32[1,32], index: 8, kind: input, shape index: {}]   ;;  %s2041_s9 = inlined_call_operand.vmem [shape: f32[1,32], index: 9, kind: input, shape index: {}]   ;;  %s2042_s10 = inlined_call_operand.vmem [shape: bf16[32,16], index: 10, kind: input, shape index: {}]   ;;  %s2043_s11 = inlined_call_operand.vmem [shape: f32[1,16], index: 11, kind: input, shape index: {}]   ;;  %s2044_s12 = inlined_call_operand.vmem [shape: f32[1,16], index: 12, kind: input, shape index: {}]   ;;  %s2045_s13 = inlined_call_operand.vmem [shape: f32[8,8], index: 13, kind: input, shape index: {}]   ;;  %s2046_s14 = inlined_call_operand.vmem [shape: bf16[8,32], index: 14, kind: output, shape index: {0}]   ;;  %s2047_s15 = inlined_call_operand.vmem [shape: f32[8,8], index: 15, kind: output, shape index: {1}]   ;;  %s2048_s0 = inlined_call_operand.vmem [shape: bf16[8,8,32], index: 0, kind: input, shape index: {}]   ;;  %s2049_s3 = inlined_call_operand.vmem [shape: bf16[16,48], index: 3, kind: input, shape index: {}]   ;;  %s2050_s4 = inlined_call_operand.vmem [shape: bf16[16,48], index: 4, kind: input, shape index: {}]   ;;  %s2051_s6 = inlined_call_operand.vmem [shape: f32[1,48], index: 6, kind: input, shape index: {}]   ;;  %s2052_s7 = inlined_call_operand.vmem [shape: f32[1,48], index: 7, kind: input, shape index: {}]   ;;  %s2053_s1 = inlined_call_operand.vmem [shape: f32[8,1], index: 1, kind: input, shape index: {}]   ;;  %s2054_s5 = inlined_call_operand.vmem [shape: f32[1,96], index: 5, kind: input, shape index: {}]  }
   0x1   :  { %v1402_v0 = vld [vmem:[%s2039_s2] sm:$0xff]   ;;  %v1403_v1 = vld [vmem:[%s2039_s2 + $0x8] sm:$0xff]   ;;  %v1405_v3 = vld [vmem:[%s2048_s0 + $0x10] sm:$0xff]  }
   0x2   :  { %1310 = vmatprep.subr.bf16.mxu0 %v1402_v0  ;;  %1354 = vmatprep.subr.bf16.mxu1 %v1402_v0  ;;  %v1404_v2 = vld [vmem:[%s2048_s0] sm:$0xff]   ;;  %v1406_v4 = vld [vmem:[%s2048_s0 + $0x8] sm:$0xff]   ;;  %v1407_v5 = vld [vmem:[%s2048_s0 + $0x18] sm:$0xff]  }
   0x3   :  { %1311 = vmatpush3.bf16.msra.mxu0 %v1402_v0  ;;  %1356 = vmatpush3.bf16.msra.mxu1 %v1402_v0  ;;  %v1604_v6 = vld [vmem:[%s2049_s3] sm:$0xf]  ;;  %v1609_v7 = vld [vmem:[%s2049_s3 + $0x4] sm:$0xf] }
   0x4   :  { %1312 = vmatprep.subr.bf16.mxu0 %v1403_v1  ;;  %1355 = vmatprep.subr.bf16.mxu1 %v1403_v1  ;;  %v1614_v8 = vld [vmem:[%s2050_s4] sm:$0xf]  ;;  %v1619_v9 = vld [vmem:[%s2050_s4 + $0x4] sm:$0xf] }
   0x5   :  { %1314 = vmatprep.mubr.msk.bf16.mxu0 %vm101_vm0, %v1404_v2  ;;  %1318 = vmatprep.mubr.msk.bf16.mxu1 %vm101_vm0, %v1405_v3  ;;  %v1624_v10 = vld [vmem:[%s2051_s6] ss:$0 sm:$0xff] }
   0x6   :  { %v1629_v11 = vld [vmem:[%s2052_s7] ss:$0 sm:$0xff] }
   0x7   :  { %1313 = vmatpush3.bf16.msra.mxu0 %v1403_v1  ;;  %1357 = vmatpush3.bf16.msra.mxu1 %v1403_v1  ;;  %v1634_v12 = vld [vmem:[%s2053_s1] sm:$0xff]  ;;  %s1651_s1 = smov 0  }
   0x8   :  { %v1249_v13 = vld [vmem:[%s2054_s5] ss:$0 sm:$0xff] }
   0xa   :  { %1315 = vmatmul.mubr.msk.bf16.vlgmr.msra.gmra.mrb[0].mxu0 %vm101_vm0, %v1406_v4  ;;  %1319 = vmatmul.mubr.msk.bf16.vlgmr.msra.gmra.mrb[0].mxu1 %vm101_vm0, %v1407_v5 }
  0xdd   :  { %v1316_v14 = vpop.f32.mrb[0].mxu0  ;;  %v1320_v15 = vpop.f32.mrb[0].mxu1 }
  0xde   :  { %v157_v16 = vadd.f32 %v1316_v14, %v1249_v13  ;;  %v173_v17 = vadd.f32 %v1320_v15, %v1249_v13  ;;  %v148_v18 = vpop.f32.mrb[1].mxu0  ;;  %v164_v19 = vpop.f32.mrb[1].mxu1 }
  0xdf   :  { %v149_v20 = vadd.f32 %v1249_v13, %v148_v18  ;;  %v165_v21 = vadd.f32 %v1249_v13, %v164_v19  ;;  %v1317_v22 = vpop.f32.mrb[2].mxu0  ;;  %v1321_v23 = vpop.f32.mrb[2].mxu1 }
  0xe0   :  { %v181_v24 = vpack.c.bf16 %v157_v16, %v157_v16  ;;  %v185_v25 = vpack.c.bf16 %v173_v17, %v173_v17  ;;  %v160_v26 = vadd.f32 %v1317_v22, %v1249_v13  ;;  %v176_v27 = vadd.f32 %v1321_v23, %v1249_v13  ;;  %v151_v28 = vpop.f32.mrb[3].mxu0  ;;  %v167_v29 = vpop.f32.mrb[3].mxu1 }
  0xe1   :  { %v179_v30 = vpack.c.bf16 %v149_v20, %v149_v20  ;;  %v183_v31 = vpack.c.bf16 %v165_v21, %v165_v21  ;;  %v152_v32 = vadd.f32 %v1249_v13, %v151_v28  ;;  %v168_v33 = vadd.f32 %v1249_v13, %v167_v29 }
  0xe2   :  { %190 = vst.msk [vmem:[#allocation2 + $0x8] sm:$0xf] %vm187_vm1, %v181_v24  ;;  %194 = vst.msk [vmem:[#allocation2 + $0x18] sm:$0xf] %vm187_vm1, %v185_v25  ;;  %v182_v34 = vpack.c.bf16 %v160_v26, %v160_v26  ;;  %v186_v35 = vpack.c.bf16 %v176_v27, %v176_v27 }
  0xe3   :  { %188 = vst.msk [vmem:[#allocation2] sm:$0xf] %vm187_vm1, %v179_v30  ;;  %192 = vst.msk [vmem:[#allocation2 + $0x10] sm:$0xf] %vm187_vm1, %v183_v31  ;;  %v180_v36 = vpack.c.bf16 %v152_v32, %v152_v32  ;;  %v184_v37 = vpack.c.bf16 %v168_v33, %v168_v33 }
  0xe4   :  { %191 = vst.msk [vmem:[#allocation2 + $0xc] sm:$0xf] %vm187_vm1, %v182_v34  ;;  %195 = vst.msk [vmem:[#allocation2 + $0x1c] sm:$0xf] %vm187_vm1, %v186_v35 }
  0xe5   :  { %189 = vst.msk [vmem:[#allocation2 + $0x4] sm:$0xf] %vm187_vm1, %v180_v36  ;;  %193 = vst.msk [vmem:[#allocation2 + $0x14] sm:$0xf] %vm187_vm1, %v184_v37 }
  0xe6 LB: > { %v1270_v40 = vcombine.low %v1614_v8, %v1619_v9  ;;  %v1491_v41 = vmov 0.0   ;;  %v334_v42 = vpack.c.bf16 %v1481_v38, %v1481_v38  ;;  %vm1492_vm2 = vmmov 0   ;;  %s1493_s4 = smov 64   ;;  %s1494_s5 = smov 112   ;;  %s1489_s1 = sphi %s1651_s1, %s220_s1   ;;  %v1485_v39 = vphi %v1649_v39, %v312_v39   ;;  %v1481_v38 = vphi %v1647_v38, %v430_v38  }
  0xe7   : > { %1328 = vmatprep.subr.bf16.mxu1 %v1491_v41  ;;  %1322 = vmatprep.subr.bf16.mxu0 %v1491_v41  ;;  %v1264_v43 = vcombine.low %v1604_v6, %v1609_v7  ;;  %v232_v44 = vpack.c.bf16 %v1485_v39, %v1485_v39  ;;  %vm242_vm3 = vcmask 130048   ;;  %s1495_s6 = smov 48   ;;  %s1496_s7 = smov 16   ;;  %v1498_v1 = vmov 0  }
  0xe8   : > { %1329 = vmatpush3.bf16.msra.mxu1 %v1270_v40  ;;  %1330 = vmatprep.mubr.msk.bf16.mxu1 %vm1492_vm2, %v1491_v41  ;;  %s1497_s2 = smov 96   ;;  %s1262_s28 = sshll.u32 %s1489_s1, 2 }
  0xe9   : > { %1324 = vmatprep.mubr.msk.bf16.mxu0 %vm1492_vm2, %v1491_v41  ;;  %336 = vrot.lane.b32.xlu0 %v334_v42, %s1493_s4  ;;  %s225_s29 = scalar_lea.vmem [#allocation2], %s1262_s28  ;;  %s1682_s30 = ssub.s32 7, %s1489_s1 }
  0xea   : > { %1323 = vmatpush3.bf16.msra.mxu0 %v1264_v43  ;;  %s1268_s16 = sshll.u32 %s1682_s30, 2  ;;  %1408 = vset.pattern.permute.xlu1 %v1498_v1  ;;  %s1499_s18 = smov 32  }
  0xeb   : > { %s327_s17 = scalar_lea.vmem [#allocation2], %s1268_s16  ;;  %1414 = vset.pattern.permute.xlu0 %v1498_v1  ;;  %s329_s19 = scvt.s32.f32 %s1682_s30 }
  0xec   : > { %v226_v57 = vld [vmem:[%s225_s29] sm:$0xf]  ;;  %s227_s0 = scvt.s32.f32 %s1489_s1  ;;  %s1273_s20 = sshll.u32 %s1682_s30, 3 }
  0xed   : > { %234 = vrot.lane.b32.xlu0 %v232_v44, %s1494_s5  ;;  %v286_v58 = vunpack.c.l.bf16 %v226_v57  ;;  %v328_v63 = vld [vmem:[%s327_s17] sm:$0xf]  ;;  %v330_v15 = vstv %s329_s19  ;;  %s1267_s21 = sshll.u32 %s1489_s1, 3  ;;  %s436_s22 = scalar_lea.vmem [#allocation4], %s1273_s20 }
  0xee   : > { %v387_v0 = vunpack.c.l.bf16 %v328_v63  ;;  %vm331_vm4 = vcmp.lt.f32.partialorder %v330_v15, %v1634_v12  ;;  %v228_v20 = vstv %s227_s0  ;;  %s324_s23 = scalar_lea.vmem [#allocation3], %s1267_s21  ;;  %s220_s1 = sadd.s32 1, %s1489_s1  }
  0xef   : > { %v1269_v18 = vsel %vm331_vm4, 1.0, %v1491_v41  ;;  %vm229_vm5 = vcmp.lt.f32.partialorder %v228_v20, %v1634_v12  ;;  %p217_p0 = scmp.ge.s32.totalorder %s220_s1, 8  }
  0xf0   : > { %v423_v19 = vsub.f32 1.0, %v1269_v18  ;;  %v1263_v23 = vsel %vm229_vm5, 1.0, %v1491_v41  ;;  %s1500_s25 = smov (%p217_p0), 112   ;;  %vm984_vm6 = vcmask (%p217_p0), 1041409   ;;  %vm986_vm7 = vcmask (%p217_p0), 1042434  }
  0xf1   : > { %v1409_v25 = vpack.i.bf16 %v1263_v23, %v1269_v18  ;;  %vm988_vm8 = vcmask (%p217_p0), 1043459   ;;  %vm990_vm9 = vcmask (%p217_p0), 1044484   ;;  %vm992_vm10 = vcmask (%p217_p0), 1045509  }
  0xf2   :  { %vm994_vm11 = vcmask (%p217_p0), 1046534   ;;  %vm996_vm12 = vcmask (%p217_p0), 1047559   ;;  %vm1000_vm14 = vcmask (%p217_p0), 64512   ;;  %vm1210_vm15 = vcmask (%p217_p0), 125952  }
  0xf3   :  { %vm1219_vm0 = vcmask (%p217_p0), 257152  }
 0x15b   : > { %v337_v45 = vpop.permute.xlu0 %336 }
 0x15c   : > { %1331 = vmatmul.mubr.msk.bf16.vlgmr.msra.gmra.mrb[0].mxu1 %vm242_vm3, %v337_v45 }
 0x15f   : > { %v235_v46 = vpop.permute.xlu0 %234 }
 0x160   : > { %1325 = vmatmul.mubr.msk.bf16.vlgmr.msra.gmra.mrb[0].mxu0 %vm242_vm3, %v235_v46 }
 0x22f   : > { %v381_v47 = vpop.f32.mrb[0].mxu1 }
 0x230   : > { %v382_v48 = vadd.f32 %v1629_v11, %v381_v47  ;;  %v1332_v49 = vpop.f32.mrb[1].mxu1 }
 0x231   : > { %v384_v50 = vpop.f32.mrb[2].mxu1 }
 0x232   : > { %389 = vrot.lane.b32.xlu1 %v382_v48, %s1495_s6  ;;  %v1333_v51 = vpop.f32.mrb[3].mxu1 }
 0x233   : > { %v280_v52 = vpop.f32.mrb[0].mxu0 }
 0x234   : > { %v281_v53 = vadd.f32 %v1624_v10, %v280_v52  ;;  %v1326_v54 = vpop.f32.mrb[1].mxu0 }
 0x235   : > { %v283_v55 = vpop.f32.mrb[2].mxu0 }
 0x236   : > { %399 = vrot.lane.b32.xlu1 %v382_v48, %s1496_s7  ;;  %295 = vrot.lane.b32.xlu0 %v281_v53, %s1497_s2  ;;  %v1327_v56 = vpop.f32.mrb[3].mxu0  ;;  %v287_v59 = vadd.f32 %v286_v58, %v281_v53 }
 0x238   : > { %v1266_v60 = vmul.f32 -1.442695, %v287_v59 }
 0x23a   : > { %1415 = vpow2.f32 %v1266_v60 }
 0x244   : > { %v1416_v61 = vpop.eup %1415 }
 0x245   : > { %v291_v62 = vadd.f32 1.0, %v1416_v61 }
 0x247   : > { %1417 = vrcp.f32 %v291_v62 }
 0x251   : > { %v1418_v5 = vpop.eup %1417 }
 0x252   : > { %v305_v42 = vsub.f32 1.0, %v1418_v5  ;;  %v311_v45 = vmul.f32 %v1485_v39, %v1418_v5 }
 0x2a4   : > { %v390_v2 = vpop.permute.xlu1 %389 }
 0x2a5   : > { %v392_v3 = vadd.f32 %v390_v2, %v387_v0 }
 0x2a7   : > { %v1272_v4 = vmul.f32 -1.442695, %v392_v3 }
 0x2a8   : > { %v296_v13 = vpop.permute.xlu0 %295  ;;  %v400_v22 = vpop.permute.xlu1 %399 }
 0x2a9   : > { %1419 = vpow2.f32 %v1272_v4  ;;  %v298_v14 = vmul.f32 %v1418_v5, %v296_v13 }
 0x2ab   : > { %300 = vrot.lane.b32.xlu0 %v298_v14, %s1499_s18 }
 0x2af   : > { %426 = vperm.xlu0 %1414, %v423_v19  }
 0x2b3   : > { %v1420_v16 = vpop.eup %1419 }
 0x2b4   : > { %v396_v17 = vadd.f32 1.0, %v1420_v16 }
 0x2b6   : > { %1421 = vrcp.f32 %v396_v17 }
 0x2c0   : > { %v1422_v21 = vpop.eup %1421 }
 0x2c1   : > { %v402_v24 = vmul.f32 %v1422_v21, %v400_v22  ;;  %v409_v33 = vsub.f32 1.0, %v1422_v21  ;;  %v415_v36 = vmul.f32 %v1481_v38, %v1422_v21 }
 0x2c3   : > { %404 = vrot.lane.b32.xlu1 %v402_v24, %s1499_s18 }
 0x2c7   : > { %1410 = vperm.xlu1 %1408, %v1409_v25  }
 0x31d   : > { %v301_v26 = vpop.permute.xlu0 %300 }
 0x31e   : > { %v303_v29 = vadd.f32 %v301_v26, %v286_v58 }
 0x32e   : > { %v427_v35 = vpop.permute.xlu0 %426 }
 0x32f   : > { %v429_v43 = vmul.f32 %v1481_v38, %v427_v35 }
 0x335   : > { %v405_v27 = vpop.permute.xlu1 %404 }
 0x336   : > { %v407_v28 = vadd.f32 %v405_v27, %v387_v0 }
 0x338   : > { %1423 = vtanh.f32 %v407_v28 }
 0x339   : > { %1425 = vtanh.f32 %v303_v29 }
 0x342   : > { %v1424_v30 = vpop.eup %1423 }
 0x343   : > { %411 = vrot.lane.b32.xlu1 %v1424_v30, %s1494_s5  ;;  %v1426_v31 = vpop.eup %1425 }
 0x346   : > { %v1411_v32 = vpop.permute.xlu1 %1410 }
 0x347   : > { %307 = vrot.lane.b32.xlu1 %v1426_v31, %s1494_s5  ;;  %v1412_v40 = vunpack.i.l.bf16 %v1411_v32  ;;  %v1413_v48 = vunpack.i.h.bf16 %v1411_v32 }
 0x3b5   : > { %v412_v34 = vpop.permute.xlu1 %411 }
 0x3b6   : > { %v414_v37 = vmul.f32 %v412_v34, %v409_v33 }
 0x3b8   : > { %v416_v41 = vadd.f32 %v415_v36, %v414_v37 }
 0x3b9   : > { %v308_v44 = vpop.permute.xlu1 %307 }
 0x3ba   : > { %v310_v46 = vmul.f32 %v308_v44, %v305_v42  ;;  %v422_v47 = vmul.f32 %v1412_v40, %v416_v41 }
 0x3bc   : > { %v312_v39 = vadd.f32 %v311_v45, %v310_v46   ;;  %v430_v38 = vadd.f32 %v429_v43, %v422_v47  }
 0x3be   : > { %432 = vrot.lane.b32.xlu1 %v430_v38, %s1493_s4  ;;  %v318_v49 = vmul.f32 %v1413_v48, %v312_v39 }
 0x3c0   : > { %320 = vrot.lane.b32.xlu0 %v318_v49, %s1494_s5 }
 0x42d   :  { %219 = sbr.rel (!%p217_p0) target bundleno = 230 (0xe6), region = 95 }
 0x430   : > { %v433_v50 = vpop.permute.xlu1 %432 }
 0x431   : > { %437 = vst.msk [vmem:[%s436_s22] sm:$0xff] %vm242_vm3, %v433_v50 }
 0x432   : > { %v321_v51 = vpop.permute.xlu0 %320 }
 0x433   : > { %325 = vst.msk [vmem:[%s324_s23] sm:$0xff] %vm242_vm3, %v321_v51 }
 0x438   :  { %v1709_v52 = vld [vmem:[#allocation4] sm:$0xff]  ;;  %v1713_v54 = vld [vmem:[#allocation4 + $0x8] sm:$0xff]  ;;  %v1733_v11 = vld [vmem:[#allocation4 + $0x18] sm:$0xff] }
 0x439   :  { %v480_v55 = vsel %vm242_vm3, %v1709_v52, 0.0  ;;  %v483_v39 = vsel %vm242_vm3, %v1713_v54, 0.0  ;;  %v1735_v12 = vld [vmem:[#allocation4 + $0x10] sm:$0xff]  ;;  %v489_v38 = vsel %vm242_vm3, %v1733_v11, 0.0  ;;  %v1749_v63 = vld [vmem:[#allocation4 + $0x28] sm:$0xff]  ;;  %v1751_v0 = vld [vmem:[#allocation4 + $0x20] sm:$0xff] }
 0x43a   :  { %v1711_v53 = vld [vmem:[#allocation3] sm:$0xff]  ;;  %v1719_v57 = vld [vmem:[#allocation3 + $0x8] sm:$0xff]  ;;  %481 = vadd.xlane.f32.xlu1 %v480_v55  ;;  %v1725_v7 = vld [vmem:[#allocation3 + $0x18] sm:$0xff]  ;;  %v486_v58 = vsel %vm242_vm3, %v1735_v12, 0.0  ;;  %v495_v1 = vsel %vm242_vm3, %v1749_v63, 0.0  ;;  %v492_v2 = vsel %vm242_vm3, %v1751_v0, 0.0 }
 0x43b   :  { %v456_v56 = vsel %vm242_vm3, %v1711_v53, 0.0  ;;  %v459_v6 = vsel %vm242_vm3, %v1719_v57, 0.0  ;;  %v1727_v8 = vld [vmem:[#allocation3 + $0x10] sm:$0xff]  ;;  %v465_v9 = vsel %vm242_vm3, %v1725_v7, 0.0  ;;  %v1741_v59 = vld [vmem:[#allocation3 + $0x28] sm:$0xff]  ;;  %v1743_v60 = vld [vmem:[#allocation3 + $0x20] sm:$0xff] }
 0x43c   :  { %457 = vadd.xlane.f32.xlu0 %v456_v56  ;;  %v462_v10 = vsel %vm242_vm3, %v1727_v8, 0.0  ;;  %v471_v61 = vsel %vm242_vm3, %v1741_v59, 0.0  ;;  %v468_v62 = vsel %vm242_vm3, %v1743_v60, 0.0  ;;  %v1757_v3 = vld [vmem:[#allocation3 + $0x38] sm:$0xff]  ;;  %v1759_v4 = vld [vmem:[#allocation3 + $0x30] sm:$0xff] }
 0x43d   :  { %v477_v5 = vsel %vm242_vm3, %v1757_v3, 0.0  ;;  %v474_v13 = vsel %vm242_vm3, %v1759_v4, 0.0  ;;  %v1765_v14 = vld [vmem:[#allocation4 + $0x38] sm:$0xff]  ;;  %v1767_v15 = vld [vmem:[#allocation4 + $0x30] sm:$0xff] }
 0x43e   :  { %484 = vadd.xlane.f32.xlu1 %v483_v39  ;;  %v501_v16 = vsel %vm242_vm3, %v1765_v14, 0.0  ;;  %v498_v17 = vsel %vm242_vm3, %v1767_v15, 0.0 }
 0x440   :  { %460 = vadd.xlane.f32.xlu0 %v459_v6 }
 0x442   :  { %466 = vadd.xlane.f32.xlu1 %v465_v9 }
 0x444   :  { %463 = vadd.xlane.f32.xlu0 %v462_v10 }
 0x446   :  { %490 = vadd.xlane.f32.xlu1 %v489_v38 }
 0x448   :  { %487 = vadd.xlane.f32.xlu0 %v486_v58 }
 0x44a   :  { %472 = vadd.xlane.f32.xlu1 %v471_v61 }
 0x44c   :  { %469 = vadd.xlane.f32.xlu0 %v468_v62 }
 0x44e   :  { %496 = vadd.xlane.f32.xlu1 %v495_v1 }
 0x450   :  { %493 = vadd.xlane.f32.xlu0 %v492_v2 }
 0x452   :  { %478 = vadd.xlane.f32.xlu1 %v477_v5 }
 0x454   :  { %475 = vadd.xlane.f32.xlu0 %v474_v13 }
 0x456   :  { %502 = vadd.xlane.f32.xlu1 %v501_v16 }
 0x458   :  { %499 = vadd.xlane.f32.xlu0 %v498_v17 }
 0x4c7   :  { %v482_v18 = vpop.xlane.xlu1 %481 }
 0x4c9   :  { %v458_v19 = vpop.xlane.xlu0 %457 }
 0x4ca   :  { %v504_v20 = vadd.f32 %v482_v18, %v458_v19 }
 0x4cb   :  { %v485_v22 = vpop.xlane.xlu1 %484 }
 0x4cc   :  { %v513_v21 = vmul.f32 0.03125, %v504_v20 }
 0x4cd   :  { %v461_v23 = vpop.xlane.xlu0 %460 }
 0x4ce   :  { %v505_v24 = vadd.f32 %v485_v22, %v461_v23  ;;  %v1774_v25 = vsub.f32 %v1711_v53, %v513_v21  ;;  %v1777_v26 = vsub.f32 %v1709_v52, %v513_v21 }
 0x4cf   :  { %v467_v29 = vpop.xlane.xlu1 %466 }
 0x4d0   :  { %v514_v27 = vmul.f32 0.03125, %v505_v24  ;;  %v529_v28 = vmul.f32 %v1774_v25, %v1774_v25  ;;  %v569_v32 = vmul.f32 %v1777_v26, %v1777_v26 }
 0x4d1   :  { %v464_v30 = vpop.xlane.xlu0 %463 }
 0x4d2   :  { %v537_v31 = vsel %vm242_vm3, %v529_v28, 0.0  ;;  %v1785_v33 = vsub.f32 %v1719_v57, %v514_v27  ;;  %v1788_v34 = vsub.f32 %v1713_v54, %v514_v27  ;;  %v577_v43 = vsel %vm242_vm3, %v569_v32, 0.0 }
 0x4d3   :  { %538 = vadd.xlane.f32.xlu0 %v537_v31  ;;  %v491_v36 = vpop.xlane.xlu1 %490 }
 0x4d4   :  { %v530_v35 = vmul.f32 %v1785_v33, %v1785_v33  ;;  %v570_v40 = vmul.f32 %v1788_v34, %v1788_v34  ;;  %v507_v41 = vadd.f32 %v491_v36, %v467_v29 }
 0x4d5   :  { %v488_v37 = vpop.xlane.xlu0 %487 }
 0x4d6   :  { %v506_v42 = vadd.f32 %v488_v37, %v464_v30  ;;  %v540_v44 = vsel %vm242_vm3, %v530_v35, 0.0  ;;  %v516_v45 = vmul.f32 0.03125, %v507_v41  ;;  %v580_v49 = vsel %vm242_vm3, %v570_v40, 0.0 }
 0x4d7   :  { %578 = vadd.xlane.f32.xlu0 %v577_v43  ;;  %541 = vadd.xlane.f32.xlu1 %v540_v44  ;;  %v473_v47 = vpop.xlane.xlu1 %472 }
 0x4d8   :  { %v515_v46 = vmul.f32 0.03125, %v506_v42  ;;  %v1798_v50 = vsub.f32 %v1725_v7, %v516_v45  ;;  %v1804_v55 = vsub.f32 %v1733_v11, %v516_v45 }
 0x4d9   :  { %v470_v48 = vpop.xlane.xlu0 %469 }
 0x4da   :  { %v1801_v51 = vsub.f32 %v1727_v8, %v515_v46  ;;  %v1807_v56 = vsub.f32 %v1735_v12, %v515_v46  ;;  %v532_v39 = vmul.f32 %v1798_v50, %v1798_v50  ;;  %v572_v38 = vmul.f32 %v1804_v55, %v1804_v55 }
 0x4db   :  { %581 = vadd.xlane.f32.xlu1 %v580_v49  ;;  %v497_v9 = vpop.xlane.xlu1 %496 }
 0x4dc   :  { %v531_v6 = vmul.f32 %v1801_v51, %v1801_v51  ;;  %v571_v58 = vmul.f32 %v1807_v56, %v1807_v56  ;;  %v509_v61 = vadd.f32 %v497_v9, %v473_v47  ;;  %v546_v1 = vsel %vm242_vm3, %v532_v39, 0.0 }
 0x4dd   :  { %v494_v10 = vpop.xlane.xlu0 %493  ;;  %v586_v18 = vsel %vm242_vm3, %v572_v38, 0.0 }
 0x4de   :  { %v508_v62 = vadd.f32 %v494_v10, %v470_v48  ;;  %v543_v2 = vsel %vm242_vm3, %v531_v6, 0.0  ;;  %v518_v5 = vmul.f32 0.03125, %v509_v61  ;;  %v583_v19 = vsel %vm242_vm3, %v571_v58, 0.0  ;;  %v1872_v61 = vld [vmem:[%s2041_s9] ss:$0 sm:$0xff] }
 0x4df   :  { %547 = vadd.xlane.f32.xlu1 %v546_v1  ;;  %544 = vadd.xlane.f32.xlu0 %v543_v2  ;;  %v479_v16 = vpop.xlane.xlu1 %478  ;;  %v1881_v1 = vld [vmem:[%s2040_s8] ss:$0 sm:$0xff]  ;;  %v1430_v2 = vld [vmem:[%s2042_s10 + $0x8] sm:$0xff]  }
 0x4e0   :  { %v517_v13 = vmul.f32 0.03125, %v508_v62  ;;  %v1822_v20 = vsub.f32 %v1741_v59, %v518_v5  ;;  %v1828_v22 = vsub.f32 %v1749_v63, %v518_v5  ;;  %v1429_v62 = vld [vmem:[%s2042_s10] sm:$0xff]   ;;  %1334 = vmatprep.subr.bf16.mxu1 %v1430_v2 }
 0x4e1   :  { %v476_v17 = vpop.xlane.xlu0 %475  ;;  %1344 = vmatprep.subr.bf16.mxu0 %v1429_v62  ;;  %1335 = vmatpush3.bf16.msra.mxu1 %v1430_v2 }
 0x4e2   :  { %v1825_v21 = vsub.f32 %v1743_v60, %v517_v13  ;;  %v1831_v23 = vsub.f32 %v1751_v0, %v517_v13  ;;  %v534_v24 = vmul.f32 %v1822_v20, %v1822_v20  ;;  %v574_v30 = vmul.f32 %v1828_v22, %v1828_v22  ;;  %1345 = vmatpush3.bf16.msra.mxu0 %v1429_v62 }
 0x4e3   :  { %587 = vadd.xlane.f32.xlu1 %v586_v18  ;;  %584 = vadd.xlane.f32.xlu0 %v583_v19  ;;  %v503_v28 = vpop.xlane.xlu1 %502 }
 0x4e4   :  { %v533_v27 = vmul.f32 %v1825_v21, %v1825_v21  ;;  %v573_v31 = vmul.f32 %v1831_v23, %v1831_v23  ;;  %v511_v32 = vadd.f32 %v503_v28, %v479_v16  ;;  %v552_v36 = vsel %vm242_vm3, %v534_v24, 0.0 }
 0x4e5   :  { %v500_v29 = vpop.xlane.xlu0 %499  ;;  %v592_v42 = vsel %vm242_vm3, %v574_v30, 0.0 }
 0x4e6   :  { %v510_v35 = vadd.f32 %v500_v29, %v476_v17  ;;  %v549_v37 = vsel %vm242_vm3, %v533_v27, 0.0  ;;  %v520_v40 = vmul.f32 0.03125, %v511_v32  ;;  %v589_v43 = vsel %vm242_vm3, %v573_v31, 0.0 }
 0x4e7   :  { %553 = vadd.xlane.f32.xlu1 %v552_v36  ;;  %550 = vadd.xlane.f32.xlu0 %v549_v37 }
 0x4e8   :  { %v519_v41 = vmul.f32 0.03125, %v510_v35  ;;  %v1846_v44 = vsub.f32 %v1757_v3, %v520_v40  ;;  %v1852_v46 = vsub.f32 %v1765_v14, %v520_v40 }
 0x4ea   :  { %v1849_v45 = vsub.f32 %v1759_v4, %v519_v41  ;;  %v1855_v47 = vsub.f32 %v1767_v15, %v519_v41  ;;  %v536_v48 = vmul.f32 %v1846_v44, %v1846_v44  ;;  %v576_v9 = vmul.f32 %v1852_v46, %v1852_v46 }
 0x4eb   :  { %593 = vadd.xlane.f32.xlu1 %v592_v42  ;;  %590 = vadd.xlane.f32.xlu0 %v589_v43 }
 0x4ec   :  { %v535_v49 = vmul.f32 %v1849_v45, %v1849_v45  ;;  %v558_v39 = vsel %vm242_vm3, %v536_v48, 0.0  ;;  %v575_v10 = vmul.f32 %v1855_v47, %v1855_v47  ;;  %v598_v38 = vsel %vm242_vm3, %v576_v9, 0.0 }
 0x4ee   :  { %v555_v6 = vsel %vm242_vm3, %v535_v49, 0.0  ;;  %v595_v58 = vsel %vm242_vm3, %v575_v10, 0.0 }
 0x4ef   :  { %559 = vadd.xlane.f32.xlu1 %v558_v39  ;;  %556 = vadd.xlane.f32.xlu0 %v555_v6 }
 0x4f3   :  { %599 = vadd.xlane.f32.xlu1 %v598_v38  ;;  %596 = vadd.xlane.f32.xlu0 %v595_v58 }
 0x504   :  { %690 = vrot.lane.b32.xlu1 %v1872_v61, %s1500_s25 }
 0x509   :  { %679 = vrot.lane.b32.xlu0 %v1881_v1, %s1500_s25 }
 0x560   :  { %v539_v5 = vpop.xlane.xlu0 %538 }
 0x564   :  { %v542_v13 = vpop.xlane.xlu1 %541  ;;  %v579_v16 = vpop.xlane.xlu0 %578 }
 0x565   :  { %v601_v17 = vadd.f32 %v579_v16, %v539_v5 }
 0x567   :  { %v609_v18 = vmul.f32 0.03125, %v601_v17 }
 0x568   :  { %v582_v19 = vpop.xlane.xlu1 %581 }
 0x569   :  { %v617_v24 = vadd.f32 1e-05, %v609_v18  ;;  %v602_v27 = vadd.f32 %v582_v19, %v542_v13 }
 0x56b   :  { %1431 = vrsqrt.f32 %v617_v24  ;;  %v610_v28 = vmul.f32 0.03125, %v602_v27 }
 0x56c   :  { %v548_v29 = vpop.xlane.xlu1 %547  ;;  %v545_v30 = vpop.xlane.xlu0 %544 }
 0x56d   :  { %v618_v31 = vadd.f32 1e-05, %v610_v28 }
 0x56f   :  { %1433 = vrsqrt.f32 %v618_v31 }
 0x570   :  { %v588_v32 = vpop.xlane.xlu1 %587  ;;  %v585_v35 = vpop.xlane.xlu0 %584 }
 0x571   :  { %v604_v36 = vadd.f32 %v588_v32, %v548_v29  ;;  %v603_v37 = vadd.f32 %v585_v35, %v545_v30 }
 0x573   :  { %v612_v40 = vmul.f32 0.03125, %v604_v36  ;;  %v611_v41 = vmul.f32 0.03125, %v603_v37 }
 0x574   :  { %v554_v42 = vpop.xlane.xlu1 %553  ;;  %v551_v43 = vpop.xlane.xlu0 %550 }
 0x575   :  { %v1432_v48 = vpop.eup %1431  ;;  %v620_v49 = vadd.f32 1e-05, %v612_v40  ;;  %v619_v39 = vadd.f32 1e-05, %v611_v41 }
 0x576   :  { %v635_v6 = vmul.f32 %v1432_v48, %v1774_v25  ;;  %v671_v40 = vmul.f32 %v1432_v48, %v1777_v26 }
 0x577   :  { %1435 = vrsqrt.f32 %v620_v49 }
 0x578   :  { %1437 = vrsqrt.f32 %v619_v39  ;;  %v594_v9 = vpop.xlane.xlu1 %593  ;;  %v591_v10 = vpop.xlane.xlu0 %590  ;;  %v649_v5 = vmul.f32 %v1881_v1, %v635_v6 }
 0x579   :  { %v1434_v38 = vpop.eup %1433  ;;  %v606_v58 = vadd.f32 %v594_v9, %v554_v42  ;;  %v605_v62 = vadd.f32 %v591_v10, %v551_v43 }
 0x57a   :  { %v636_v2 = vmul.f32 %v1434_v38, %v1785_v33  ;;  %v663_v25 = vadd.f32 %v1872_v61, %v649_v5 }
 0x57b   :  { %v614_v13 = vmul.f32 0.03125, %v606_v58  ;;  %v613_v16 = vmul.f32 0.03125, %v605_v62  ;;  %v672_v58 = vmul.f32 %v1434_v38, %v1788_v34 }
 0x57c   :  { %v560_v17 = vpop.xlane.xlu1 %559  ;;  %v557_v18 = vpop.xlane.xlu0 %556  ;;  %v650_v19 = vmul.f32 %v1881_v1, %v636_v2 }
 0x57d   :  { %v622_v24 = vadd.f32 1e-05, %v614_v13  ;;  %v621_v27 = vadd.f32 1e-05, %v613_v16 }
 0x57e   :  { %v664_v28 = vadd.f32 %v1872_v61, %v650_v19 }
 0x57f   :  { %1439 = vrsqrt.f32 %v622_v24 }
 0x580   :  { %1441 = vrsqrt.f32 %v621_v27  ;;  %v600_v29 = vpop.xlane.xlu1 %599  ;;  %v597_v30 = vpop.xlane.xlu0 %596  ;;  %v705_v31 = vpack.c.bf16 %v664_v28, %v663_v25 }
 0x581   :  { %v1436_v33 = vpop.eup %1435  ;;  %v608_v32 = vadd.f32 %v600_v29, %v560_v17  ;;  %v607_v35 = vadd.f32 %v597_v30, %v557_v18 }
 0x582   :  { %v1438_v36 = vpop.eup %1437  ;;  %1346 = vmatprep.mubr.msk.bf16.mxu0 %vm242_vm3, %v705_v31  ;;  %v638_v37 = vmul.f32 %v1436_v33, %v1798_v50  ;;  %v674_v41 = vmul.f32 %v1436_v33, %v1804_v55 }
 0x583   :  { %v616_v42 = vmul.f32 0.03125, %v608_v32  ;;  %v615_v43 = vmul.f32 0.03125, %v607_v35  ;;  %v637_v49 = vmul.f32 %v1438_v36, %v1801_v51  ;;  %v673_v39 = vmul.f32 %v1438_v36, %v1807_v56 }
 0x584   :  { %v680_v6 = vpop.permute.xlu0 %679  ;;  %v691_v9 = vpop.permute.xlu1 %690  ;;  %v652_v10 = vmul.f32 %v1881_v1, %v638_v37 }
 0x585   :  { %v624_v62 = vadd.f32 1e-05, %v616_v42  ;;  %v623_v2 = vadd.f32 1e-05, %v615_v43  ;;  %v651_v50 = vmul.f32 %v1881_v1, %v637_v49  ;;  %v682_v5 = vmul.f32 %v680_v6, %v671_v40 }
 0x586   :  { %v666_v26 = vadd.f32 %v1872_v61, %v652_v10  ;;  %v683_v55 = vmul.f32 %v680_v6, %v672_v58  ;;  %v684_v48 = vmul.f32 %v680_v6, %v673_v39  ;;  %v685_v13 = vmul.f32 %v680_v6, %v674_v41 }
 0x587   :  { %1443 = vrsqrt.f32 %v624_v62  ;;  %v665_v51 = vadd.f32 %v1872_v61, %v651_v50  ;;  %v693_v56 = vadd.f32 %v691_v9, %v682_v5 }
 0x588   :  { %1445 = vrsqrt.f32 %v623_v2  ;;  %v694_v16 = vadd.f32 %v691_v9, %v683_v55  ;;  %v695_v17 = vadd.f32 %v691_v9, %v684_v48  ;;  %v696_v18 = vadd.f32 %v691_v9, %v685_v13 }
 0x589   :  { %v1440_v19 = vpop.eup %1439  ;;  %v706_v34 = vpack.c.bf16 %v666_v26, %v665_v51 }
 0x58a   :  { %v1442_v38 = vpop.eup %1441  ;;  %v709_v24 = vpack.c.bf16 %v694_v16, %v693_v56  ;;  %v710_v27 = vpack.c.bf16 %v696_v18, %v695_v17  ;;  %v676_v25 = vmul.f32 %v1440_v19, %v1828_v22  ;;  %v640_v28 = vmul.f32 %v1440_v19, %v1822_v20 }
 0x58b   :  { %1347 = vmatmul.mubr.msk.bf16.vlgmr.msra.gmra.mrb[0].mxu0 %vm242_vm3, %v706_v34  ;;  %v675_v29 = vmul.f32 %v1442_v38, %v1831_v23  ;;  %v639_v30 = vmul.f32 %v1442_v38, %v1825_v21 }
 0x58c   :  { %1336 = vmatprep.mubr.msk.bf16.mxu1 %vm242_vm3, %v709_v24  ;;  %v687_v31 = vmul.f32 %v680_v6, %v676_v25  ;;  %v654_v33 = vmul.f32 %v1881_v1, %v640_v28 }
 0x58d   :  { %1337 = vmatmul.mubr.msk.bf16.vlgmr.msra.gmra.mrb[0].mxu1 %vm242_vm3, %v710_v27  ;;  %v686_v32 = vmul.f32 %v680_v6, %v675_v29  ;;  %v653_v35 = vmul.f32 %v1881_v1, %v639_v30  ;;  %v1287_v27 = vld [vmem:[%s2044_s12] ss:$0 sm:$0xff] }
 0x58e   :  { %v698_v36 = vadd.f32 %v691_v9, %v687_v31  ;;  %v668_v22 = vadd.f32 %v1872_v61, %v654_v33 }
 0x58f   :  { %v697_v20 = vadd.f32 %v691_v9, %v686_v32  ;;  %v667_v37 = vadd.f32 %v1872_v61, %v653_v35 }
 0x591   :  { %v1444_v40 = vpop.eup %1443  ;;  %v711_v23 = vpack.c.bf16 %v698_v36, %v697_v20  ;;  %v707_v41 = vpack.c.bf16 %v668_v22, %v667_v37 }
 0x592   :  { %v1446_v21 = vpop.eup %1445  ;;  %v678_v42 = vmul.f32 %v1444_v40, %v1852_v46  ;;  %v642_v43 = vmul.f32 %v1444_v40, %v1846_v44 }
 0x593   :  { %1340 = vmatprep.mubr.msk.bf16.mxu1 %vm242_vm3, %v711_v23  ;;  %1350 = vmatprep.mubr.msk.bf16.mxu0 %vm242_vm3, %v707_v41  ;;  %v677_v49 = vmul.f32 %v1446_v21, %v1855_v47  ;;  %v641_v39 = vmul.f32 %v1446_v21, %v1849_v45 }
 0x594   :  { %v689_v10 = vmul.f32 %v680_v6, %v678_v42  ;;  %v656_v58 = vmul.f32 %v1881_v1, %v642_v43 }
 0x595   :  { %v688_v62 = vmul.f32 %v680_v6, %v677_v49  ;;  %v655_v2 = vmul.f32 %v1881_v1, %v641_v39  ;;  %v1286_v6 = vld [vmem:[%s2043_s11] ss:$0 sm:$0xff] }
 0x596   :  { %v700_v50 = vadd.f32 %v691_v9, %v689_v10  ;;  %v670_v5 = vadd.f32 %v1872_v61, %v656_v58 }
 0x597   :  { %v699_v46 = vadd.f32 %v691_v9, %v688_v62  ;;  %v669_v44 = vadd.f32 %v1872_v61, %v655_v2 }
 0x599   :  { %v712_v26 = vpack.c.bf16 %v700_v50, %v699_v46  ;;  %v708_v55 = vpack.c.bf16 %v670_v5, %v669_v44 }
 0x59b   :  { %1341 = vmatmul.mubr.msk.bf16.gmra.mrb[4].mxu1 %vm242_vm3, %v712_v26  ;;  %1351 = vmatmul.mubr.msk.bf16.gmra.mrb[4].mxu0 %vm242_vm3, %v708_v55 }
 0x65e   :  { %v1348_v47 = vpop.f32.mrb[0].mxu0 }
 0x65f   :  { %v848_v45 = vpop.f32.mrb[1].mxu0 }
 0x660   :  { %v1338_v48 = vpop.f32.mrb[0].mxu1  ;;  %v1349_v1 = vpop.f32.mrb[2].mxu0 }
 0x661   :  { %v857_v13 = vadd.f32 %v1348_v47, %v1338_v48  ;;  %v765_v51 = vpop.f32.mrb[1].mxu1  ;;  %v851_v56 = vpop.f32.mrb[3].mxu0 }
 0x662   :  { %v849_v9 = vadd.f32 %v848_v45, %v765_v51  ;;  %v1339_v16 = vpop.f32.mrb[2].mxu1 }
 0x663   :  { %v888_v61 = vadd.f32 %v1286_v6, %v857_v13  ;;  %v860_v17 = vadd.f32 %v1349_v1, %v1339_v16  ;;  %v768_v18 = vpop.f32.mrb[3].mxu1 }
 0x664   :  { %v886_v19 = vadd.f32 %v1286_v6, %v849_v9  ;;  %v852_v34 = vadd.f32 %v851_v56, %v768_v18 }
 0x665   :  { %1447 = vtanh.f32 %v888_v61  ;;  %v889_v38 = vadd.f32 %v1286_v6, %v860_v17  ;;  %v950_v61 = vlaneseq }
 0x666   :  { %1449 = vtanh.f32 %v886_v19  ;;  %v887_v24 = vadd.f32 %v1286_v6, %v852_v34 }
 0x667   :  { %1451 = vtanh.f32 %v889_v38  ;;  %v951_v18 = vand.u32 127, %v950_v61  ;;  %v1941_v19 = vshrl.u32 %v950_v61, 7 }
 0x668   :  { %1453 = vtanh.f32 %v887_v24 }
 0x669   :  { %v1944_v24 = vsub.s32 %v951_v18, %v1941_v19 }
 0x66e   :  { %v1342_v25 = vpop.f32.mrb[4].mxu1  ;;  %v1352_v28 = vpop.f32.mrb[4].mxu0 }
 0x66f   :  { %v1448_v29 = vpop.eup %1447  ;;  %v873_v30 = vadd.f32 %v1352_v28, %v1342_v25  ;;  %v781_v31 = vpop.f32.mrb[5].mxu1 }
 0x670   :  { %v864_v33 = vpop.f32.mrb[5].mxu0  ;;  %v1450_v32 = vpop.eup %1449  ;;  %v911_v20 = vmul.f32 %v1448_v29, %v1287_v27 }
 0x671   :  { %v865_v35 = vadd.f32 %v864_v33, %v781_v31  ;;  %v1343_v36 = vpop.f32.mrb[6].mxu1  ;;  %v1353_v22 = vpop.f32.mrb[6].mxu0  ;;  %v892_v40 = vadd.f32 %v1286_v6, %v873_v30  ;;  %v909_v42 = vmul.f32 %v1450_v32, %v1287_v27 }
 0x672   :  { %v1452_v37 = vpop.eup %1451  ;;  %v876_v23 = vadd.f32 %v1353_v22, %v1343_v36  ;;  %v784_v41 = vpop.f32.mrb[7].mxu1  ;;  %v923_v10 = vsel %vm242_vm3, %v911_v20, 0.0 }
 0x673   :  { %v867_v21 = vpop.f32.mrb[7].mxu0  ;;  %v1454_v43 = vpop.eup %1453  ;;  %v890_v49 = vadd.f32 %v1286_v6, %v865_v35  ;;  %v912_v58 = vmul.f32 %v1452_v37, %v1287_v27  ;;  %1455 = vtanh.f32 %v892_v40  ;;  %924 = vadd.xlane.f32.xlu0 %v923_v10  ;;  %v917_v2 = vsel %vm242_vm3, %v909_v42, 0.0 }
 0x674   :  { %v868_v39 = vadd.f32 %v867_v21, %v784_v41  ;;  %v893_v62 = vadd.f32 %v1286_v6, %v876_v23  ;;  %v910_v50 = vmul.f32 %v1454_v43, %v1287_v27  ;;  %918 = vadd.xlane.f32.xlu1 %v917_v2  ;;  %v1959_v23 = vld [vmem:[%s2045_s13] sm:$0xff] }
 0x675   :  { %1457 = vtanh.f32 %v890_v49  ;;  %v926_v44 = vsel %vm242_vm3, %v912_v58, 0.0  ;;  %vm941_vm13 = vcmp.gt.f32.partialorder %v1959_v23, 0.0 }
 0x676   :  { %v891_v5 = vadd.f32 %v1286_v6, %v868_v39  ;;  %1459 = vtanh.f32 %v893_v62  ;;  %v920_v46 = vsel %vm242_vm3, %v910_v50, 0.0  ;;  %v1501_v62 = vmov 0  }
 0x677   :  { %921 = vadd.xlane.f32.xlu0 %v920_v46  ;;  %1427 = vset.pattern.permute.xlu1 %v1501_v62 }
 0x678   :  { %1461 = vtanh.f32 %v891_v5  ;;  %927 = vadd.xlane.f32.xlu1 %v926_v44  ;;  %1428 = vset.pattern.permute.xlu0 %v1501_v62 }
 0x67d   :  { %v1456_v26 = vpop.eup %1455 }
 0x67e   :  { %v915_v51 = vmul.f32 %v1456_v26, %v1287_v27 }
 0x67f   :  { %v1458_v55 = vpop.eup %1457 }
 0x680   :  { %v1460_v47 = vpop.eup %1459  ;;  %v913_v45 = vmul.f32 %v1458_v55, %v1287_v27  ;;  %v935_v9 = vsel %vm242_vm3, %v915_v51, 0.0 }
 0x681   :  { %v916_v56 = vmul.f32 %v1460_v47, %v1287_v27 }
 0x682   :  { %v1462_v48 = vpop.eup %1461  ;;  %v929_v1 = vsel %vm242_vm3, %v913_v45, 0.0 }
 0x683   :  { %v914_v13 = vmul.f32 %v1462_v48, %v1287_v27  ;;  %930 = vadd.xlane.f32.xlu0 %v929_v1  ;;  %v938_v16 = vsel %vm242_vm3, %v916_v56, 0.0 }
 0x685   :  { %v932_v6 = vsel %vm242_vm3, %v914_v13, 0.0 }
 0x686   :  { %933 = vadd.xlane.f32.xlu1 %v932_v6 }
 0x687   :  { %936 = vadd.xlane.f32.xlu0 %v935_v9 }
 0x68a   :  { %939 = vadd.xlane.f32.xlu1 %v938_v16 }
 0x700   :  { %v925_v17 = vpop.xlane.xlu0 %924 }
 0x701   :  { %v919_v34 = vpop.xlane.xlu1 %918  ;;  %v963_v30 = vrot.slane %v925_v17, %v1944_v24 }
 0x702   :  { %v955_v27 = vrot.slane %v919_v34, %v1944_v24 }
 0x704   :  { %v922_v38 = vpop.xlane.xlu0 %921 }
 0x705   :  { %v959_v25 = vrot.slane %v922_v38, %v1944_v24  ;;  %v928_v28 = vpop.xlane.xlu1 %927 }
 0x706   :  { %v967_v31 = vrot.slane %v928_v28, %v1944_v24 }
 0x707   :  { %v985_v29 = vsel %vm984_vm6, %v959_v25, %v955_v27 }
 0x708   :  { %v987_v33 = vsel %vm986_vm7, %v963_v30, %v985_v29 }
 0x709   :  { %v989_v36 = vsel %vm988_vm8, %v967_v31, %v987_v33 }
 0x710   :  { %v931_v32 = vpop.xlane.xlu0 %930 }
 0x711   :  { %v971_v35 = vrot.slane %v931_v32, %v1944_v24 }
 0x713   :  { %v934_v22 = vpop.xlane.xlu1 %933  ;;  %v991_v20 = vsel %vm990_vm9, %v971_v35, %v989_v36 }
 0x714   :  { %v975_v37 = vrot.slane %v934_v22, %v1944_v24  ;;  %v937_v40 = vpop.xlane.xlu0 %936 }
 0x715   :  { %v979_v21 = vrot.slane %v937_v40, %v1944_v24 }
 0x716   :  { %v993_v41 = vsel %vm992_vm10, %v975_v37, %v991_v20 }
 0x717   :  { %v940_v42 = vpop.xlane.xlu1 %939  ;;  %v995_v43 = vsel %vm994_vm11, %v979_v21, %v993_v41 }
 0x718   :  { %v983_v49 = vrot.slane %v940_v42, %v1944_v24 }
 0x71a   :  { %v997_v39 = vsel %vm996_vm12, %v983_v49, %v995_v43 }
 0x71b   :  { %v999_v10 = vsel %vm941_vm13, %v997_v39, -3e+38 }
 0x71c   :  { %v1001_v58 = vsel %vm1000_vm14, %v999_v10, -inf }
 0x71d   :  { %v1002_v2 = vrot.slane %v1001_v58, 4 }
 0x71f   :  { %v1003_v50 = vmax.f32 %v1001_v58, %v1002_v2 }
 0x721   :  { %v1004_v5 = vrot.slane %v1003_v50, 2 }
 0x723   :  { %v1005_v46 = vmax.f32 %v1003_v50, %v1004_v5 }
 0x725   :  { %v1006_v44 = vrot.slane %v1005_v46, 1 }
 0x727   :  { %v1007_v26 = vmax.f32 %v1005_v46, %v1006_v44  ;;  %v1116_v44 = vsub.s32 1, %v1941_v19 }
 0x729   :  { %1010 = vbcast.lane.b32.xlu0 %v1007_v26, 256  ;;  %v1109_v26 = vsub.s32 0, %v1941_v19 }
 0x79b   :  { %v1011_v55 = vpop.permute.xlu0 %1010 }
 0x79c   :  { %v1016_v47 = vsub.f32 %v928_v28, %v1011_v55  ;;  %v1013_v45 = vsub.f32 %v919_v34, %v1011_v55  ;;  %v1019_v48 = vsub.f32 %v937_v40, %v1011_v55  ;;  %v1014_v1 = vsub.f32 %v922_v38, %v1011_v55 }
 0x79d   :  { %v1015_v13 = vsub.f32 %v925_v17, %v1011_v55  ;;  %v1017_v51 = vsub.f32 %v931_v32, %v1011_v55  ;;  %v1018_v6 = vsub.f32 %v934_v22, %v1011_v55  ;;  %v1020_v56 = vsub.f32 %v940_v42, %v1011_v55 }
 0x79e   :  { %1039 = vperm.xlu0 %1428, %v1016_v47   ;;  %1030 = vperm.xlu1 %1427, %v1013_v45  }
 0x7a2   :  { %1048 = vperm.xlu0 %1428, %v1019_v48   ;;  %1033 = vperm.xlu1 %1427, %v1014_v1   ;;  %v1130_v48 = vsub.s32 3, %v1941_v19  ;;  %v1123_v1 = vsub.s32 2, %v1941_v19 }
 0x7a6   :  { %1036 = vperm.xlu1 %1427, %v1015_v13  }
 0x7aa   :  { %1042 = vperm.xlu1 %1427, %v1017_v51  }
 0x7ae   :  { %1045 = vperm.xlu1 %1427, %v1018_v6   ;;  %v1144_v6 = vsub.s32 5, %v1941_v19 }
 0x7b2   :  { %1051 = vperm.xlu1 %1427, %v1020_v56   ;;  %v1137_v56 = vsub.s32 4, %v1941_v19 }
 0x81d   :  { %v1031_v9 = vpop.permute.xlu1 %1030  ;;  %v1040_v25 = vpop.permute.xlu0 %1039 }
 0x81e   :  { %v1056_v38 = vrot.slane %v1031_v9, %v1944_v24  ;;  %v1068_v30 = vrot.slane %v1040_v25, %v1944_v24 }
 0x821   :  { %v1034_v16 = vpop.permute.xlu1 %1033  ;;  %v1049_v33 = vpop.permute.xlu0 %1048 }
 0x822   :  { %v1060_v18 = vrot.slane %v1034_v16, %v1944_v24  ;;  %v1080_v20 = vrot.slane %v1049_v33, %v1944_v24 }
 0x824   :  { %v1085_v17 = vsel %vm984_vm6, %v1060_v18, %v1056_v38  ;;  %v1151_v18 = vsub.s32 6, %v1941_v19 }
 0x825   :  { %v1037_v61 = vpop.permute.xlu1 %1036 }
 0x826   :  { %v1064_v34 = vrot.slane %v1037_v61, %v1944_v24  ;;  %v1158_v61 = vsub.s32 7, %v1941_v19 }
 0x828   :  { %v1086_v28 = vsel %vm986_vm7, %v1064_v34, %v1085_v17 }
 0x829   :  { %v1043_v27 = vpop.permute.xlu1 %1042  ;;  %v1087_v32 = vsel %vm988_vm8, %v1068_v30, %v1086_v28 }
 0x82a   :  { %v1072_v29 = vrot.slane %v1043_v27, %v1944_v24 }
 0x82c   :  { %v1088_v36 = vsel %vm990_vm9, %v1072_v29, %v1087_v32 }
 0x82d   :  { %v1046_v31 = vpop.permute.xlu1 %1045 }
 0x82e   :  { %v1076_v35 = vrot.slane %v1046_v31, %v1944_v24 }
 0x830   :  { %v1089_v22 = vsel %vm992_vm10, %v1076_v35, %v1088_v36 }
 0x831   :  { %v1052_v37 = vpop.permute.xlu1 %1051  ;;  %v1090_v41 = vsel %vm994_vm11, %v1080_v20, %v1089_v22 }
 0x832   :  { %v1084_v40 = vrot.slane %v1052_v37, %v1944_v24 }
 0x834   :  { %v1091_v21 = vsel %vm996_vm12, %v1084_v40, %v1090_v41 }
 0x835   :  { %v1093_v42 = vsel %vm941_vm13, %v1091_v21, 0.0 }
 0x836   :  { %v1094_v43 = vmul.f32 1.442695, %v1093_v42 }
 0x838   :  { %1463 = vpow2.f32 %v1094_v43 }
 0x842   :  { %v1464_v49 = vpop.eup %1463 }
 0x843   :  { %v1096_v39 = vmul.f32 %v1464_v49, %v1959_v23 }
 0x845   :  { %v1097_v10 = vsel %vm1000_vm14, %v1096_v39, 0.0 }
 0x846   :  { %v1098_v58 = vrot.slane %v1097_v10, 4 }
 0x848   :  { %v1099_v62 = vadd.f32 %v1098_v58, %v1097_v10 }
 0x84a   :  { %v1100_v2 = vrot.slane %v1099_v62, 2 }
 0x84c   :  { %v1101_v50 = vadd.f32 %v1100_v2, %v1099_v62 }
 0x84e   :  { %v1102_v5 = vrot.slane %v1101_v50, 1 }
 0x850   :  { %v1103_v24 = vadd.f32 %v1102_v5, %v1101_v50 }
 0x852   :  { %v1104_v46 = vmax.f32 %v1103_v24, 1e-12 }
 0x854   :  { %1465 = vrcp.f32 %v1104_v46 }
 0x85e   :  { %v1466_v55 = vpop.eup %1465 }
 0x85f   :  { %v1106_v47 = vmul.f32 %v1466_v55, %v1096_v39 }
 0x861   :  { %1221 = vst.msk [vmem:[%s2047_s15] sm:$0xff] %vm1000_vm14, %v1106_v47  ;;  %v1117_v23 = vrot.slane %v1106_v47, %v1116_v44  ;;  %v1110_v45 = vrot.slane %v1106_v47, %v1109_v26  ;;  %v1131_v13 = vrot.slane %v1106_v47, %v1130_v48  ;;  %v1124_v51 = vrot.slane %v1106_v47, %v1123_v1  ;;  %s1502_s15 = smov 16  }
 0x862   :  { %v1145_v9 = vrot.slane %v1106_v47, %v1144_v6  ;;  %v1138_v16 = vrot.slane %v1106_v47, %v1137_v56  ;;  %v1159_v34 = vrot.slane %v1106_v47, %v1158_v61  ;;  %v1152_v25 = vrot.slane %v1106_v47, %v1151_v18 }
 0x863   :  { %1119 = vbcast.lane.b32.xlu1 %v1117_v23, 256  ;;  %1112 = vbcast.lane.b32.xlu0 %v1110_v45, 256 }
 0x867   :  { %1133 = vbcast.lane.b32.xlu1 %v1131_v13, 256  ;;  %1126 = vbcast.lane.b32.xlu0 %v1124_v51, 256 }
 0x86b   :  { %1147 = vbcast.lane.b32.xlu1 %v1145_v9, 256  ;;  %1140 = vbcast.lane.b32.xlu0 %v1138_v16, 256 }
 0x86f   :  { %1161 = vbcast.lane.b32.xlu1 %v1159_v34, 256  ;;  %1154 = vbcast.lane.b32.xlu0 %v1152_v25, 256 }
 0x8d5   :  { %v1120_v38 = vpop.permute.xlu1 %1119  ;;  %v1113_v27 = vpop.permute.xlu0 %1112 }
 0x8d6   :  { %v1164_v17 = vmul.f32 %v1120_v38, %v1719_v57  ;;  %v1187_v28 = vmul.f32 %v1120_v38, %v1713_v54  ;;  %v1163_v29 = vmul.f32 %v1113_v27, %v1711_v53  ;;  %v1186_v30 = vmul.f32 %v1113_v27, %v1709_v52 }
 0x8d8   :  { %v1172_v31 = vsel %vm242_vm3, %v1164_v17, 0.0  ;;  %v1195_v19 = vsel %vm242_vm3, %v1187_v28, 0.0  ;;  %v1171_v33 = vsel %vm242_vm3, %v1163_v29, 0.0  ;;  %v1194_v32 = vsel %vm242_vm3, %v1186_v30, 0.0 }
 0x8d9   :  { %v1134_v35 = vpop.permute.xlu1 %1133  ;;  %v1127_v36 = vpop.permute.xlu0 %1126  ;;  %v1173_v20 = vadd.f32 %v1172_v31, %v1171_v33  ;;  %v1196_v52 = vadd.f32 %v1195_v19, %v1194_v32 }
 0x8da   :  { %v1166_v22 = vmul.f32 %v1134_v35, %v1725_v7  ;;  %v1189_v57 = vmul.f32 %v1134_v35, %v1733_v11  ;;  %v1165_v54 = vmul.f32 %v1127_v36, %v1727_v8  ;;  %v1188_v53 = vmul.f32 %v1127_v36, %v1735_v12 }
 0x8dc   :  { %v1174_v37 = vsel %vm242_vm3, %v1165_v54, 0.0  ;;  %v1197_v40 = vsel %vm242_vm3, %v1188_v53, 0.0  ;;  %v1176_v41 = vsel %vm242_vm3, %v1166_v22, 0.0  ;;  %v1199_v21 = vsel %vm242_vm3, %v1189_v57, 0.0 }
 0x8dd   :  { %v1175_v42 = vadd.f32 %v1174_v37, %v1173_v20  ;;  %v1198_v43 = vadd.f32 %v1197_v40, %v1196_v52  ;;  %v1148_v49 = vpop.permute.xlu1 %1147  ;;  %v1141_v7 = vpop.permute.xlu0 %1140 }
 0x8de   :  { %v1168_v11 = vmul.f32 %v1148_v49, %v1741_v59  ;;  %v1191_v8 = vmul.f32 %v1148_v49, %v1749_v63  ;;  %v1167_v12 = vmul.f32 %v1141_v7, %v1743_v60  ;;  %v1190_v39 = vmul.f32 %v1141_v7, %v1751_v0 }
 0x8df   :  { %v1177_v10 = vadd.f32 %v1176_v41, %v1175_v42  ;;  %v1200_v58 = vadd.f32 %v1199_v21, %v1198_v43 }
 0x8e0   :  { %v1178_v62 = vsel %vm242_vm3, %v1167_v12, 0.0  ;;  %v1201_v2 = vsel %vm242_vm3, %v1190_v39, 0.0  ;;  %v1180_v50 = vsel %vm242_vm3, %v1168_v11, 0.0  ;;  %v1203_v5 = vsel %vm242_vm3, %v1191_v8, 0.0 }
 0x8e1   :  { %v1179_v24 = vadd.f32 %v1178_v62, %v1177_v10  ;;  %v1202_v46 = vadd.f32 %v1201_v2, %v1200_v58  ;;  %v1162_v44 = vpop.permute.xlu1 %1161  ;;  %v1155_v59 = vpop.permute.xlu0 %1154 }
 0x8e2   :  { %v1170_v63 = vmul.f32 %v1162_v44, %v1757_v3  ;;  %v1193_v60 = vmul.f32 %v1162_v44, %v1765_v14  ;;  %v1169_v0 = vmul.f32 %v1155_v59, %v1759_v4  ;;  %v1192_v26 = vmul.f32 %v1155_v59, %v1767_v15 }
 0x8e3   :  { %v1181_v55 = vadd.f32 %v1180_v50, %v1179_v24  ;;  %v1204_v47 = vadd.f32 %v1203_v5, %v1202_v46 }
 0x8e4   :  { %v1182_v23 = vsel %vm242_vm3, %v1169_v0, 0.0  ;;  %v1205_v45 = vsel %vm242_vm3, %v1192_v26, 0.0  ;;  %v1184_v13 = vsel %vm242_vm3, %v1170_v63, 0.0  ;;  %v1207_v51 = vsel %vm242_vm3, %v1193_v60, 0.0 }
 0x8e5   :  { %v1183_v48 = vadd.f32 %v1182_v23, %v1181_v55  ;;  %v1206_v1 = vadd.f32 %v1205_v45, %v1204_v47 }
 0x8e7   :  { %v1185_v6 = vadd.f32 %v1184_v13, %v1183_v48  ;;  %v1208_v3 = vadd.f32 %v1207_v51, %v1206_v1 }
 0x8e9   :  { %v1209_v14 = vpack.c.bf16 %v1185_v6, %v1185_v6  ;;  %v1289_v56 = vpack.c.bf16 %v1208_v3, %v1208_v3 }
 0x8eb   :  { %1216 = vrot.lane.b32.xlu0 %v1289_v56, %s1502_s15  ;;  %1211 = vst.msk [vmem:[%s2046_s14] sm:$0xf] %vm1210_vm15, %v1209_v14 }
 0x95d   :  { %v1217_v4 = vpop.permute.xlu0 %1216 }
 0x95e   :  { %1220 = vst.msk [vmem:[%s2046_s14] sm:$0xf] %vm1219_vm0, %v1217_v4 }

</bundles_post_ra>
